<compile_context>
chip_gen: v6e
topology: v6e:2x2x1
jax: 0.10.0
libtpu: 0.0.40
codegen_flags: <defaults>
</compile_context>

<pallas_src>
import functools

import jax
import jax.numpy as jnp
from jax.experimental import pallas as pl
from jax.experimental.pallas import tpu as pltpu

LRELU_SLOPE = 0.1  # model_config.leaky_relu_slope (HiFi-GAN default)


def get_padding(kernel_size, dilation=1):
    return (kernel_size * dilation - dilation) // 2


# (cin, cout, K, stride, padding) -- static layer configuration (matches the torch module)
LAYER_DEFS = (
    (1, 32, 5, 3, get_padding(5, 1)),
    (32, 128, 5, 3, get_padding(5, 1)),
    (128, 512, 5, 3, get_padding(5, 1)),
    (512, 1024, 5, 3, get_padding(5, 1)),
    (1024, 1024, 5, 1, 2),
    (1024, 1, 3, 1, 1),   # post_conv
)


def _round_up(x, m):
    return ((x + m - 1) // m) * m


@functools.lru_cache(maxsize=1)
def _tile_config():
    """Per-generation tile configuration, chosen once at trace time."""
    try:
        cap = getattr(pltpu.get_tpu_info(), "vmem_capacity_bytes", 0)
    except Exception:  # pragma: no cover - unknown part -> conservative config
        cap = 0
    if cap >= 100 * 1024 * 1024:
        # v5e / v6e: 128 MiB VMEM -> bigger blocks amortize per-step overhead.
        return dict(tm=1024, tn=512, vmem=64 * 1024 * 1024)
    # v7x (64 MiB physical) or unknown: conservative blocks, <=48 MiB scoped.
    return dict(tm=512, tn=256, vmem=48 * 1024 * 1024)


# ----------------------------- Pallas kernel --------------------------------
def _matmul_bias_act_kernel(x_ref, w_ref, b_ref, o_ref, *, slope, apply_act):
    # x_ref: (TM, K*Cin) bf16   w_ref: (K*Cin, TN) bf16   b_ref: (1, TN) f32
    acc = jnp.dot(x_ref[...], w_ref[...], preferred_element_type=jnp.float32)
    acc = acc + b_ref[...]
    if apply_act:
        acc = jnp.where(acc >= 0.0, acc, slope * acc)  # leaky_relu
    o_ref[...] = acc.astype(o_ref.dtype)


def conv_kh1(x_nhc, w2, b2, K, stride, padding, *, apply_act, slope=LRELU_SLOPE):
    """Conv2d with kernel (K, 1), stride (stride, 1), padding (padding, 0).

    x_nhc: (N, H, Cin) channels-last, N = batch * period.
    w2:    (K*Cin, Cout) pre-transposed, pre-weight-normed (bf16 for large Cout).
    b2:    (1, Cout) f32.
    Returns (N, Hout, Cout) in x_nhc.dtype.
    """
    N, H, Cin = x_nhc.shape
    KC, Cout = w2.shape
    assert KC == K * Cin
    Hout = (H + 2 * padding - K) // stride + 1

    # glue: pad along H, build im2col patches (M, K*Cin) in the matmul dtype.
    # TODO(synk): for the stride-1 1024-channel layers a halo-windowed (no-im2col)
    # variant would cut HBM read amplification further; kept im2col (in bf16) for
    # robustness of blocked indexing.
    x_pad = jnp.pad(x_nhc, ((0, 0), (padding, padding), (0, 0))).astype(w2.dtype)
    cols = [x_pad[:, k:k + stride * (Hout - 1) + 1:stride, :] for k in range(K)]
    xcol = jnp.stack(cols, axis=2).reshape(N * Hout, KC)
    M = N * Hout

    if Cout < 128:
        # Lane-sparse output (Cout in {32, 1}): masked stores + idle MXU -> plain XLA.
        acc = jnp.dot(xcol, w2, preferred_element_type=jnp.float32) + b2
        if apply_act:
            acc = jnp.where(acc >= 0.0, acc, slope * acc)
        return acc.astype(x_nhc.dtype).reshape(N, Hout, Cout)

    conf = _tile_config()
    tn = min(conf["tn"], Cout)
    assert Cout % tn == 0
    tm = min(conf["tm"], _round_up(M, 8))
    m_pad = _round_up(M, tm)
    if m_pad != M:
        xcol = jnp.pad(xcol, ((0, m_pad - M), (0, 0)))

    grid = (m_pad // tm, Cout // tn)  # Cout innermost: x tile stays resident across j

    itemsize = xcol.dtype.itemsize
    cost = pl.CostEstimate(
        flops=2 * m_pad * KC * Cout,
        transcendentals=0,
        bytes_accessed=(m_pad * KC * itemsize + KC * Cout * w2.dtype.itemsize
                        + Cout * 4 + m_pad * Cout * 4),
    )

    kernel = functools.partial(_matmul_bias_act_kernel, slope=slope,
                               apply_act=apply_act)

    out = pl.pallas_call(
        kernel,
        out_shape=jax.ShapeDtypeStruct((m_pad, Cout), jnp.float32),
        grid=grid,
        in_specs=[
            pl.BlockSpec((tm, KC), lambda i, j: (i, 0)),    # activation row tile
            pl.BlockSpec((KC, tn), lambda i, j: (0, j)),    # weight tile over Cout
            pl.BlockSpec((1, tn), lambda i, j: (0, j)),     # bias tile
        ],
        out_specs=pl.BlockSpec((tm, tn), lambda i, j: (i, j)),
        compiler_params=pltpu.CompilerParams(
            dimension_semantics=("parallel", "parallel"),
            vmem_limit_bytes=conf["vmem"],
        ),
        cost_estimate=cost,
    )(xcol, w2, b2)

    return out[:M].astype(x_nhc.dtype).reshape(N, Hout, Cout)


# ----------------------------- parameters ------------------------------------
def weight_norm_effective(v, g):
    # nn.utils.weight_norm (dim=0): w = g * v / ||v||, norm over (Cin, kH, kW) per out ch.
    norm = jnp.sqrt(jnp.sum(v * v, axis=(1, 2, 3), keepdims=True))
    return g * v / norm


def init_params(key):
    params = []
    for (cin, cout, k, _, _) in LAYER_DEFS:
        key, k1, k2, k3 = jax.random.split(key, 4)
        v = jax.random.normal(k1, (cout, cin, k, 1), jnp.float32) * 0.05
        g = jnp.abs(jax.random.normal(k2, (cout, 1, 1, 1), jnp.float32)) + 0.5
        b = jax.random.normal(k3, (cout,), jnp.float32) * 0.02
        params.append({"v": v, "g": g, "b": b})
    return params


def prepare_params(params):
    """Hoisted out of the forward: weight-norm + (K*Cin, Cout) transpose + dtype cast."""
    prepared = []
    for p, (cin, cout, k, _, _) in zip(params, LAYER_DEFS):
        w = weight_norm_effective(p["v"], p["g"])                    # (Cout, Cin, K, 1)
        w2 = jnp.transpose(w[:, :, :, 0], (2, 1, 0)).reshape(k * cin, cout)
        dtype = jnp.bfloat16 if cout >= 128 else jnp.float32         # bf16 MXU path
        prepared.append({"w2": w2.astype(dtype),
                         "b2": p["b"].reshape(1, cout).astype(jnp.float32)})
    return prepared


# ----------------------------- forward ---------------------------------------
@functools.partial(jax.jit, static_argnums=(2,))
def one_period_discriminator_forward(x, prepared, period):
    b, t = x.shape
    if t % period != 0:
        n_pad = period - t % period
        x = jnp.pad(x, ((0, 0), (0, n_pad)), mode="reflect")
        t = t + n_pad
    H = t // period
    x_nchw = x.reshape(b, 1, H, period)                          # (b, 1, H, W=period)
    # channels-last, fold period into batch: (b*period, H, 1)
    h = jnp.transpose(x_nchw, (0, 3, 2, 1)).reshape(b * period, H, 1)

    fmap = []
    n_layers = len(LAYER_DEFS)
    for i, ((cin, cout, K, stride, padding), layer) in enumerate(zip(LAYER_DEFS, prepared)):
        apply_act = i < n_layers - 1  # leaky_relu after each conv, none after post_conv
        h = conv_kh1(h, layer["w2"], layer["b2"], K, stride, padding,
                     apply_act=apply_act)
        Hc, Cc = h.shape[1], h.shape[2]
        h_nchw = jnp.transpose(h.reshape(b, period, Hc, Cc), (0, 3, 2, 1))
        fmap.append(h_nchw)

    x_out = fmap[-1].reshape(b, -1)  # torch.flatten(x, 1, -1) over (C=1, H, W)
    return x_out, fmap


# ----------------------------- main -------------------------------------------
if __name__ == "__main__":
    key = jax.random.PRNGKey(0)
    kx, kp = jax.random.split(key)

    batch, t, period = 2, 254, 4  # t % period != 0 -> exercises the reflect-pad path
    x = jax.random.normal(kx, (batch, t), jnp.float32)
    params = init_params(kp)
    prepared = prepare_params(params)

    out, fmap = one_period_discriminator_forward(x, prepared, period)
    (out, fmap) = jax.block_until_ready((out, fmap))

    assert out.shape[0] == batch
    assert len(fmap) == 6
    assert fmap[0].shape[1] == 32 and fmap[-1].shape[1] == 1
    print("KERNEL_OK")
</pallas_src>

<mosaic_0001>
module attributes {stable_mosaic.version = 11 : i64} {
  func.func @_matmul_bias_act_kernel(%arg0: i32, %arg1: i32, %arg2: memref<64x160xbf16, #tpu.memory_space<vmem>>, %arg3: memref<160x128xbf16, #tpu.memory_space<vmem>>, %arg4: memref<1x128xf32, #tpu.memory_space<vmem>>, %arg5: memref<64x128xf32, #tpu.memory_space<vmem>>) attributes {dimension_semantics = [#tpu.dimension_semantics<parallel>, #tpu.dimension_semantics<parallel>], iteration_bounds = array<i64: 1, 1>, scalar_prefetch = 0 : i64, scratch_operands = 0 : i64, tpu.core_type = #tpu.core_type<tc>, window_params = [{transform_indices = @transform_0, window_bounds = array<i64: 64, 160>}, {transform_indices = @transform_1, window_bounds = array<i64: 160, 128>}, {transform_indices = @transform_2, window_bounds = array<i64: 1, 128>}, {transform_indices = @transform_3, window_bounds = array<i64: 64, 128>}]} {
    %c0 = arith.constant 0 : index
    %c0_0 = arith.constant 0 : index
    %0 = vector.load %arg2[%c0, %c0_0] : memref<64x160xbf16, #tpu.memory_space<vmem>>, vector<64x160xbf16>
    %c0_1 = arith.constant 0 : index
    %c0_2 = arith.constant 0 : index
    %1 = vector.load %arg3[%c0_1, %c0_2] : memref<160x128xbf16, #tpu.memory_space<vmem>>, vector<160x128xbf16>
    %cst = arith.constant dense<0.000000e+00> : vector<64x128xf32>
    %2 = tpu.matmul %0, %1, %cst {dimension_numbers = #tpu.dot_dimension_numbers<[1], [0], [0], [1], [0, 0, 1, 1], [], []>} : vector<64x160xbf16>, vector<160x128xbf16>, vector<64x128xf32> -> vector<64x128xf32>
    %c0_3 = arith.constant 0 : index
    %c0_4 = arith.constant 0 : index
    %3 = vector.load %arg4[%c0_3, %c0_4] : memref<1x128xf32, #tpu.memory_space<vmem>>, vector<1x128xf32>
    %4 = vector.broadcast %3 : vector<1x128xf32> to vector<64x128xf32>
    %5 = arith.addf %2, %4 : vector<64x128xf32>
    %cst_5 = arith.constant 0.000000e+00 : f32
    %6 = vector.broadcast %cst_5 : f32 to vector<64x128xf32>
    %7 = arith.cmpf oge, %5, %6 : vector<64x128xf32>
    %cst_6 = arith.constant 1.000000e-01 : f32
    %8 = vector.broadcast %cst_6 : f32 to vector<64x128xf32>
    %9 = arith.mulf %8, %5 : vector<64x128xf32>
    %10 = arith.select %7, %5, %9 : vector<64x128xi1>, vector<64x128xf32>
    %c0_7 = arith.constant 0 : index
    %c0_8 = arith.constant 0 : index
    %11 = vector.load %arg5[%c0_7, %c0_8] : memref<64x128xf32, #tpu.memory_space<vmem>>, vector<64x128xf32>
    tpu.vector_store %arg5[%c0_7, %c0_8], %10 {strides = array<i32>} : memref<64x128xf32, #tpu.memory_space<vmem>>, vector<64x128xf32>,
    return
  }
  func.func @transform_0(%arg0: i32, %arg1: i32) -> (i32, i32) {
    %c0_i32 = arith.constant 0 : i32
    %c0_i32_0 = arith.constant 0 : i32
    return %arg0, %c0_i32 : i32, i32
  }
  func.func @transform_1(%arg0: i32, %arg1: i32) -> (i32, i32) {
    %c0_i32 = arith.constant 0 : i32
    %c0_i32_0 = arith.constant 0 : i32
    return %c0_i32, %arg1 : i32, i32
  }
  func.func @transform_2(%arg0: i32, %arg1: i32) -> (i32, i32) {
    %c0_i32 = arith.constant 0 : i32
    %c0_i32_0 = arith.constant 0 : i32
    return %c0_i32, %arg1 : i32, i32
  }
  func.func @transform_3(%arg0: i32, %arg1: i32) -> (i32, i32) {
    %c0_i32 = arith.constant 0 : i32
    return %arg0, %arg1 : i32, i32
  }
}

module attributes {stable_mosaic.version = 11 : i64} {
  func.func @_matmul_bias_act_kernel(%arg0: i32, %arg1: i32, %arg2: memref<24x640xbf16, #tpu.memory_space<vmem>>, %arg3: memref<640x256xbf16, #tpu.memory_space<vmem>>, %arg4: memref<1x256xf32, #tpu.memory_space<vmem>>, %arg5: memref<24x256xf32, #tpu.memory_space<vmem>>) attributes {dimension_semantics = [#tpu.dimension_semantics<parallel>, #tpu.dimension_semantics<parallel>], iteration_bounds = array<i64: 1, 2>, scalar_prefetch = 0 : i64, scratch_operands = 0 : i64, tpu.core_type = #tpu.core_type<tc>, window_params = [{transform_indices = @transform_0, window_bounds = array<i64: 24, 640>}, {transform_indices = @transform_1, window_bounds = array<i64: 640, 256>}, {transform_indices = @transform_2, window_bounds = array<i64: 1, 256>}, {transform_indices = @transform_3, window_bounds = array<i64: 24, 256>}]} {
    %c0 = arith.constant 0 : index
    %c0_0 = arith.constant 0 : index
    %0 = vector.load %arg2[%c0, %c0_0] : memref<24x640xbf16, #tpu.memory_space<vmem>>, vector<24x640xbf16>
    %c0_1 = arith.constant 0 : index
    %c0_2 = arith.constant 0 : index
    %1 = vector.load %arg3[%c0_1, %c0_2] : memref<640x256xbf16, #tpu.memory_space<vmem>>, vector<640x256xbf16>
    %cst = arith.constant dense<0.000000e+00> : vector<24x256xf32>
    %2 = tpu.matmul %0, %1, %cst {dimension_numbers = #tpu.dot_dimension_numbers<[1], [0], [0], [1], [0, 0, 1, 1], [], []>} : vector<24x640xbf16>, vector<640x256xbf16>, vector<24x256xf32> -> vector<24x256xf32>
    %c0_3 = arith.constant 0 : index
    %c0_4 = arith.constant 0 : index
    %3 = vector.load %arg4[%c0_3, %c0_4] : memref<1x256xf32, #tpu.memory_space<vmem>>, vector<1x256xf32>
    %4 = vector.broadcast %3 : vector<1x256xf32> to vector<24x256xf32>
    %5 = arith.addf %2, %4 : vector<24x256xf32>
    %cst_5 = arith.constant 0.000000e+00 : f32
    %6 = vector.broadcast %cst_5 : f32 to vector<24x256xf32>
    %7 = arith.cmpf oge, %5, %6 : vector<24x256xf32>
    %cst_6 = arith.constant 1.000000e-01 : f32
    %8 = vector.broadcast %cst_6 : f32 to vector<24x256xf32>
    %9 = arith.mulf %8, %5 : vector<24x256xf32>
    %10 = arith.select %7, %5, %9 : vector<24x256xi1>, vector<24x256xf32>
    %c0_7 = arith.constant 0 : index
    %c0_8 = arith.constant 0 : index
    %11 = vector.load %arg5[%c0_7, %c0_8] : memref<24x256xf32, #tpu.memory_space<vmem>>, vector<24x256xf32>
    tpu.vector_store %arg5[%c0_7, %c0_8], %10 {strides = array<i32>} : memref<24x256xf32, #tpu.memory_space<vmem>>, vector<24x256xf32>,
    return
  }
  func.func @transform_0(%arg0: i32, %arg1: i32) -> (i32, i32) {
    %c0_i32 = arith.constant 0 : i32
    %c0_i32_0 = arith.constant 0 : i32
    return %arg0, %c0_i32 : i32, i32
  }
  func.func @transform_1(%arg0: i32, %arg1: i32) -> (i32, i32) {
    %c0_i32 = arith.constant 0 : i32
    %c0_i32_0 = arith.constant 0 : i32
    return %c0_i32, %arg1 : i32, i32
  }
  func.func @transform_2(%arg0: i32, %arg1: i32) -> (i32, i32) {
    %c0_i32 = arith.constant 0 : i32
    %c0_i32_0 = arith.constant 0 : i32
    return %c0_i32, %arg1 : i32, i32
  }
  func.func @transform_3(%arg0: i32, %arg1: i32) -> (i32, i32) {
    %c0_i32 = arith.constant 0 : i32
    return %arg0, %arg1 : i32, i32
  }
}

module attributes {stable_mosaic.version = 11 : i64} {
  func.func @_matmul_bias_act_kernel(%arg0: i32, %arg1: i32, %arg2: memref<8x2560xbf16, #tpu.memory_space<vmem>>, %arg3: memref<2560x256xbf16, #tpu.memory_space<vmem>>, %arg4: memref<1x256xf32, #tpu.memory_space<vmem>>, %arg5: memref<8x256xf32, #tpu.memory_space<vmem>>) attributes {dimension_semantics = [#tpu.dimension_semantics<parallel>, #tpu.dimension_semantics<parallel>], iteration_bounds = array<i64: 1, 4>, scalar_prefetch = 0 : i64, scratch_operands = 0 : i64, tpu.core_type = #tpu.core_type<tc>, window_params = [{transform_indices = @transform_0, window_bounds = array<i64: 8, 2560>}, {transform_indices = @transform_1, window_bounds = array<i64: 2560, 256>}, {transform_indices = @transform_2, window_bounds = array<i64: 1, 256>}, {transform_indices = @transform_3, window_bounds = array<i64: 8, 256>}]} {
    %c0 = arith.constant 0 : index
    %c0_0 = arith.constant 0 : index
    %0 = vector.load %arg2[%c0, %c0_0] : memref<8x2560xbf16, #tpu.memory_space<vmem>>, vector<8x2560xbf16>
    %c0_1 = arith.constant 0 : index
    %c0_2 = arith.constant 0 : index
    %1 = vector.load %arg3[%c0_1, %c0_2] : memref<2560x256xbf16, #tpu.memory_space<vmem>>, vector<2560x256xbf16>
    %cst = arith.constant dense<0.000000e+00> : vector<8x256xf32>
    %2 = tpu.matmul %0, %1, %cst {dimension_numbers = #tpu.dot_dimension_numbers<[1], [0], [0], [1], [0, 0, 1, 1], [], []>} : vector<8x2560xbf16>, vector<2560x256xbf16>, vector<8x256xf32> -> vector<8x256xf32>
    %c0_3 = arith.constant 0 : index
    %c0_4 = arith.constant 0 : index
    %3 = vector.load %arg4[%c0_3, %c0_4] : memref<1x256xf32, #tpu.memory_space<vmem>>, vector<1x256xf32>
    %4 = vector.broadcast %3 : vector<1x256xf32> to vector<8x256xf32>
    %5 = arith.addf %2, %4 : vector<8x256xf32>
    %cst_5 = arith.constant 0.000000e+00 : f32
    %6 = vector.broadcast %cst_5 : f32 to vector<8x256xf32>
    %7 = arith.cmpf oge, %5, %6 : vector<8x256xf32>
    %cst_6 = arith.constant 1.000000e-01 : f32
    %8 = vector.broadcast %cst_6 : f32 to vector<8x256xf32>
    %9 = arith.mulf %8, %5 : vector<8x256xf32>
    %10 = arith.select %7, %5, %9 : vector<8x256xi1>, vector<8x256xf32>
    %c0_7 = arith.constant 0 : index
    %c0_8 = arith.constant 0 : index
    %11 = vector.load %arg5[%c0_7, %c0_8] : memref<8x256xf32, #tpu.memory_space<vmem>>, vector<8x256xf32>
    tpu.vector_store %arg5[%c0_7, %c0_8], %10 {strides = array<i32>} : memref<8x256xf32, #tpu.memory_space<vmem>>, vector<8x256xf32>,
    return
  }
  func.func @transform_0(%arg0: i32, %arg1: i32) -> (i32, i32) {
    %c0_i32 = arith.constant 0 : i32
    %c0_i32_0 = arith.constant 0 : i32
    return %arg0, %c0_i32 : i32, i32
  }
  func.func @transform_1(%arg0: i32, %arg1: i32) -> (i32, i32) {
    %c0_i32 = arith.constant 0 : i32
    %c0_i32_0 = arith.constant 0 : i32
    return %c0_i32, %arg1 : i32, i32
  }
  func.func @transform_2(%arg0: i32, %arg1: i32) -> (i32, i32) {
    %c0_i32 = arith.constant 0 : i32
    %c0_i32_0 = arith.constant 0 : i32
    return %c0_i32, %arg1 : i32, i32
  }
  func.func @transform_3(%arg0: i32, %arg1: i32) -> (i32, i32) {
    %c0_i32 = arith.constant 0 : i32
    return %arg0, %arg1 : i32, i32
  }
}

module attributes {stable_mosaic.version = 11 : i64} {
  func.func @_matmul_bias_act_kernel(%arg0: i32, %arg1: i32, %arg2: memref<8x5120xbf16, #tpu.memory_space<vmem>>, %arg3: memref<5120x256xbf16, #tpu.memory_space<vmem>>, %arg4: memref<1x256xf32, #tpu.memory_space<vmem>>, %arg5: memref<8x256xf32, #tpu.memory_space<vmem>>) attributes {dimension_semantics = [#tpu.dimension_semantics<parallel>, #tpu.dimension_semantics<parallel>], iteration_bounds = array<i64: 1, 4>, scalar_prefetch = 0 : i64, scratch_operands = 0 : i64, tpu.core_type = #tpu.core_type<tc>, window_params = [{transform_indices = @transform_0, window_bounds = array<i64: 8, 5120>}, {transform_indices = @transform_1, window_bounds = array<i64: 5120, 256>}, {transform_indices = @transform_2, window_bounds = array<i64: 1, 256>}, {transform_indices = @transform_3, window_bounds = array<i64: 8, 256>}]} {
    %c0 = arith.constant 0 : index
    %c0_0 = arith.constant 0 : index
    %0 = vector.load %arg2[%c0, %c0_0] : memref<8x5120xbf16, #tpu.memory_space<vmem>>, vector<8x5120xbf16>
    %c0_1 = arith.constant 0 : index
    %c0_2 = arith.constant 0 : index
    %1 = vector.load %arg3[%c0_1, %c0_2] : memref<5120x256xbf16, #tpu.memory_space<vmem>>, vector<5120x256xbf16>
    %cst = arith.constant dense<0.000000e+00> : vector<8x256xf32>
    %2 = tpu.matmul %0, %1, %cst {dimension_numbers = #tpu.dot_dimension_numbers<[1], [0], [0], [1], [0, 0, 1, 1], [], []>} : vector<8x5120xbf16>, vector<5120x256xbf16>, vector<8x256xf32> -> vector<8x256xf32>
    %c0_3 = arith.constant 0 : index
    %c0_4 = arith.constant 0 : index
    %3 = vector.load %arg4[%c0_3, %c0_4] : memref<1x256xf32, #tpu.memory_space<vmem>>, vector<1x256xf32>
    %4 = vector.broadcast %3 : vector<1x256xf32> to vector<8x256xf32>
    %5 = arith.addf %2, %4 : vector<8x256xf32>
    %cst_5 = arith.constant 0.000000e+00 : f32
    %6 = vector.broadcast %cst_5 : f32 to vector<8x256xf32>
    %7 = arith.cmpf oge, %5, %6 : vector<8x256xf32>
    %cst_6 = arith.constant 1.000000e-01 : f32
    %8 = vector.broadcast %cst_6 : f32 to vector<8x256xf32>
    %9 = arith.mulf %8, %5 : vector<8x256xf32>
    %10 = arith.select %7, %5, %9 : vector<8x256xi1>, vector<8x256xf32>
    %c0_7 = arith.constant 0 : index
    %c0_8 = arith.constant 0 : index
    %11 = vector.load %arg5[%c0_7, %c0_8] : memref<8x256xf32, #tpu.memory_space<vmem>>, vector<8x256xf32>
    tpu.vector_store %arg5[%c0_7, %c0_8], %10 {strides = array<i32>} : memref<8x256xf32, #tpu.memory_space<vmem>>, vector<8x256xf32>,
    return
  }
  func.func @transform_0(%arg0: i32, %arg1: i32) -> (i32, i32) {
    %c0_i32 = arith.constant 0 : i32
    %c0_i32_0 = arith.constant 0 : i32
    return %arg0, %c0_i32 : i32, i32
  }
  func.func @transform_1(%arg0: i32, %arg1: i32) -> (i32, i32) {
    %c0_i32 = arith.constant 0 : i32
    %c0_i32_0 = arith.constant 0 : i32
    return %c0_i32, %arg1 : i32, i32
  }
  func.func @transform_2(%arg0: i32, %arg1: i32) -> (i32, i32) {
    %c0_i32 = arith.constant 0 : i32
    %c0_i32_0 = arith.constant 0 : i32
    return %c0_i32, %arg1 : i32, i32
  }
  func.func @transform_3(%arg0: i32, %arg1: i32) -> (i32, i32) {
    %c0_i32 = arith.constant 0 : i32
    return %arg0, %arg1 : i32, i32
  }
}

</mosaic_0001>

<bundles_post_ra>
// kernel: one_period_discriminator_forward.4
= control target key start
LH: loop header
LB: loop body
LE: loop exit
PB: predicated region body
PF: predicated region fallthrough
CT: control target
= control target key end

     0   :  { %8 = vsyncpa [#allocation3], 0  ;;  %s485_s0 = inlined_call_operand.vmem [shape: bf16[64,160], index: 0, kind: input, shape index: {}]   ;;  %s486_s1 = inlined_call_operand.hbm [shape: bf16[160,128], index: 1, kind: input, shape index: {}]   ;;  %s487_s2 = inlined_call_operand.hbm [shape: f32[1,128], index: 2, kind: input, shape index: {}]   ;;  %s488_s3 = inlined_call_operand.vmem [shape: f32[64,128], index: 3, kind: output, shape index: {}]  }
   0x1   :  { %9 = vsyncpa [#allocation5], 0  ;;  %s402_s12 = smov [#allocation2]  }
   0x2   :  { %s17_s13 = sshll.u32 %s402_s12, 4  ;;  %s18_s13 = int_to_ptr.vmem [resolvable:$true] %s17_s13 }
   0x3   :  { %s366_s14 = scalar_lea.vmem %s18_s13, 1280  ;;  %p371_p1 = scmp.lt.s32.totalorder %s18_s13, %s18_s13 }
   0x4   :  { %p367_p0 = scmp.ne.s32.totalorder %s18_s13, %s366_s14  ;;  %p372_p2 = scmp.lt.s32.totalorder %s366_s14, %s366_s14 }
   0x6   :  { %p373_p3 = por %p372_p2, %p371_p1 }
   0x8   :  { %p374_p4 = pnand %p373_p3, %p367_p0 }
   0xa   :  { %377 = shalt.err (!%p374_p4)
}
   0xb   :  { %s403_s15 = smov 64   ;;  %s404_s16 = smov 4  }
   0xc   :  { %23 = dma.hbm_to_vmem [thread:$0]  %s486_s1, 1280, %s18_s13, [#allocation3], %s403_s15, %s403_s15, %s404_s16  }
   0xd   :  { %s405_s19 = smov [#allocation4]  }
   0xe   :  { %s30_s20 = sshll.u32 %s405_s19, 4  ;;  %s31_s20 = int_to_ptr.vmem [resolvable:$true] %s30_s20 }
   0xf   :  { %s386_s21 = scalar_lea.vmem %s31_s20, 16  ;;  %s390_s22 = scalar_lea.vmem %s31_s20, 32 }
  0x10   :  { %p387_p5 = scmp.ne.s32.totalorder %s31_s20, %s386_s21  ;;  %p391_p6 = scmp.lt.s32.totalorder %s31_s20, %s31_s20 }
  0x11   :  { %p392_p7 = scmp.lt.s32.totalorder %s390_s22, %s386_s21 }
  0x13   :  { %p393_p8 = por %p392_p7, %p391_p6 }
  0x15   :  { %p394_p9 = pnand %p393_p8, %p387_p5 }
  0x17   :  { %397 = shalt.err (!%p394_p9)
}
  0x18   :  { %33 = dma.hbm_to_vmem [thread:$0]  %s487_s2, 16, %s31_s20, [#allocation5]  }
  0x19   :  { %398 = dma.done.wait [#allocation3], 1280  }
  0x1a   :  { %399 = vsyncadd [#allocation3], 4294966016 }
  0x1b   :  { %400 = dma.done.wait [#allocation5], 16  }
  0x1c   :  { %401 = vsyncadd [#allocation5], 4294967280  ;;  %v406_v0 = vmov 0   ;;  %v336_v1 = vld [vmem:[#allocation2 + $0x38] sm:$0xff]   ;;  %v337_v2 = vld [vmem:[#allocation2 + $0x30] sm:$0xff]   ;;  %vm172_vm0 = vcmask 261120  }
  0x1d   :  { %185 = vmatprep.subr.bf16.mxu0 %v406_v0  ;;  %311 = vmatprep.subr.bf16.mxu1 %v406_v0  ;;  %v338_v3 = vld [vmem:[#allocation2 + $0x28] sm:$0xff]   ;;  %v339_v4 = vld [vmem:[#allocation2 + $0x20] sm:$0xff]   ;;  %v340_v7 = vld [vmem:[#allocation2 + $0x18] sm:$0xff]  }
  0x1e   :  { %186 = vmatpush1.bf16.msra.mxu0 %v336_v1  ;;  %321 = vmatpush1.bf16.msra.mxu1 %v336_v1  ;;  %v348_v5 = vld [vmem:[%s485_s0 + $0x4] ss:$8 sps:$4 sm:$0xff]   ;;  %v341_v8 = vld [vmem:[#allocation2 + $0x10] sm:$0xff]   ;;  %v346_v13 = vld [vmem:[%s485_s0] ss:$8 sps:$4 sm:$0xff]  }
  0x1f   :  { %187 = vmatprep.subr.bf16.mxu0 %v406_v0  ;;  %312 = vmatprep.subr.bf16.mxu1 %v406_v0  ;;  %v351_v6 = vld [vmem:[%s485_s0 + $0x24] ss:$8 sps:$4 sm:$0xff]   ;;  %v349_v14 = vld [vmem:[%s485_s0 + $0x20] ss:$8 sps:$4 sm:$0xff]   ;;  %v352_v15 = vld [vmem:[%s485_s0 + $0x14] ss:$8 sps:$4 sm:$0xff]  }
  0x20   :  { %307 = vmatprep.mubr.msk.bf16.mxu0 %vm172_vm0, %v348_v5  ;;  %309 = vmatprep.mubr.msk.bf16.mxu1 %vm172_vm0, %v351_v6  ;;  %v342_v9 = vld [vmem:[#allocation2 + $0x8] sm:$0xff]   ;;  %v343_v10 = vld [vmem:[#allocation2] sm:$0xff]   ;;  %v354_v16 = vld [vmem:[%s485_s0 + $0x34] ss:$8 sps:$4 sm:$0xff]  }
  0x21   :  { %v344_v11 = vld [vmem:[#allocation2 + $0x48] sm:$0xff]   ;;  %v345_v12 = vld [vmem:[#allocation2 + $0x40] sm:$0xff]   ;;  %v356_v17 = vld [vmem:[%s485_s0 + $0x10] ss:$8 sps:$4 sm:$0xff]  }
  0x22   :  { %188 = vmatpush1.bf16.msra.mxu0 %v337_v2  ;;  %322 = vmatpush1.bf16.msra.mxu1 %v337_v2  ;;  %v357_v18 = vld [vmem:[%s485_s0 + $0x30] ss:$8 sps:$4 sm:$0xff]  }
  0x23   :  { %189 = vmatprep.subr.bf16.mxu0 %v406_v0  ;;  %313 = vmatprep.subr.bf16.mxu1 %v406_v0  ;;  %v288_v19 = vld [vmem:[#allocation4] ss:$0 sm:$0xff] }
  0x26   :  { %190 = vmatpush1.bf16.msra.mxu0 %v338_v3  ;;  %323 = vmatpush1.bf16.msra.mxu1 %v338_v3 }
  0x27   :  { %191 = vmatprep.subr.bf16.mxu0 %v406_v0  ;;  %314 = vmatprep.subr.bf16.mxu1 %v406_v0 }
  0x2a   :  { %192 = vmatpush1.bf16.msra.mxu0 %v339_v4  ;;  %324 = vmatpush1.bf16.msra.mxu1 %v339_v4 }
  0x2b   :  { %193 = vmatprep.subr.bf16.mxu0 %v406_v0  ;;  %315 = vmatprep.subr.bf16.mxu1 %v406_v0 }
  0x2e   :  { %194 = vmatpush1.bf16.msra.mxu0 %v340_v7  ;;  %325 = vmatpush1.bf16.msra.mxu1 %v340_v7 }
  0x2f   :  { %195 = vmatprep.subr.bf16.mxu0 %v406_v0  ;;  %316 = vmatprep.subr.bf16.mxu1 %v406_v0 }
  0x32   :  { %196 = vmatpush1.bf16.msra.mxu0 %v341_v8  ;;  %326 = vmatpush1.bf16.msra.mxu1 %v341_v8 }
  0x33   :  { %197 = vmatprep.subr.bf16.mxu0 %v406_v0  ;;  %317 = vmatprep.subr.bf16.mxu1 %v406_v0 }
  0x36   :  { %198 = vmatpush1.bf16.msra.mxu0 %v342_v9  ;;  %327 = vmatpush1.bf16.msra.mxu1 %v342_v9 }
  0x37   :  { %199 = vmatprep.subr.bf16.mxu0 %v406_v0  ;;  %318 = vmatprep.subr.bf16.mxu1 %v406_v0 }
  0x3a   :  { %200 = vmatpush1.bf16.msra.mxu0 %v343_v10  ;;  %328 = vmatpush1.bf16.msra.mxu1 %v343_v10 }
  0x3b   :  { %213 = vmatprep.subr.bf16.mxu0 %v406_v0  ;;  %319 = vmatprep.subr.bf16.mxu1 %v406_v0 }
  0x3e   :  { %214 = vmatpush2.bf16.msra.mxu0 %v344_v11  ;;  %329 = vmatpush2.bf16.msra.mxu1 %v344_v11 }
  0x3f   :  { %215 = vmatprep.subr.bf16.mxu0 %v406_v0  ;;  %320 = vmatprep.subr.bf16.mxu1 %v406_v0 }
  0x42   :  { %216 = vmatpush2.bf16.msra.mxu0 %v345_v12  ;;  %330 = vmatpush2.bf16.msra.mxu1 %v345_v12 }
  0x45   :  { %218 = vmatmul.mubr.bf16.vlgmr.msra.gmra.mxu0 %v346_v13  ;;  %234 = vmatmul.mubr.bf16.vlgmr.msra.gmra.mxu1 %v349_v14 }
  0x46   :  { %308 = vmatprep.mubr.msk.bf16.mxu0 %vm172_vm0, %v352_v15  ;;  %310 = vmatprep.mubr.msk.bf16.mxu1 %vm172_vm0, %v354_v16 }
  0x4d   :  { %226 = vmatmul.mubr.bf16.gmra.mxu0 %v356_v17  ;;  %242 = vmatmul.mubr.bf16.gmra.mxu1 %v357_v18 }
 0x105   :  { %v219_v20 = vpop.f32.mrf.mxu0  ;;  %v235_v21 = vpop.f32.mrf.mxu1 }
 0x106   :  { %v220_v22 = vadd.f32 %v288_v19, %v219_v20  ;;  %v236_v23 = vadd.f32 %v288_v19, %v235_v21 }
 0x107   :  { %v221_v24 = vpop.f32.mrf.mxu0  ;;  %v237_v25 = vpop.f32.mrf.mxu1 }
 0x108   :  { %vm250_vm1 = vcmp.ge.f32.partialorder %v220_v22, 0.0  ;;  %v258_v26 = vmul.f32 0.1, %v220_v22  ;;  %vm254_vm2 = vcmp.ge.f32.partialorder %v236_v23, 0.0  ;;  %v262_v27 = vmul.f32 0.1, %v236_v23 }
 0x109   :  { %v222_v28 = vpop.f32.mrf.mxu0  ;;  %v238_v29 = vpop.f32.mrf.mxu1 }
 0x10a   :  { %v266_v30 = vsel %vm250_vm1, %v220_v22, %v258_v26  ;;  %v270_v31 = vsel %vm254_vm2, %v236_v23, %v262_v27  ;;  %v223_v32 = vadd.f32 %v288_v19, %v222_v28  ;;  %v239_v33 = vadd.f32 %v288_v19, %v238_v29 }
 0x10b   :  { %274 = vst [vmem:[%s488_s3] sm:$0xff] %v266_v30  ;;  %278 = vst [vmem:[%s488_s3 + $0x20] sm:$0xff] %v270_v31  ;;  %v224_v34 = vpop.f32.mrf.mxu0  ;;  %v240_v35 = vpop.f32.mrf.mxu1 }
 0x10c   :  { %vm251_vm3 = vcmp.ge.f32.partialorder %v223_v32, 0.0  ;;  %v259_v36 = vmul.f32 0.1, %v223_v32  ;;  %vm255_vm4 = vcmp.ge.f32.partialorder %v239_v33, 0.0  ;;  %v263_v37 = vmul.f32 0.1, %v239_v33 }
 0x10d   :  { %v227_v38 = vpop.f32.mrf.mxu0  ;;  %v243_v39 = vpop.f32.mrf.mxu1 }
 0x10e   :  { %v267_v40 = vsel %vm251_vm3, %v223_v32, %v259_v36  ;;  %v271_v41 = vsel %vm255_vm4, %v239_v33, %v263_v37  ;;  %v228_v42 = vadd.f32 %v288_v19, %v227_v38  ;;  %v244_v43 = vadd.f32 %v288_v19, %v243_v39 }
 0x10f   :  { %275 = vst [vmem:[%s488_s3 + $0x8] sm:$0xff] %v267_v40  ;;  %279 = vst [vmem:[%s488_s3 + $0x28] sm:$0xff] %v271_v41  ;;  %v229_v44 = vpop.f32.mrf.mxu0  ;;  %v245_v45 = vpop.f32.mrf.mxu1 }
 0x110   :  { %vm252_vm5 = vcmp.ge.f32.partialorder %v228_v42, 0.0  ;;  %v260_v46 = vmul.f32 0.1, %v228_v42  ;;  %vm256_vm6 = vcmp.ge.f32.partialorder %v244_v43, 0.0  ;;  %v264_v47 = vmul.f32 0.1, %v244_v43 }
 0x111   :  { %v230_v48 = vpop.f32.mrf.mxu0  ;;  %v246_v49 = vpop.f32.mrf.mxu1 }
 0x112   :  { %v268_v50 = vsel %vm252_vm5, %v228_v42, %v260_v46  ;;  %v272_v51 = vsel %vm256_vm6, %v244_v43, %v264_v47  ;;  %v231_v52 = vadd.f32 %v288_v19, %v230_v48  ;;  %v247_v53 = vadd.f32 %v288_v19, %v246_v49 }
 0x113   :  { %276 = vst [vmem:[%s488_s3 + $0x10] sm:$0xff] %v268_v50  ;;  %280 = vst [vmem:[%s488_s3 + $0x30] sm:$0xff] %v272_v51  ;;  %v232_v54 = vpop.f32.mrf.mxu0  ;;  %v248_v55 = vpop.f32.mrf.mxu1 }
 0x114   :  { %vm253_vm7 = vcmp.ge.f32.partialorder %v231_v52, 0.0  ;;  %v261_v56 = vmul.f32 0.1, %v231_v52  ;;  %vm257_vm8 = vcmp.ge.f32.partialorder %v247_v53, 0.0  ;;  %v265_v57 = vmul.f32 0.1, %v247_v53 }
 0x116   :  { %v269_v58 = vsel %vm253_vm7, %v231_v52, %v261_v56  ;;  %v273_v59 = vsel %vm257_vm8, %v247_v53, %v265_v57 }
 0x117   :  { %277 = vst [vmem:[%s488_s3 + $0x18] sm:$0xff] %v269_v58  ;;  %281 = vst [vmem:[%s488_s3 + $0x38] sm:$0xff] %v273_v59 }
 0x118   :  { %286 = vsyncpa [#allocation3], 1 }
 0x119   :  { %287 = vsyncpa [#allocation5], 1 }

// kernel: one_period_discriminator_forward.5
= control target key start
LH: loop header
LB: loop body
LE: loop exit
PB: predicated region body
PF: predicated region fallthrough
CT: control target
= control target key end

     0   :  { %8 = vsyncpa [#allocation3], 0  ;;  %s1849_s0 = inlined_call_operand.vmem [shape: bf16[24,640], index: 0, kind: input, shape index: {}]   ;;  %s1850_s1 = inlined_call_operand.hbm [shape: bf16[640,512], index: 1, kind: input, shape index: {}]   ;;  %s1851_s2 = inlined_call_operand.hbm [shape: f32[1,512], index: 2, kind: input, shape index: {}]   ;;  %s1852_s3 = inlined_call_operand.vmem [shape: f32[24,512], index: 3, kind: output, shape index: {}]  }
   0x1   :  { %10 = vsyncpa [#allocation3 + $0x1], 0 }
   0x2   :  { %11 = vsyncpa [#allocation5], 0 }
   0x3   :  { %13 = vsyncpa [#allocation5 + $0x1], 0  ;;  %s1602_s12 = smov 0   ;;  %s1604_s13 = smov 0  }
   0x4   :  { %s1606_s14 = smov 0   ;;  %s1608_s15 = smov 0  }
   0x5   :  { %s1610_s16 = smov 0   ;;  %s1612_s17 = smov 0  }
   0x6 LB: > { %s1140_s18 = sadd.s32 4294967295, %s1574_s17   ;;  %s28_s19 = sadd.s32 1, %s1570_s16  ;;  %s1574_s17 = sphi %s1612_s17, %s19_s17   ;;  %s1570_s16 = sphi %s1610_s16, %s1862_s16   ;;  %s1566_s15 = sphi %s1608_s15, %s1861_s15   ;;  %s1562_s14 = sphi %s1606_s14, %s1860_s14   ;;  %s1558_s13 = sphi %s1604_s13, %s1859_s13   ;;  %s1554_s12 = sphi %s1602_s12, %s1858_s12  }
   0x7   : > { %p29_p0 = scmp.ge.s32.totalorder %s28_s19, 2  ;;  %s64_s20 = sadd.s32 1, %s1562_s14 }
   0x8   : > { %p71_p1 = scmp.ne.s32.totalorder %s1562_s14, %s1558_s13  ;;  %p72_p2 = scmp.eq.s32.totalorder %s1574_s17, 0 }
   0x9   : > { %s1864_s19 = smov (%p29_p0, %s28_s19), 0  ;;  %p77_p4 = scmp.ne.s32.totalorder %s1558_s13, %s1554_s12 }
   0xa   : > { %p1638_p3 = por %p72_p2, %p71_p1  ;;  %s61_s22 = ssub.s32 %s1570_s16, %s1864_s19 }
   0xb   : > { %p78_p5 = scmp.eq.s32.totalorder %s1140_s18, 0  ;;  %p62_p6 = scmp.eq.s32.totalorder %s61_s22, 0 }
   0xc   : > { %p129_p7 = scmp.eq.s32.totalorder %s1140_s18, 1  ;;  %p1279_p10 = scmp.lt.s32.totalorder %s1574_s17, 2 }
   0xd   : > { %p1645_p8 = por %p78_p5, %p77_p4  ;;  %s1658_s26 = sand.u32 1, %s1562_s14  }
   0xe   : > { %s1650_s24 = scalar_select %p62_p6, %s1562_s14, %s64_s20  }
   0xf   : > { %p1652_p9 = por %p129_p7, %p71_p1  ;;  %s1246_s27 = sshll.u32 %s1570_s16, 7 }
  0x10   : > { %s1265_s28 = smul.u32 640, %s1658_s26  ;;  %s175_s4 = scalar_lea.hbm %s1850_s1, %s1246_s27 }
  0x11   : > { %p1667_p11 = pnand %p1279_p10, %p1638_p3  ;;  %p1150_p12 = scmp.ge.s32.totalorder %s1574_s17, 1 }
  0x12   : > { %s169_s6 = scalar_lea.vmem [#allocation2], %s1265_s28  ;;  %s166_s8 = scalar_lea.sflag [#allocation3], %s1658_s26 }
  0x13   : > { %s176_s7 = sshll.u32 %s169_s6, 4  ;;  %p1466_p13 = pneg %p1667_p11  ;;  %s177_s7 = int_to_ptr.vmem [resolvable:$true] %s176_s7 }
  0x14   : > { %s1477_s9 = scalar_lea.vmem %s177_s7, 10240  ;;  %s1576_s10 = smov [#allocation2]  }
  0x15   : > { %p1478_p0 = scmp.ne.s32.totalorder %s177_s7, %s1477_s9  ;;  %s1482_s11 = sshll.u32 %s1576_s10, 4  ;;  %s1483_s11 = int_to_ptr.vmem [resolvable:$false] %s1482_s11 }
  0x16   : > { %s1484_s12 = scalar_lea.vmem %s1483_s11, 20480  ;;  %p1485_p3 = scmp.lt.s32.totalorder %s177_s7, %s1483_s11 }
  0x17   : > { %p1480_p1 = pnand %p1478_p0, %p1466_p13  ;;  %p1486_p4 = scmp.lt.s32.totalorder %s1484_s12, %s1477_s9 }
  0x19   : > { %p1481_p2 = pneg %p1480_p1  ;;  %p1487_p5 = por %p1486_p4, %p1485_p3 }
  0x1b   : > { %p1488_p6 = pnand %p1487_p5, %p1481_p2 }
  0x1d   : > { %1491 = shalt.err (!%p1488_p6)
}
  0x1e   : > { %s1577_s18 = smov 256   ;;  %s1578_s20 = smov 128  }
  0x1f   : > { %s1579_s21 = smov 8   ;;  %p203_p7 = scmp.lt.s32.totalorder %s1574_s17, 3 }
  0x20   : > { %1275 = dma.hbm_to_vmem [thread:$0]  (!%p1667_p11), %s175_s4, 10240, %s177_s7, %s166_s8, %s1577_s18, %s1578_s20, %s1579_s21  }
  0x21   : > { %s1147_s22 = sshll.u32 %s1658_s26, 1  ;;  %s1247_s27 = sshll.u32 %s1570_s16, 5 }
  0x22   : > { %p1685_p10 = pnand %p1150_p12, %p203_p7  ;;  %s196_s6 = scalar_lea.hbm %s1851_s2, %s1247_s27 }
  0x23   : > { %s190_s9 = scalar_lea.vmem [#allocation4], %s1147_s22  ;;  %s187_s11 = scalar_lea.sflag [#allocation5], %s1658_s26 }
  0x24   : > { %s198_s10 = sshll.u32 %s190_s9, 4  ;;  %s1580_s4 = smov [#allocation4]   ;;  %s199_s10 = int_to_ptr.vmem [resolvable:$true] %s198_s10 }
  0x25   : > { %s1505_s12 = scalar_lea.vmem %s199_s10, 32  ;;  %s1510_s7 = sshll.u32 %s1580_s4, 4  ;;  %s1511_s7 = int_to_ptr.vmem [resolvable:$false] %s1510_s7 }
  0x26   : > { %p1506_p0 = scmp.ne.s32.totalorder %s199_s10, %s1505_s12  ;;  %s1512_s8 = scalar_lea.vmem %s1511_s7, 64 }
  0x27   : > { %p1513_p12 = scmp.lt.s32.totalorder %s199_s10, %s1511_s7  ;;  %p1514_p3 = scmp.lt.s32.totalorder %s1512_s8, %s1505_s12 }
  0x28   : > { %p1508_p1 = pnand %p1506_p0, %p1466_p13 }
  0x29   : > { %p1515_p4 = por %p1514_p3, %p1513_p12 }
  0x2a   : > { %p1509_p2 = pneg %p1508_p1 }
  0x2c   : > { %p1516_p5 = pnand %p1515_p4, %p1509_p2 }
  0x2e   : > { %1519 = shalt.err (!%p1516_p5)
}
  0x2f   : > { %1278 = dma.hbm_to_vmem [thread:$0]  (!%p1667_p11), %s196_s6, 32, %s199_s10, %s187_s11  }
  0x30   : > { %207 = sbr.rel (%p1685_p10) target bundleno = 367 (0x16f), region = 32  ;;  %s1701_s26 = sand.u32 (!%p1685_p10), 1, %s1558_s13  }
  0x31   : > { %s1266_s18 = smul.u32 (!%p1685_p10), 640, %s1701_s26  ;;  %s210_s20 = scalar_lea.sflag (!%p1685_p10), [#allocation3], %s1701_s26 }
  0x33   : > { %s1705_s21 = scalar_lea.vmem (!%p1685_p10), [#allocation2], %s1266_s18 }
  0x35   : > { %1545 = dma.done.wait (%p1645_p8), %s210_s20, 10240  }
  0x36   : > { %1547 = vsyncadd (%p1645_p8), %s210_s20, 4294957056  ;;  %s1151_s5 = sshll.u32 %s1701_s26, 1  ;;  %s219_s22 = scalar_lea.sflag [#allocation5], %s1701_s26 }
  0x37   : > { %s1713_s27 = scalar_lea.vmem [#allocation4], %s1151_s5 }
  0x38   : > { %1549 = dma.done.wait (%p1645_p8), %s219_s22, 32  }
  0x39   : > { %1551 = vsyncadd (%p1645_p8), %s219_s22, 4294967264  ;;  %v1332_v0 = vld [vmem:[%s1705_s21 + $0x74] ss:$8 sps:$4 sm:$0xff]   ;;  %v1336_v2 = vld [vmem:[%s1705_s21 + $0x70] ss:$8 sps:$4 sm:$0xff]  }
  0x3a   : > { %v1334_v1 = vld [vmem:[%s1705_s21 + $0x174] ss:$8 sps:$4 sm:$0xff]   ;;  %812 = vmatprep.subr.bf16.mxu0 %v1332_v0  ;;  %v1337_v3 = vld [vmem:[%s1705_s21 + $0x170] ss:$8 sps:$4 sm:$0xff]   ;;  %v1338_v4 = vld [vmem:[%s1705_s21 + $0x64] ss:$8 sps:$4 sm:$0xff]  }
  0x3b   : > { %863 = vmatprep.subr.bf16.mxu1 %v1334_v1  ;;  %813 = vmatpush1.bf16.msra.mxu0 %v1336_v2  ;;  %v1340_v5 = vld [vmem:[%s1705_s21 + $0x164] ss:$8 sps:$4 sm:$0xff]   ;;  %v1342_v6 = vld [vmem:[%s1705_s21 + $0x60] ss:$8 sps:$4 sm:$0xff]   ;;  %v1344_v8 = vld [vmem:[%s1705_s21 + $0x54] ss:$8 sps:$4 sm:$0xff]  }
  0x3c   : > { %864 = vmatpush1.bf16.msra.mxu1 %v1337_v3  ;;  %814 = vmatprep.subr.bf16.mxu0 %v1338_v4  ;;  %v1343_v7 = vld [vmem:[%s1705_s21 + $0x160] ss:$8 sps:$4 sm:$0xff]   ;;  %v1346_v9 = vld [vmem:[%s1705_s21 + $0x154] ss:$8 sps:$4 sm:$0xff]   ;;  %v1348_v10 = vld [vmem:[%s1705_s21 + $0x50] ss:$8 sps:$4 sm:$0xff]  }
  0x3d   : > { %865 = vmatprep.subr.bf16.mxu1 %v1340_v5  ;;  %v1349_v11 = vld [vmem:[%s1705_s21 + $0x150] ss:$8 sps:$4 sm:$0xff]   ;;  %v1350_v12 = vld [vmem:[%s1705_s21 + $0x44] ss:$8 sps:$4 sm:$0xff]   ;;  %v1354_v14 = vld [vmem:[%s1705_s21 + $0x40] ss:$8 sps:$4 sm:$0xff]  }
  0x3e   : > { %v1352_v13 = vld [vmem:[%s1705_s21 + $0x144] ss:$8 sps:$4 sm:$0xff]   ;;  %v1355_v15 = vld [vmem:[%s1705_s21 + $0x140] ss:$8 sps:$4 sm:$0xff]   ;;  %v1356_v16 = vld [vmem:[%s1705_s21 + $0x34] ss:$8 sps:$4 sm:$0xff]  }
  0x3f   : > { %815 = vmatpush1.bf16.msra.mxu0 %v1342_v6  ;;  %v1358_v17 = vld [vmem:[%s1705_s21 + $0x134] ss:$8 sps:$4 sm:$0xff]   ;;  %v1360_v18 = vld [vmem:[%s1705_s21 + $0x30] ss:$8 sps:$4 sm:$0xff]   ;;  %v1362_v20 = vld [vmem:[%s1705_s21 + $0x24] ss:$8 sps:$4 sm:$0xff]  }
  0x40   : > { %866 = vmatpush1.bf16.msra.mxu1 %v1343_v7  ;;  %816 = vmatprep.subr.bf16.mxu0 %v1344_v8  ;;  %v1361_v19 = vld [vmem:[%s1705_s21 + $0x130] ss:$8 sps:$4 sm:$0xff]   ;;  %v1364_v21 = vld [vmem:[%s1705_s21 + $0x124] ss:$8 sps:$4 sm:$0xff]   ;;  %v1366_v22 = vld [vmem:[%s1705_s21 + $0x20] ss:$8 sps:$4 sm:$0xff]  }
  0x41   : > { %867 = vmatprep.subr.bf16.mxu1 %v1346_v9  ;;  %v1367_v23 = vld [vmem:[%s1705_s21 + $0x120] ss:$8 sps:$4 sm:$0xff]   ;;  %v1368_v24 = vld [vmem:[%s1705_s21 + $0x14] ss:$8 sps:$4 sm:$0xff]   ;;  %v1372_v26 = vld [vmem:[%s1705_s21 + $0x10] ss:$8 sps:$4 sm:$0xff]  }
  0x42   : > { %v1370_v25 = vld [vmem:[%s1705_s21 + $0x114] ss:$8 sps:$4 sm:$0xff]   ;;  %v1373_v27 = vld [vmem:[%s1705_s21 + $0x110] ss:$8 sps:$4 sm:$0xff]   ;;  %v1374_v28 = vld [vmem:[%s1705_s21 + $0x4] ss:$8 sps:$4 sm:$0xff]  }
  0x43   : > { %817 = vmatpush1.bf16.msra.mxu0 %v1348_v10  ;;  %v1376_v29 = vld [vmem:[%s1705_s21 + $0x104] ss:$8 sps:$4 sm:$0xff]   ;;  %v1378_v30 = vld [vmem:[%s1705_s21] ss:$8 sps:$4 sm:$0xff]   ;;  %v1380_v32 = vld [vmem:[%s1705_s21 + $0xf4] ss:$8 sps:$4 sm:$0xff]  }
  0x44   : > { %868 = vmatpush1.bf16.msra.mxu1 %v1349_v11  ;;  %818 = vmatprep.subr.bf16.mxu0 %v1350_v12  ;;  %v1379_v31 = vld [vmem:[%s1705_s21 + $0x100] ss:$8 sps:$4 sm:$0xff]   ;;  %v1382_v33 = vld [vmem:[%s1705_s21 + $0x1f4] ss:$8 sps:$4 sm:$0xff]   ;;  %v1384_v34 = vld [vmem:[%s1705_s21 + $0xf0] ss:$8 sps:$4 sm:$0xff]  }
  0x45   : > { %869 = vmatprep.subr.bf16.mxu1 %v1352_v13  ;;  %v1385_v35 = vld [vmem:[%s1705_s21 + $0x1f0] ss:$8 sps:$4 sm:$0xff]   ;;  %v1386_v36 = vld [vmem:[%s1705_s21 + $0xe4] ss:$8 sps:$4 sm:$0xff]   ;;  %v1390_v38 = vld [vmem:[%s1705_s21 + $0xe0] ss:$8 sps:$4 sm:$0xff]  }
  0x46   : > { %v1388_v37 = vld [vmem:[%s1705_s21 + $0x1e4] ss:$8 sps:$4 sm:$0xff]   ;;  %v1391_v39 = vld [vmem:[%s1705_s21 + $0x1e0] ss:$8 sps:$4 sm:$0xff]   ;;  %v1392_v40 = vld [vmem:[%s1705_s21 + $0xd4] ss:$8 sps:$4 sm:$0xff]  }
  0x47   : > { %819 = vmatpush1.bf16.msra.mxu0 %v1354_v14  ;;  %v1394_v41 = vld [vmem:[%s1705_s21 + $0x1d4] ss:$8 sps:$4 sm:$0xff]   ;;  %v1396_v42 = vld [vmem:[%s1705_s21 + $0xd0] ss:$8 sps:$4 sm:$0xff]   ;;  %v1398_v44 = vld [vmem:[%s1705_s21 + $0xc4] ss:$8 sps:$4 sm:$0xff]  }
  0x48   : > { %870 = vmatpush1.bf16.msra.mxu1 %v1355_v15  ;;  %820 = vmatprep.subr.bf16.mxu0 %v1356_v16  ;;  %v1397_v43 = vld [vmem:[%s1705_s21 + $0x1d0] ss:$8 sps:$4 sm:$0xff]   ;;  %v1400_v45 = vld [vmem:[%s1705_s21 + $0x1c4] ss:$8 sps:$4 sm:$0xff]   ;;  %v1402_v46 = vld [vmem:[%s1705_s21 + $0xc0] ss:$8 sps:$4 sm:$0xff]  }
  0x49   : > { %871 = vmatprep.subr.bf16.mxu1 %v1358_v17  ;;  %v1403_v47 = vld [vmem:[%s1705_s21 + $0x1c0] ss:$8 sps:$4 sm:$0xff]   ;;  %v1404_v48 = vld [vmem:[%s1705_s21 + $0xb4] ss:$8 sps:$4 sm:$0xff]   ;;  %v1430_v49 = vld [vmem:[%s1849_s0 + $0x4] ss:$20 sps:$4 sm:$0xff]  }
  0x4a   : > { %v1406_v50 = vld [vmem:[%s1705_s21 + $0x1b4] ss:$8 sps:$4 sm:$0xff]   ;;  %v1433_v51 = vld [vmem:[%s1849_s0 + $0xc] ss:$20 sps:$4 sm:$0xff]   ;;  %844 = vmatprep.mubr.bf16.mxu0 %v1430_v49  ;;  %v1408_v52 = vld [vmem:[%s1705_s21 + $0xb0] ss:$8 sps:$4 sm:$0xff]  }
  0x4b   : > { %821 = vmatpush1.bf16.msra.mxu0 %v1360_v18  ;;  %v1409_v53 = vld [vmem:[%s1705_s21 + $0x1b0] ss:$8 sps:$4 sm:$0xff]   ;;  %895 = vmatprep.mubr.bf16.mxu1 %v1433_v51  ;;  %v1410_v54 = vld [vmem:[%s1705_s21 + $0xa4] ss:$8 sps:$4 sm:$0xff]   ;;  %v1414_v56 = vld [vmem:[%s1705_s21 + $0xa0] ss:$8 sps:$4 sm:$0xff]  }
  0x4c   : > { %872 = vmatpush1.bf16.msra.mxu1 %v1361_v19  ;;  %822 = vmatprep.subr.bf16.mxu0 %v1362_v20  ;;  %v1412_v55 = vld [vmem:[%s1705_s21 + $0x1a4] ss:$8 sps:$4 sm:$0xff]   ;;  %v1415_v57 = vld [vmem:[%s1705_s21 + $0x1a0] ss:$8 sps:$4 sm:$0xff]   ;;  %v1416_v58 = vld [vmem:[%s1705_s21 + $0x94] ss:$8 sps:$4 sm:$0xff]  }
  0x4d   : > { %873 = vmatprep.subr.bf16.mxu1 %v1364_v21  ;;  %v1418_v59 = vld [vmem:[%s1705_s21 + $0x194] ss:$8 sps:$4 sm:$0xff]   ;;  %v1420_v60 = vld [vmem:[%s1705_s21 + $0x90] ss:$8 sps:$4 sm:$0xff]   ;;  %v1422_v62 = vld [vmem:[%s1705_s21 + $0x84] ss:$8 sps:$4 sm:$0xff]  }
  0x4e   : > { %v1421_v61 = vld [vmem:[%s1705_s21 + $0x190] ss:$8 sps:$4 sm:$0xff]   ;;  %v1424_v63 = vld [vmem:[%s1705_s21 + $0x184] ss:$8 sps:$4 sm:$0xff]   ;;  %v1426_v0 = vld [vmem:[%s1705_s21 + $0x80] ss:$8 sps:$4 sm:$0xff]  }
  0x4f   : > { %823 = vmatpush1.bf16.msra.mxu0 %v1366_v22  ;;  %v1427_v1 = vld [vmem:[%s1705_s21 + $0x180] ss:$8 sps:$4 sm:$0xff]   ;;  %v1436_v2 = vld [vmem:[%s1705_s21 + $0x274] ss:$8 sps:$4 sm:$0xff]   ;;  %v1434_v7 = vld [vmem:[%s1705_s21 + $0x270] ss:$8 sps:$4 sm:$0xff]  }
  0x50   : > { %874 = vmatpush1.bf16.msra.mxu1 %v1367_v23  ;;  %824 = vmatprep.subr.bf16.mxu0 %v1368_v24  ;;  %v1428_v3 = vld [vmem:[%s1849_s0] ss:$20 sps:$4 sm:$0xff]   ;;  %v1431_v4 = vld [vmem:[%s1849_s0 + $0x8] ss:$20 sps:$4 sm:$0xff]   ;;  %v1439_v8 = vld [vmem:[%s1705_s21 + $0x264] ss:$8 sps:$4 sm:$0xff]  }
  0x51   : > { %875 = vmatprep.subr.bf16.mxu1 %v1370_v25  ;;  %v273_v5 = vld [vmem:[%s1849_s0 + $0x28] sm:$0xff]  ;;  %v274_v6 = vld [vmem:[%s1849_s0 + $0x30] sm:$0xff]  ;;  %v1581_v19 = vmov 0  }
  0x52   : > { %v1158_v9 = vcombine.high %v273_v5, %v273_v5  ;;  %v1160_v10 = vcombine.high %v274_v6, %v274_v6  ;;  %v1437_v11 = vld [vmem:[%s1705_s21 + $0x260] ss:$8 sps:$4 sm:$0xff]   ;;  %v1442_v12 = vld [vmem:[%s1705_s21 + $0x254] ss:$8 sps:$4 sm:$0xff]   ;;  %v1157_v13 = vcombine.low %v273_v5, %v273_v5  ;;  %v1159_v14 = vcombine.low %v274_v6, %v274_v6  ;;  %v1440_v15 = vld [vmem:[%s1705_s21 + $0x250] ss:$8 sps:$4 sm:$0xff]  }
  0x53   : > { %825 = vmatpush1.bf16.msra.mxu0 %v1372_v26  ;;  %v1445_v16 = vld [vmem:[%s1705_s21 + $0x244] ss:$8 sps:$4 sm:$0xff]   ;;  %v1443_v17 = vld [vmem:[%s1705_s21 + $0x240] ss:$8 sps:$4 sm:$0xff]   ;;  %v1448_v18 = vld [vmem:[%s1705_s21 + $0x234] ss:$8 sps:$4 sm:$0xff]  }
  0x54   : > { %876 = vmatpush1.bf16.msra.mxu1 %v1373_v27  ;;  %826 = vmatprep.subr.bf16.mxu0 %v1374_v28  ;;  %v1446_v20 = vld [vmem:[%s1705_s21 + $0x230] ss:$8 sps:$4 sm:$0xff]   ;;  %v1453_v21 = vld [vmem:[%s1705_s21 + $0x224] ss:$8 sps:$4 sm:$0xff]   ;;  %v1451_v22 = vld [vmem:[%s1705_s21 + $0x220] ss:$8 sps:$4 sm:$0xff]  }
  0x55   : > { %877 = vmatprep.subr.bf16.mxu1 %v1376_v29  ;;  %v1458_v23 = vld [vmem:[%s1705_s21 + $0x214] ss:$8 sps:$4 sm:$0xff]   ;;  %v1456_v24 = vld [vmem:[%s1705_s21 + $0x210] ss:$8 sps:$4 sm:$0xff]   ;;  %v1461_v25 = vld [vmem:[%s1705_s21 + $0x204] ss:$8 sps:$4 sm:$0xff]  }
  0x56   : > { %v1459_v26 = vld [vmem:[%s1705_s21 + $0x200] ss:$8 sps:$4 sm:$0xff]   ;;  %v1462_v27 = vld [vmem:[%s1849_s0 + $0x10] ss:$20 sps:$4 sm:$0xff]   ;;  %v1463_v28 = vld [vmem:[%s1849_s0 + $0x38] ss:$0 sps:$4 sm:$0xff]  }
  0x57   : > { %827 = vmatpush1.bf16.msra.mxu0 %v1378_v30  ;;  %s1267_s21 = smul.u32 48, %s1701_s26 }
  0x58   : > { %878 = vmatpush1.bf16.msra.mxu1 %v1379_v31  ;;  %828 = vmatprep.subr.bf16.mxu0 %v1380_v32 }
  0x59   : > { %879 = vmatprep.subr.bf16.mxu1 %v1382_v33  ;;  %s254_s26 = scalar_lea.vmem [#allocation6], %s1267_s21 }
  0x5b   : > { %829 = vmatpush2.bf16.msra.mxu0 %v1384_v34 }
  0x5c   : > { %880 = vmatpush2.bf16.msra.mxu1 %v1385_v35  ;;  %830 = vmatprep.subr.bf16.mxu0 %v1386_v36 }
  0x5d   : > { %881 = vmatprep.subr.bf16.mxu1 %v1388_v37 }
  0x5f   : > { %831 = vmatpush2.bf16.msra.mxu0 %v1390_v38 }
  0x60   : > { %882 = vmatpush2.bf16.msra.mxu1 %v1391_v39  ;;  %832 = vmatprep.subr.bf16.mxu0 %v1392_v40 }
  0x61   : > { %883 = vmatprep.subr.bf16.mxu1 %v1394_v41  ;;  %v358_v41 = vlaneseq }
  0x63   : > { %833 = vmatpush2.bf16.msra.mxu0 %v1396_v42 }
  0x64   : > { %884 = vmatpush2.bf16.msra.mxu1 %v1397_v43  ;;  %834 = vmatprep.subr.bf16.mxu0 %v1398_v44 }
  0x65   : > { %885 = vmatprep.subr.bf16.mxu1 %v1400_v45 }
  0x67   : > { %835 = vmatpush2.bf16.msra.mxu0 %v1402_v46  ;;  %v359_v46 = vshrl.u32 %v358_v41, 7 }
  0x68   : > { %886 = vmatpush2.bf16.msra.mxu1 %v1403_v47  ;;  %836 = vmatprep.subr.bf16.mxu0 %v1404_v48  ;;  %v356_v48 = vld [vmem:[%s1713_s27] sm:$0x3]  ;;  %s1248_s27 = sshll.u32 (%p1652_p9), %s1566_s15, 4 }
  0x69   : > { %887 = vmatprep.subr.bf16.mxu1 %v1406_v50  ;;  %v360_v47 = vsub.s32 0, %v359_v46  ;;  %v364_v49 = vsub.s32 1, %v359_v46  ;;  %s1001_s29 = scalar_lea.vmem (%p1652_p9), %s1852_s3, %s1248_s27 }
  0x6b   : > { %837 = vmatpush2.bf16.msra.mxu0 %v1408_v52  ;;  %v361_v50 = vrot.slane %v356_v48, %v360_v47  ;;  %v365_v51 = vrot.slane %v356_v48, %v364_v49 }
  0x6c   : > { %888 = vmatpush2.bf16.msra.mxu1 %v1409_v53  ;;  %838 = vmatprep.subr.bf16.mxu0 %v1410_v54 }
  0x6d   : > { %889 = vmatprep.subr.bf16.mxu1 %v1412_v55 }
  0x6f   : > { %839 = vmatpush2.bf16.msra.mxu0 %v1414_v56 }
  0x70   : > { %890 = vmatpush2.bf16.msra.mxu1 %v1415_v57  ;;  %840 = vmatprep.subr.bf16.mxu0 %v1416_v58 }
  0x71   : > { %891 = vmatprep.subr.bf16.mxu1 %v1418_v59 }
  0x73   : > { %841 = vmatpush2.bf16.msra.mxu0 %v1420_v60 }
  0x74   : > { %892 = vmatpush2.bf16.msra.mxu1 %v1421_v61  ;;  %842 = vmatprep.subr.bf16.mxu0 %v1422_v62 }
  0x75   : > { %893 = vmatprep.subr.bf16.mxu1 %v1424_v63 }
  0x77   : > { %843 = vmatpush2.bf16.msra.mxu0 %v1426_v0 }
  0x78   : > { %894 = vmatpush2.bf16.msra.mxu1 %v1427_v1  ;;  %914 = vmatprep.subr.bf16.mxu0 %v1436_v2 }
  0x79   : > { %1249 = vmatprep.subr.bf16.mxu1 %v1436_v2 }
  0x7a   : > { %845 = vmatmul.mubr.bf16.vlgmr.msra.gmra.mxu0 %v1428_v3 }
  0x7b   : > { %896 = vmatmul.mubr.bf16.vlgmr.msra.gmra.mxu1 %v1431_v4  ;;  %915 = vmatpush1.bf16.msra.mxu0 %v1434_v7 }
  0x7c   : > { %1257 = vmatpush1.bf16.msra.mxu1 %v1434_v7  ;;  %916 = vmatprep.subr.bf16.mxu0 %v1439_v8 }
  0x7d   : > { %1250 = vmatprep.subr.bf16.mxu1 %v1439_v8  ;;  %854 = vmatprep.mubr.bf16.mxu0 %v1158_v9 }
  0x7e   : > { %905 = vmatprep.mubr.bf16.mxu1 %v1160_v10 }
  0x7f   : > { %917 = vmatpush1.bf16.msra.mxu0 %v1437_v11 }
  0x80   : > { %1258 = vmatpush1.bf16.msra.mxu1 %v1437_v11  ;;  %918 = vmatprep.subr.bf16.mxu0 %v1442_v12 }
  0x81   : > { %1251 = vmatprep.subr.bf16.mxu1 %v1442_v12 }
  0x82   : > { %855 = vmatmul.mubr.bf16.gmra.mxu0 %v1157_v13 }
  0x83   : > { %906 = vmatmul.mubr.bf16.gmra.mxu1 %v1159_v14  ;;  %919 = vmatpush1.bf16.msra.mxu0 %v1440_v15 }
  0x84   : > { %1259 = vmatpush1.bf16.msra.mxu1 %v1440_v15  ;;  %920 = vmatprep.subr.bf16.mxu0 %v1445_v16 }
  0x85   : > { %1252 = vmatprep.subr.bf16.mxu1 %v1445_v16  ;;  %946 = vmatprep.mubr.bf16.mxu0 %v1581_v19 }
  0x86   : > { %956 = vmatprep.mubr.bf16.mxu1 %v1581_v19 }
  0x87   : > { %921 = vmatpush1.bf16.msra.mxu0 %v1443_v17 }
  0x88   : > { %1260 = vmatpush1.bf16.msra.mxu1 %v1443_v17  ;;  %922 = vmatprep.subr.bf16.mxu0 %v1448_v18 }
  0x89   : > { %1253 = vmatprep.subr.bf16.mxu1 %v1448_v18 }
  0x8b   : > { %923 = vmatpush1.bf16.msra.mxu0 %v1446_v20 }
  0x8c   : > { %1261 = vmatpush1.bf16.msra.mxu1 %v1446_v20  ;;  %924 = vmatprep.subr.bf16.mxu0 %v1453_v21 }
  0x8d   : > { %1254 = vmatprep.subr.bf16.mxu1 %v1453_v21 }
  0x8f   : > { %925 = vmatpush1.bf16.msra.mxu0 %v1451_v22 }
  0x90   : > { %1262 = vmatpush1.bf16.msra.mxu1 %v1451_v22  ;;  %926 = vmatprep.subr.bf16.mxu0 %v1458_v23 }
  0x91   : > { %1255 = vmatprep.subr.bf16.mxu1 %v1458_v23 }
  0x93   : > { %927 = vmatpush1.bf16.msra.mxu0 %v1456_v24 }
  0x94   : > { %1263 = vmatpush1.bf16.msra.mxu1 %v1456_v24  ;;  %928 = vmatprep.subr.bf16.mxu0 %v1461_v25 }
  0x95   : > { %1256 = vmatprep.subr.bf16.mxu1 %v1461_v25 }
  0x97   : > { %929 = vmatpush1.bf16.msra.mxu0 %v1459_v26 }
  0x98   : > { %1264 = vmatpush1.bf16.msra.mxu1 %v1459_v26 }
  0x9a   : > { %947 = vmatmul.mubr.bf16.vlgmr.msra.gmra.mxu0 %v1462_v27 }
  0x9b   : > { %957 = vmatmul.mubr.bf16.vlgmr.msra.gmra.mxu1 %v1463_v28 }
 0x13a   : > { %v846_v29 = vpop.f32.mrf.mxu0 }
 0x13b   : > { %v897_v30 = vpop.f32.mrf.mxu1  ;;  %v847_v52 = vadd.f32 %v846_v29, %v361_v50 }
 0x13c   : > { %v848_v31 = vpop.f32.mrf.mxu0 }
 0x13d   : > { %v899_v32 = vpop.f32.mrf.mxu1  ;;  %v849_v54 = vadd.f32 %v848_v31, %v365_v51  ;;  %v898_v57 = vadd.f32 %v897_v30, %v847_v52 }
 0x13e   : > { %v850_v33 = vpop.f32.mrf.mxu0 }
 0x13f   : > { %v901_v34 = vpop.f32.mrf.mxu1  ;;  %v851_v55 = vadd.f32 %v850_v33, %v361_v50  ;;  %v900_v0 = vadd.f32 %v899_v32, %v849_v54 }
 0x140   : > { %v852_v35 = vpop.f32.mrf.mxu0 }
 0x141   : > { %v903_v36 = vpop.f32.mrf.mxu1  ;;  %v853_v61 = vadd.f32 %v852_v35, %v365_v51  ;;  %v902_v1 = vadd.f32 %v901_v34, %v851_v55 }
 0x142   : > { %v856_v37 = vpop.f32.mrf.mxu0 }
 0x143   : > { %v907_v38 = vpop.f32.mrf.mxu1  ;;  %v857_v53 = vadd.f32 %v856_v37, %v361_v50  ;;  %v904_v11 = vadd.f32 %v903_v36, %v853_v61 }
 0x144   : > { %v858_v39 = vpop.f32.mrf.mxu0 }
 0x145   : > { %v909_v40 = vpop.f32.mrf.mxu1  ;;  %v859_v56 = vadd.f32 %v858_v39, %v365_v51  ;;  %v908_v58 = vadd.f32 %v907_v38, %v857_v53 }
 0x146   : > { %v860_v42 = vpop.f32.mrf.mxu0 }
 0x147   : > { %v911_v43 = vpop.f32.mrf.mxu1  ;;  %v910_v2 = vadd.f32 %v909_v40, %v859_v56 }
 0x148   : > { %v861_v44 = vpop.f32.mrf.mxu0 }
 0x149   : > { %v912_v45 = vpop.f32.mrf.mxu1 }
 0x15a   : > { %v948_v59 = vpop.f32.mrf.mxu0 }
 0x15b   : > { %v958_v60 = vpop.f32.mrf.mxu1  ;;  %v949_v62 = vadd.f32 %v948_v59, %v898_v57 }
 0x15c   : > { %v959_v63 = vadd.f32 %v958_v60, %v908_v58  ;;  %v950_v3 = vpop.f32.mrf.mxu0 }
 0x15d   : > { %v960_v4 = vpop.f32.mrf.mxu1  ;;  %vm965_vm0 = vcmp.ge.f32.partialorder %v949_v62, 0.0  ;;  %v971_v5 = vmul.f32 0.1, %v949_v62  ;;  %v951_v7 = vadd.f32 %v950_v3, %v900_v0 }
 0x15e   : > { %vm969_vm1 = vcmp.ge.f32.partialorder %v959_v63, 0.0  ;;  %v975_v6 = vmul.f32 0.1, %v959_v63  ;;  %v961_v8 = vadd.f32 %v960_v4, %v910_v2  ;;  %v952_v9 = vpop.f32.mrf.mxu0 }
 0x15f   : > { %v962_v10 = vpop.f32.mrf.mxu1  ;;  %v977_v12 = vsel %vm965_vm0, %v949_v62, %v971_v5  ;;  %v953_v14 = vadd.f32 %v952_v9, %v902_v1  ;;  %vm966_vm2 = vcmp.ge.f32.partialorder %v951_v7, 0.0  ;;  %v972_v15 = vmul.f32 0.1, %v951_v7 }
 0x160   : > { %v981_v13 = vsel %vm969_vm1, %v959_v63, %v975_v6  ;;  %983 = vst [vmem:[%s254_s26] sm:$0xff] %v977_v12  ;;  %vm970_vm3 = vcmp.ge.f32.partialorder %v961_v8, 0.0  ;;  %v976_v16 = vmul.f32 0.1, %v961_v8  ;;  %v954_v17 = vpop.f32.mrf.mxu0 }
 0x161   : > { %987 = vst [vmem:[%s254_s26 + $0x20] sm:$0xff] %v981_v13  ;;  %v963_v18 = vpop.f32.mrf.mxu1  ;;  %vm967_vm4 = vcmp.ge.f32.partialorder %v953_v14, 0.0  ;;  %v973_v19 = vmul.f32 0.1, %v953_v14  ;;  %v955_v20 = vadd.f32 %v954_v17, %v904_v11  ;;  %v978_v21 = vsel %vm966_vm2, %v951_v7, %v972_v15 }
 0x162   : > { %v982_v22 = vsel %vm970_vm3, %v961_v8, %v976_v16  ;;  %984 = vst [vmem:[%s254_s26 + $0x8] sm:$0xff] %v978_v21  ;;  %995 = sbr.rel (!%p1652_p9) target bundleno = 367 (0x16f), region = 44 }
 0x163   : > { %988 = vst [vmem:[%s254_s26 + $0x28] sm:$0xff] %v982_v22  ;;  %v979_v23 = vsel %vm967_vm4, %v953_v14, %v973_v19  ;;  %vm968_vm5 = vcmp.ge.f32.partialorder %v955_v20, 0.0  ;;  %v974_v24 = vmul.f32 0.1, %v955_v20 }
 0x164   : > { %985 = vst [vmem:[%s254_s26 + $0x10] sm:$0xff] %v979_v23 }
 0x165   : > { %v980_v25 = vsel %vm968_vm5, %v955_v20, %v974_v24 }
 0x166   : > { %986 = vst [vmem:[%s254_s26 + $0x18] sm:$0xff] %v980_v25 }
 0x167   : > { %v1014_v26 = vld [vmem:[%s254_s26] sm:$0xff] }
 0x168   : > { %v1022_v30 = vld [vmem:[%s254_s26 + $0x20] sm:$0xff]  ;;  %1015 = vst [vmem:[%s1001_s29] sm:$0xff] %v1014_v26 }
 0x169   : > { %v1016_v27 = vld [vmem:[%s254_s26 + $0x8] sm:$0xff]  ;;  %1023 = vst [vmem:[%s1001_s29 + $0x40] sm:$0xff] %v1022_v30 }
 0x16a   : > { %v1024_v31 = vld [vmem:[%s254_s26 + $0x28] sm:$0xff]  ;;  %1017 = vst [vmem:[%s1001_s29 + $0x8] sm:$0xff] %v1016_v27 }
 0x16b   : > { %v1018_v28 = vld [vmem:[%s254_s26 + $0x10] sm:$0xff]  ;;  %1025 = vst [vmem:[%s1001_s29 + $0x48] sm:$0xff] %v1024_v31 }
 0x16c   : > { %1019 = vst [vmem:[%s1001_s29 + $0x20] sm:$0xff] %v1018_v28 }
 0x16d   : > { %v1020_v29 = vld [vmem:[%s254_s26 + $0x18] sm:$0xff] }
 0x16e   : > { %1021 = vst [vmem:[%s1001_s29 + $0x28] sm:$0xff] %v1020_v29 }
 0x16f PF: > { %s19_s17 = sadd.s32 1, %s1574_s17   ;;  %s1858_s12 = smov %s1558_s13 }
 0x170   : > { %p16_p8 = scmp.ge.s32.totalorder %s19_s17, 4   ;;  %s1859_s13 = smov %s1562_s14 }
 0x171   : > { %s1860_s14 = smov %s1650_s24  ;;  %s1861_s15 = smov %s1570_s16 }
 0x172   : > { %s1862_s16 = smov %s1864_s19  ;;  %18 = sbr.rel (!%p16_p8) target bundleno = 6 (0x6), region = 111 }
 0x177   :  { %1041 = vsyncpa [#allocation3], 1 }
 0x178   :  { %1043 = vsyncpa [#allocation3 + $0x1], 1 }
 0x179   :  { %1044 = vsyncpa [#allocation5], 1 }
 0x17a   :  { %1046 = vsyncpa [#allocation5 + $0x1], 1 }

// kernel: one_period_discriminator_forward.6
= control target key start
LH: loop header
LB: loop body
LE: loop exit
PB: predicated region body
PF: predicated region fallthrough
CT: control target
= control target key end

     0   :  { %8 = vsyncpa [#allocation3], 0  ;;  %s4422_s0 = inlined_call_operand.vmem [shape: bf16[8,2560], index: 0, kind: input, shape index: {}]   ;;  %s4423_s1 = inlined_call_operand.hbm [shape: bf16[2560,1024], index: 1, kind: input, shape index: {}]   ;;  %s4424_s2 = inlined_call_operand.hbm [shape: f32[1,1024], index: 2, kind: input, shape index: {}]   ;;  %s4425_s3 = inlined_call_operand.vmem [shape: f32[8,1024], index: 3, kind: output, shape index: {}]  }
   0x1   :  { %10 = vsyncpa [#allocation3 + $0x1], 0 }
   0x2   :  { %11 = vsyncpa [#allocation5], 0 }
   0x3   :  { %13 = vsyncpa [#allocation5 + $0x1], 0  ;;  %s3894_s12 = smov 0   ;;  %s3896_s13 = smov 0  }
   0x4   :  { %s3898_s14 = smov 0   ;;  %s3900_s15 = smov 0  }
   0x5   :  { %s3902_s16 = smov 0   ;;  %s3904_s17 = smov 0  }
   0x6 LB: > { %s2834_s18 = sadd.s32 4294967295, %s3867_s17   ;;  %s28_s19 = sadd.s32 1, %s3863_s16  ;;  %s3867_s17 = sphi %s3904_s17, %s19_s17   ;;  %s3863_s16 = sphi %s3902_s16, %s4433_s16   ;;  %s3859_s15 = sphi %s3900_s15, %s4432_s15   ;;  %s3855_s14 = sphi %s3898_s14, %s4431_s14   ;;  %s3851_s13 = sphi %s3896_s13, %s4430_s13   ;;  %s3847_s12 = sphi %s3894_s12, %s4429_s12  }
   0x7   : > { %p29_p0 = scmp.ge.s32.totalorder %s28_s19, 4  ;;  %s64_s20 = sadd.s32 1, %s3855_s14 }
   0x8   : > { %p71_p1 = scmp.ne.s32.totalorder %s3855_s14, %s3851_s13  ;;  %p72_p2 = scmp.eq.s32.totalorder %s3867_s17, 0 }
   0x9   : > { %s4435_s19 = smov (%p29_p0, %s28_s19), 0  ;;  %p77_p4 = scmp.ne.s32.totalorder %s3851_s13, %s3847_s12 }
   0xa   : > { %p73_p3 = por %p72_p2, %p71_p1  ;;  %s61_s21 = ssub.s32 %s3863_s16, %s4435_s19 }
   0xb   : > { %p78_p5 = scmp.eq.s32.totalorder %s2834_s18, 0  ;;  %p62_p6 = scmp.eq.s32.totalorder %s61_s21, 0 }
   0xc   : > { %p3205_p8 = scmp.lt.s32.totalorder %s3867_s17, 4  ;;  %s3942_s24 = sand.u32 1, %s3855_s14  }
   0xd   : > { %p3933_p7 = por %p78_p5, %p77_p4  ;;  %s3190_s25 = sshll.u32 %s3863_s16, 7 }
   0xe   : > { %s3939_s23 = scalar_select %p62_p6, %s3855_s14, %s64_s20  }
   0xf   : > { %s3192_s26 = smul.u32 2560, %s3942_s24  ;;  %s173_s29 = scalar_lea.hbm %s4423_s1, %s3190_s25 }
  0x10   : > { %p3949_p9 = pnand %p3205_p8, %p73_p3  ;;  %p2844_p10 = scmp.ge.s32.totalorder %s3867_s17, 1 }
  0x11   : > { %s167_s4 = scalar_lea.vmem [#allocation2], %s3192_s26  ;;  %s164_s6 = scalar_lea.sflag [#allocation3], %s3942_s24 }
  0x12   : > { %s174_s5 = sshll.u32 %s167_s4, 4  ;;  %p3759_p11 = pneg %p3949_p9  ;;  %s175_s5 = int_to_ptr.vmem [resolvable:$true] %s174_s5 }
  0x13   : > { %s3770_s7 = scalar_lea.vmem %s175_s5, 40960  ;;  %s3869_s8 = smov [#allocation2]  }
  0x14   : > { %p3771_p12 = scmp.ne.s32.totalorder %s175_s5, %s3770_s7  ;;  %s3775_s9 = sshll.u32 %s3869_s8, 4  ;;  %s3776_s9 = int_to_ptr.vmem [resolvable:$false] %s3775_s9 }
  0x15   : > { %s3777_s10 = scalar_lea.vmem %s3776_s9, 81920  ;;  %p3778_p1 = scmp.lt.s32.totalorder %s175_s5, %s3776_s9 }
  0x16   : > { %p3773_p13 = pnand %p3771_p12, %p3759_p11  ;;  %p3779_p2 = scmp.lt.s32.totalorder %s3777_s10, %s3770_s7 }
  0x18   : > { %p3774_p0 = pneg %p3773_p13  ;;  %p3780_p3 = por %p3779_p2, %p3778_p1 }
  0x1a   : > { %p3781_p4 = pnand %p3780_p3, %p3774_p0 }
  0x1c   : > { %3784 = shalt.err (!%p3781_p4)
}
  0x1d   : > { %s3870_s11 = smov 512   ;;  %s3871_s12 = smov 128  }
  0x1e   : > { %s3872_s18 = smov 8   ;;  %p201_p5 = scmp.lt.s32.totalorder %s3867_s17, 5 }
  0x1f   : > { %3201 = dma.hbm_to_vmem [thread:$0]  (!%p3949_p9), %s173_s29, 40960, %s175_s5, %s164_s6, %s3870_s11, %s3871_s12, %s3872_s18  }
  0x20   : > { %s2841_s20 = sshll.u32 %s3942_s24, 1  ;;  %s3191_s21 = sshll.u32 %s3863_s16, 5 }
  0x21   : > { %p3967_p6 = pnand %p2844_p10, %p201_p5  ;;  %s194_s28 = scalar_lea.hbm %s4424_s2, %s3191_s21 }
  0x22   : > { %s188_s4 = scalar_lea.vmem [#allocation4], %s2841_s20  ;;  %s185_s8 = scalar_lea.sflag [#allocation5], %s3942_s24 }
  0x23   : > { %s196_s7 = sshll.u32 %s188_s4, 4  ;;  %s3873_s29 = smov [#allocation4]   ;;  %s197_s7 = int_to_ptr.vmem [resolvable:$true] %s196_s7 }
  0x24   : > { %s3798_s9 = scalar_lea.vmem %s197_s7, 32  ;;  %s3803_s5 = sshll.u32 %s3873_s29, 4  ;;  %s3804_s5 = int_to_ptr.vmem [resolvable:$false] %s3803_s5 }
  0x25   : > { %p3799_p8 = scmp.ne.s32.totalorder %s197_s7, %s3798_s9  ;;  %s3805_s6 = scalar_lea.vmem %s3804_s5, 64 }
  0x26   : > { %p3806_p10 = scmp.lt.s32.totalorder %s197_s7, %s3804_s5  ;;  %p3807_p0 = scmp.lt.s32.totalorder %s3805_s6, %s3798_s9 }
  0x27   : > { %p3801_p12 = pnand %p3799_p8, %p3759_p11 }
  0x28   : > { %p3808_p1 = por %p3807_p0, %p3806_p10 }
  0x29   : > { %p3802_p13 = pneg %p3801_p12 }
  0x2b   : > { %p3809_p2 = pnand %p3808_p1, %p3802_p13 }
  0x2d   : > { %3812 = shalt.err (!%p3809_p2)
}
  0x2e   : > { %3204 = dma.hbm_to_vmem [thread:$0]  (!%p3949_p9), %s194_s28, 32, %s197_s7, %s185_s8  }
  0x2f   : > { %205 = sbr.rel (%p3967_p6) target bundleno = 580 (0x244), region = 32  ;;  %s207_s24 = sand.u32 (!%p3967_p6), 1, %s3851_s13  }
  0x30   : > { %s3193_s10 = smul.u32 (!%p3967_p6), 2560, %s207_s24  ;;  %s208_s11 = scalar_lea.sflag (!%p3967_p6), [#allocation3], %s207_s24 }
  0x32   : > { %s3983_s12 = scalar_lea.vmem (!%p3967_p6), [#allocation2], %s3193_s10 }
  0x34   : > { %3838 = dma.done.wait (%p3933_p7), %s208_s11, 40960  }
  0x35   : > { %3840 = vsyncadd (%p3933_p7), %s208_s11, 4294926336  ;;  %s2845_s18 = sshll.u32 %s207_s24, 1  ;;  %s217_s20 = scalar_lea.sflag [#allocation5], %s207_s24 }
  0x36   : > { %s3989_s30 = scalar_lea.vmem [#allocation4], %s2845_s18 }
  0x37   : > { %3842 = dma.done.wait (%p3933_p7), %s217_s20, 32  }
  0x38   : > { %3844 = vsyncadd (%p3933_p7), %s217_s20, 4294967264  ;;  %v3257_v0 = vld [vmem:[%s3983_s12 + $0x74] ss:$8 sps:$4 sm:$0xff]   ;;  %v3261_v2 = vld [vmem:[%s3983_s12 + $0x70] ss:$8 sps:$4 sm:$0xff]  }
  0x39   : > { %v3259_v1 = vld [vmem:[%s3983_s12 + $0x174] ss:$8 sps:$4 sm:$0xff]   ;;  %2286 = vmatprep.subr.bf16.mxu0 %v3257_v0  ;;  %v3262_v3 = vld [vmem:[%s3983_s12 + $0x170] ss:$8 sps:$4 sm:$0xff]   ;;  %v3263_v4 = vld [vmem:[%s3983_s12 + $0x64] ss:$8 sps:$4 sm:$0xff]  }
  0x3a   : > { %2327 = vmatprep.subr.bf16.mxu1 %v3259_v1  ;;  %2287 = vmatpush1.bf16.msra.mxu0 %v3261_v2  ;;  %v3265_v5 = vld [vmem:[%s3983_s12 + $0x164] ss:$8 sps:$4 sm:$0xff]   ;;  %v3267_v6 = vld [vmem:[%s3983_s12 + $0x60] ss:$8 sps:$4 sm:$0xff]   ;;  %v3269_v8 = vld [vmem:[%s3983_s12 + $0x54] ss:$8 sps:$4 sm:$0xff]  }
  0x3b   : > { %2328 = vmatpush1.bf16.msra.mxu1 %v3262_v3  ;;  %2288 = vmatprep.subr.bf16.mxu0 %v3263_v4  ;;  %v3268_v7 = vld [vmem:[%s3983_s12 + $0x160] ss:$8 sps:$4 sm:$0xff]   ;;  %v3271_v9 = vld [vmem:[%s3983_s12 + $0x154] ss:$8 sps:$4 sm:$0xff]   ;;  %v3273_v10 = vld [vmem:[%s3983_s12 + $0x50] ss:$8 sps:$4 sm:$0xff]  }
  0x3c   : > { %2329 = vmatprep.subr.bf16.mxu1 %v3265_v5  ;;  %v3274_v11 = vld [vmem:[%s3983_s12 + $0x150] ss:$8 sps:$4 sm:$0xff]   ;;  %v3275_v12 = vld [vmem:[%s3983_s12 + $0x44] ss:$8 sps:$4 sm:$0xff]   ;;  %v3279_v14 = vld [vmem:[%s3983_s12 + $0x40] ss:$8 sps:$4 sm:$0xff]  }
  0x3d   : > { %v3277_v13 = vld [vmem:[%s3983_s12 + $0x144] ss:$8 sps:$4 sm:$0xff]   ;;  %v3280_v15 = vld [vmem:[%s3983_s12 + $0x140] ss:$8 sps:$4 sm:$0xff]   ;;  %v3281_v16 = vld [vmem:[%s3983_s12 + $0x34] ss:$8 sps:$4 sm:$0xff]  }
  0x3e   : > { %2289 = vmatpush1.bf16.msra.mxu0 %v3267_v6  ;;  %v3283_v17 = vld [vmem:[%s3983_s12 + $0x134] ss:$8 sps:$4 sm:$0xff]   ;;  %v3285_v18 = vld [vmem:[%s3983_s12 + $0x30] ss:$8 sps:$4 sm:$0xff]   ;;  %v3287_v20 = vld [vmem:[%s3983_s12 + $0x24] ss:$8 sps:$4 sm:$0xff]  }
  0x3f   : > { %2330 = vmatpush1.bf16.msra.mxu1 %v3268_v7  ;;  %2290 = vmatprep.subr.bf16.mxu0 %v3269_v8  ;;  %v3286_v19 = vld [vmem:[%s3983_s12 + $0x130] ss:$8 sps:$4 sm:$0xff]   ;;  %v3289_v21 = vld [vmem:[%s3983_s12 + $0x124] ss:$8 sps:$4 sm:$0xff]   ;;  %v3291_v22 = vld [vmem:[%s3983_s12 + $0x20] ss:$8 sps:$4 sm:$0xff]  }
  0x40   : > { %2331 = vmatprep.subr.bf16.mxu1 %v3271_v9  ;;  %v3292_v23 = vld [vmem:[%s3983_s12 + $0x120] ss:$8 sps:$4 sm:$0xff]   ;;  %v3293_v24 = vld [vmem:[%s3983_s12 + $0x14] ss:$8 sps:$4 sm:$0xff]   ;;  %v3297_v26 = vld [vmem:[%s3983_s12 + $0x10] ss:$8 sps:$4 sm:$0xff]  }
  0x41   : > { %v3295_v25 = vld [vmem:[%s3983_s12 + $0x114] ss:$8 sps:$4 sm:$0xff]   ;;  %v3298_v27 = vld [vmem:[%s3983_s12 + $0x110] ss:$8 sps:$4 sm:$0xff]   ;;  %v3299_v28 = vld [vmem:[%s3983_s12 + $0x4] ss:$8 sps:$4 sm:$0xff]  }
  0x42   : > { %2291 = vmatpush1.bf16.msra.mxu0 %v3273_v10  ;;  %v3301_v29 = vld [vmem:[%s3983_s12 + $0x104] ss:$8 sps:$4 sm:$0xff]   ;;  %v3303_v30 = vld [vmem:[%s3983_s12] ss:$8 sps:$4 sm:$0xff]   ;;  %v3305_v32 = vld [vmem:[%s3983_s12 + $0xf4] ss:$8 sps:$4 sm:$0xff]  }
  0x43   : > { %2332 = vmatpush1.bf16.msra.mxu1 %v3274_v11  ;;  %2292 = vmatprep.subr.bf16.mxu0 %v3275_v12  ;;  %v3304_v31 = vld [vmem:[%s3983_s12 + $0x100] ss:$8 sps:$4 sm:$0xff]   ;;  %v3307_v33 = vld [vmem:[%s3983_s12 + $0x1f4] ss:$8 sps:$4 sm:$0xff]   ;;  %v3309_v34 = vld [vmem:[%s3983_s12 + $0xf0] ss:$8 sps:$4 sm:$0xff]  }
  0x44   : > { %2333 = vmatprep.subr.bf16.mxu1 %v3277_v13  ;;  %v3310_v35 = vld [vmem:[%s3983_s12 + $0x1f0] ss:$8 sps:$4 sm:$0xff]   ;;  %v3311_v36 = vld [vmem:[%s3983_s12 + $0xe4] ss:$8 sps:$4 sm:$0xff]   ;;  %v3315_v38 = vld [vmem:[%s3983_s12 + $0xe0] ss:$8 sps:$4 sm:$0xff]  }
  0x45   : > { %v3313_v37 = vld [vmem:[%s3983_s12 + $0x1e4] ss:$8 sps:$4 sm:$0xff]   ;;  %v3316_v39 = vld [vmem:[%s3983_s12 + $0x1e0] ss:$8 sps:$4 sm:$0xff]   ;;  %v3317_v40 = vld [vmem:[%s3983_s12 + $0xd4] ss:$8 sps:$4 sm:$0xff]  }
  0x46   : > { %2293 = vmatpush1.bf16.msra.mxu0 %v3279_v14  ;;  %v3319_v41 = vld [vmem:[%s3983_s12 + $0x1d4] ss:$8 sps:$4 sm:$0xff]   ;;  %v3321_v42 = vld [vmem:[%s3983_s12 + $0xd0] ss:$8 sps:$4 sm:$0xff]   ;;  %v3323_v44 = vld [vmem:[%s3983_s12 + $0xc4] ss:$8 sps:$4 sm:$0xff]  }
  0x47   : > { %2334 = vmatpush1.bf16.msra.mxu1 %v3280_v15  ;;  %2294 = vmatprep.subr.bf16.mxu0 %v3281_v16  ;;  %v3322_v43 = vld [vmem:[%s3983_s12 + $0x1d0] ss:$8 sps:$4 sm:$0xff]   ;;  %v3325_v45 = vld [vmem:[%s3983_s12 + $0x1c4] ss:$8 sps:$4 sm:$0xff]   ;;  %v3327_v49 = vld [vmem:[%s3983_s12 + $0xc0] ss:$8 sps:$4 sm:$0xff]  }
  0x48   : > { %2335 = vmatprep.subr.bf16.mxu1 %v3283_v17  ;;  %v274_v46 = vld [vmem:[%s4422_s0] sm:$0xff]  ;;  %v275_v48 = vld [vmem:[%s4422_s0 + $0x8] sm:$0xff]  ;;  %v3329_v52 = vld [vmem:[%s3983_s12 + $0xb4] ss:$8 sps:$4 sm:$0xff]  }
  0x49   : > { %v2849_v47 = vcombine.high %v274_v46, %v274_v46  ;;  %v3328_v50 = vld [vmem:[%s3983_s12 + $0x1c0] ss:$8 sps:$4 sm:$0xff]   ;;  %v2851_v51 = vcombine.high %v275_v48, %v275_v48  ;;  %v3331_v53 = vld [vmem:[%s3983_s12 + $0x1b4] ss:$8 sps:$4 sm:$0xff]   ;;  %v3333_v54 = vld [vmem:[%s3983_s12 + $0xb0] ss:$8 sps:$4 sm:$0xff]   ;;  %v2848_v6 = vcombine.low %v274_v46, %v274_v46  ;;  %v2850_v7 = vcombine.low %v275_v48, %v275_v48 }
  0x4a   : > { %2295 = vmatpush1.bf16.msra.mxu0 %v3285_v18  ;;  %v3334_v55 = vld [vmem:[%s3983_s12 + $0x1b0] ss:$8 sps:$4 sm:$0xff]   ;;  %v3335_v56 = vld [vmem:[%s3983_s12 + $0xa4] ss:$8 sps:$4 sm:$0xff]   ;;  %v3339_v58 = vld [vmem:[%s3983_s12 + $0xa0] ss:$8 sps:$4 sm:$0xff]  }
  0x4b   : > { %2336 = vmatpush1.bf16.msra.mxu1 %v3286_v19  ;;  %2296 = vmatprep.subr.bf16.mxu0 %v3287_v20  ;;  %v3337_v57 = vld [vmem:[%s3983_s12 + $0x1a4] ss:$8 sps:$4 sm:$0xff]   ;;  %v3340_v59 = vld [vmem:[%s3983_s12 + $0x1a0] ss:$8 sps:$4 sm:$0xff]   ;;  %v3341_v60 = vld [vmem:[%s3983_s12 + $0x94] ss:$8 sps:$4 sm:$0xff]  }
  0x4c   : > { %2337 = vmatprep.subr.bf16.mxu1 %v3289_v21  ;;  %2318 = vmatprep.mubr.bf16.mxu0 %v2849_v47  ;;  %v3343_v61 = vld [vmem:[%s3983_s12 + $0x194] ss:$8 sps:$4 sm:$0xff]   ;;  %v3345_v62 = vld [vmem:[%s3983_s12 + $0x90] ss:$8 sps:$4 sm:$0xff]   ;;  %v3347_v0 = vld [vmem:[%s3983_s12 + $0x84] ss:$8 sps:$4 sm:$0xff]  }
  0x4d   : > { %2359 = vmatprep.mubr.bf16.mxu1 %v2851_v51  ;;  %v3346_v63 = vld [vmem:[%s3983_s12 + $0x190] ss:$8 sps:$4 sm:$0xff]   ;;  %v3349_v1 = vld [vmem:[%s3983_s12 + $0x184] ss:$8 sps:$4 sm:$0xff]   ;;  %v3351_v2 = vld [vmem:[%s3983_s12 + $0x80] ss:$8 sps:$4 sm:$0xff]  }
  0x4e   : > { %2297 = vmatpush1.bf16.msra.mxu0 %v3291_v22  ;;  %v3352_v3 = vld [vmem:[%s3983_s12 + $0x180] ss:$8 sps:$4 sm:$0xff]   ;;  %v3359_v4 = vld [vmem:[%s3983_s12 + $0x274] ss:$8 sps:$4 sm:$0xff]   ;;  %v3357_v8 = vld [vmem:[%s3983_s12 + $0x270] ss:$8 sps:$4 sm:$0xff]  }
  0x4f   : > { %2338 = vmatpush1.bf16.msra.mxu1 %v3292_v23  ;;  %2298 = vmatprep.subr.bf16.mxu0 %v3293_v24  ;;  %v3362_v5 = vld [vmem:[%s3983_s12 + $0x374] ss:$8 sps:$4 sm:$0xff]   ;;  %v3360_v9 = vld [vmem:[%s3983_s12 + $0x370] ss:$8 sps:$4 sm:$0xff]   ;;  %v3365_v10 = vld [vmem:[%s3983_s12 + $0x264] ss:$8 sps:$4 sm:$0xff]  }
  0x50   : > { %2339 = vmatprep.subr.bf16.mxu1 %v3295_v25  ;;  %v3368_v11 = vld [vmem:[%s3983_s12 + $0x364] ss:$8 sps:$4 sm:$0xff]   ;;  %v3363_v12 = vld [vmem:[%s3983_s12 + $0x260] ss:$8 sps:$4 sm:$0xff]   ;;  %v3371_v14 = vld [vmem:[%s3983_s12 + $0x254] ss:$8 sps:$4 sm:$0xff]  }
  0x51   : > { %v3366_v13 = vld [vmem:[%s3983_s12 + $0x360] ss:$8 sps:$4 sm:$0xff]   ;;  %v3374_v15 = vld [vmem:[%s3983_s12 + $0x354] ss:$8 sps:$4 sm:$0xff]   ;;  %v3369_v16 = vld [vmem:[%s3983_s12 + $0x250] ss:$8 sps:$4 sm:$0xff]  }
  0x52   : > { %2299 = vmatpush1.bf16.msra.mxu0 %v3297_v26  ;;  %v3372_v17 = vld [vmem:[%s3983_s12 + $0x350] ss:$8 sps:$4 sm:$0xff]   ;;  %v3377_v18 = vld [vmem:[%s3983_s12 + $0x244] ss:$8 sps:$4 sm:$0xff]   ;;  %v3375_v20 = vld [vmem:[%s3983_s12 + $0x240] ss:$8 sps:$4 sm:$0xff]  }
  0x53   : > { %2340 = vmatpush1.bf16.msra.mxu1 %v3298_v27  ;;  %2300 = vmatprep.subr.bf16.mxu0 %v3299_v28  ;;  %v3380_v19 = vld [vmem:[%s3983_s12 + $0x344] ss:$8 sps:$4 sm:$0xff]   ;;  %v3378_v21 = vld [vmem:[%s3983_s12 + $0x340] ss:$8 sps:$4 sm:$0xff]   ;;  %v3383_v22 = vld [vmem:[%s3983_s12 + $0x234] ss:$8 sps:$4 sm:$0xff]  }
  0x54   : > { %2341 = vmatprep.subr.bf16.mxu1 %v3301_v29  ;;  %v3386_v23 = vld [vmem:[%s3983_s12 + $0x334] ss:$8 sps:$4 sm:$0xff]   ;;  %v3381_v24 = vld [vmem:[%s3983_s12 + $0x230] ss:$8 sps:$4 sm:$0xff]   ;;  %v3389_v26 = vld [vmem:[%s3983_s12 + $0x224] ss:$8 sps:$4 sm:$0xff]  }
  0x55   : > { %v3384_v25 = vld [vmem:[%s3983_s12 + $0x330] ss:$8 sps:$4 sm:$0xff]   ;;  %v3392_v27 = vld [vmem:[%s3983_s12 + $0x324] ss:$8 sps:$4 sm:$0xff]   ;;  %v3387_v28 = vld [vmem:[%s3983_s12 + $0x220] ss:$8 sps:$4 sm:$0xff]  }
  0x56   : > { %2301 = vmatpush1.bf16.msra.mxu0 %v3303_v30  ;;  %v3390_v29 = vld [vmem:[%s3983_s12 + $0x320] ss:$8 sps:$4 sm:$0xff]   ;;  %v3395_v30 = vld [vmem:[%s3983_s12 + $0x214] ss:$8 sps:$4 sm:$0xff]   ;;  %v3413_v46 = vld [vmem:[%s3983_s12 + $0x2e4] ss:$8 sps:$4 sm:$0xff]  }
  0x57   : > { %2342 = vmatpush1.bf16.msra.mxu1 %v3304_v31  ;;  %2302 = vmatprep.subr.bf16.mxu0 %v3305_v32  ;;  %v3398_v31 = vld [vmem:[%s3983_s12 + $0x314] ss:$8 sps:$4 sm:$0xff]   ;;  %v3416_v47 = vld [vmem:[%s3983_s12 + $0x3e4] ss:$8 sps:$4 sm:$0xff]   ;;  %v3411_v48 = vld [vmem:[%s3983_s12 + $0x2e0] ss:$8 sps:$4 sm:$0xff]  }
  0x58   : > { %2343 = vmatprep.subr.bf16.mxu1 %v3307_v33  ;;  %v4094_v32 = vld [vmem:[%s4422_s0 + $0x10] sm:$0xff]  ;;  %v4099_v33 = vld [vmem:[%s4422_s0 + $0x18] sm:$0xff] }
  0x59   : > { %v3422_v51 = vld [vmem:[%s3983_s12 + $0x3d4] ss:$8 sps:$4 sm:$0xff]  }
  0x5a   : > { %2303 = vmatpush2.bf16.msra.mxu0 %v3309_v34  ;;  %v3393_v34 = vld [vmem:[%s3983_s12 + $0x210] ss:$8 sps:$4 sm:$0xff]  }
  0x5b   : > { %2344 = vmatpush2.bf16.msra.mxu1 %v3310_v35  ;;  %2304 = vmatprep.subr.bf16.mxu0 %v3311_v36  ;;  %v3396_v35 = vld [vmem:[%s3983_s12 + $0x310] ss:$8 sps:$4 sm:$0xff]   ;;  %v2853_v36 = vcombine.high %v4094_v32, %v4094_v32 }
  0x5c   : > { %2345 = vmatprep.subr.bf16.mxu1 %v3313_v37  ;;  %v2855_v37 = vcombine.high %v4099_v33, %v4099_v33 }
  0x5e   : > { %2305 = vmatpush2.bf16.msra.mxu0 %v3315_v38  ;;  %v3401_v38 = vld [vmem:[%s3983_s12 + $0x204] ss:$8 sps:$4 sm:$0xff]  }
  0x5f   : > { %2346 = vmatpush2.bf16.msra.mxu1 %v3316_v39  ;;  %2306 = vmatprep.subr.bf16.mxu0 %v3317_v40  ;;  %v3404_v39 = vld [vmem:[%s3983_s12 + $0x304] ss:$8 sps:$4 sm:$0xff]   ;;  %v3399_v40 = vld [vmem:[%s3983_s12 + $0x200] ss:$8 sps:$4 sm:$0xff]  }
  0x60   : > { %2347 = vmatprep.subr.bf16.mxu1 %v3319_v41  ;;  %v3402_v41 = vld [vmem:[%s3983_s12 + $0x300] ss:$8 sps:$4 sm:$0xff]  }
  0x62   : > { %2307 = vmatpush2.bf16.msra.mxu0 %v3321_v42  ;;  %v3407_v42 = vld [vmem:[%s3983_s12 + $0x2f4] ss:$8 sps:$4 sm:$0xff]  }
  0x63   : > { %2348 = vmatpush2.bf16.msra.mxu1 %v3322_v43  ;;  %2308 = vmatprep.subr.bf16.mxu0 %v3323_v44  ;;  %v3410_v43 = vld [vmem:[%s3983_s12 + $0x3f4] ss:$8 sps:$4 sm:$0xff]   ;;  %v3405_v44 = vld [vmem:[%s3983_s12 + $0x2f0] ss:$8 sps:$4 sm:$0xff]  }
  0x64   : > { %2349 = vmatprep.subr.bf16.mxu1 %v3325_v45  ;;  %v3408_v45 = vld [vmem:[%s3983_s12 + $0x3f0] ss:$8 sps:$4 sm:$0xff]  }
  0x66   : > { %2309 = vmatpush2.bf16.msra.mxu0 %v3327_v49  ;;  %v3414_v49 = vld [vmem:[%s3983_s12 + $0x3e0] ss:$8 sps:$4 sm:$0xff]  }
  0x67   : > { %2350 = vmatpush2.bf16.msra.mxu1 %v3328_v50  ;;  %2310 = vmatprep.subr.bf16.mxu0 %v3329_v52  ;;  %v3419_v50 = vld [vmem:[%s3983_s12 + $0x2d4] ss:$8 sps:$4 sm:$0xff]   ;;  %v3417_v52 = vld [vmem:[%s3983_s12 + $0x2d0] ss:$8 sps:$4 sm:$0xff]  }
  0x68   : > { %2351 = vmatprep.subr.bf16.mxu1 %v3331_v53  ;;  %v3420_v53 = vld [vmem:[%s3983_s12 + $0x3d0] ss:$8 sps:$4 sm:$0xff]  }
  0x6a   : > { %2311 = vmatpush2.bf16.msra.mxu0 %v3333_v54  ;;  %v3425_v54 = vld [vmem:[%s3983_s12 + $0x2c4] ss:$8 sps:$4 sm:$0xff]  }
  0x6b   : > { %2352 = vmatpush2.bf16.msra.mxu1 %v3334_v55  ;;  %2312 = vmatprep.subr.bf16.mxu0 %v3335_v56  ;;  %v3428_v55 = vld [vmem:[%s3983_s12 + $0x3c4] ss:$8 sps:$4 sm:$0xff]   ;;  %v3423_v56 = vld [vmem:[%s3983_s12 + $0x2c0] ss:$8 sps:$4 sm:$0xff]  }
  0x6c   : > { %2353 = vmatprep.subr.bf16.mxu1 %v3337_v57  ;;  %v3426_v57 = vld [vmem:[%s3983_s12 + $0x3c0] ss:$8 sps:$4 sm:$0xff]  }
  0x6e   : > { %2313 = vmatpush2.bf16.msra.mxu0 %v3339_v58  ;;  %v3431_v58 = vld [vmem:[%s3983_s12 + $0x2b4] ss:$8 sps:$4 sm:$0xff]  }
  0x6f   : > { %2354 = vmatpush2.bf16.msra.mxu1 %v3340_v59  ;;  %2314 = vmatprep.subr.bf16.mxu0 %v3341_v60  ;;  %v3434_v59 = vld [vmem:[%s3983_s12 + $0x3b4] ss:$8 sps:$4 sm:$0xff]   ;;  %v3429_v60 = vld [vmem:[%s3983_s12 + $0x2b0] ss:$8 sps:$4 sm:$0xff]  }
  0x70   : > { %2355 = vmatprep.subr.bf16.mxu1 %v3343_v61  ;;  %v3432_v61 = vld [vmem:[%s3983_s12 + $0x3b0] ss:$8 sps:$4 sm:$0xff]  }
  0x72   : > { %2315 = vmatpush2.bf16.msra.mxu0 %v3345_v62  ;;  %v3437_v62 = vld [vmem:[%s3983_s12 + $0x2a4] ss:$8 sps:$4 sm:$0xff]  }
  0x73   : > { %2356 = vmatpush2.bf16.msra.mxu1 %v3346_v63  ;;  %2316 = vmatprep.subr.bf16.mxu0 %v3347_v0  ;;  %v3440_v63 = vld [vmem:[%s3983_s12 + $0x3a4] ss:$8 sps:$4 sm:$0xff]   ;;  %v3435_v0 = vld [vmem:[%s3983_s12 + $0x2a0] ss:$8 sps:$4 sm:$0xff]  }
  0x74   : > { %2357 = vmatprep.subr.bf16.mxu1 %v3349_v1  ;;  %v3438_v1 = vld [vmem:[%s3983_s12 + $0x3a0] ss:$8 sps:$4 sm:$0xff]  }
  0x76   : > { %2317 = vmatpush2.bf16.msra.mxu0 %v3351_v2  ;;  %v3443_v2 = vld [vmem:[%s3983_s12 + $0x294] ss:$8 sps:$4 sm:$0xff]  }
  0x77   : > { %2358 = vmatpush2.bf16.msra.mxu1 %v3352_v3  ;;  %2368 = vmatprep.subr.bf16.mxu0 %v3359_v4  ;;  %v3446_v3 = vld [vmem:[%s3983_s12 + $0x394] ss:$8 sps:$4 sm:$0xff]   ;;  %v3441_v4 = vld [vmem:[%s3983_s12 + $0x290] ss:$8 sps:$4 sm:$0xff]  }
  0x78   : > { %2409 = vmatprep.subr.bf16.mxu1 %v3362_v5  ;;  %v3444_v5 = vld [vmem:[%s3983_s12 + $0x390] ss:$8 sps:$4 sm:$0xff]  }
  0x79   : > { %2319 = vmatmul.mubr.bf16.vlgmr.msra.gmra.mxu0 %v2848_v6  ;;  %v3449_v6 = vld [vmem:[%s3983_s12 + $0x284] ss:$8 sps:$4 sm:$0xff]  }
  0x7a   : > { %2360 = vmatmul.mubr.bf16.vlgmr.msra.gmra.mxu1 %v2850_v7  ;;  %2369 = vmatpush1.bf16.msra.mxu0 %v3357_v8  ;;  %v3452_v7 = vld [vmem:[%s3983_s12 + $0x384] ss:$8 sps:$4 sm:$0xff]   ;;  %v3447_v8 = vld [vmem:[%s3983_s12 + $0x280] ss:$8 sps:$4 sm:$0xff]  }
  0x7b   : > { %2410 = vmatpush1.bf16.msra.mxu1 %v3360_v9  ;;  %2370 = vmatprep.subr.bf16.mxu0 %v3365_v10  ;;  %v3450_v9 = vld [vmem:[%s3983_s12 + $0x380] ss:$8 sps:$4 sm:$0xff]   ;;  %v3459_v10 = vld [vmem:[%s3983_s12 + $0x474] ss:$8 sps:$4 sm:$0xff]  }
  0x7c   : > { %2411 = vmatprep.subr.bf16.mxu1 %v3368_v11  ;;  %2400 = vmatprep.mubr.bf16.mxu0 %v2853_v36  ;;  %v3462_v11 = vld [vmem:[%s3983_s12 + $0x574] ss:$8 sps:$4 sm:$0xff]   ;;  %v3489_v36 = vld [vmem:[%s3983_s12 + $0x424] ss:$8 sps:$4 sm:$0xff]  }
  0x7d   : > { %2441 = vmatprep.mubr.bf16.mxu1 %v2855_v37  ;;  %v3492_v37 = vld [vmem:[%s3983_s12 + $0x524] ss:$8 sps:$4 sm:$0xff]  }
  0x7e   : > { %2371 = vmatpush1.bf16.msra.mxu0 %v3363_v12  ;;  %v2852_v12 = vcombine.low %v4094_v32, %v4094_v32  ;;  %v3483_v32 = vld [vmem:[%s3983_s12 + $0x434] ss:$8 sps:$4 sm:$0xff]  }
  0x7f   : > { %2412 = vmatpush1.bf16.msra.mxu1 %v3366_v13  ;;  %2372 = vmatprep.subr.bf16.mxu0 %v3371_v14  ;;  %v2854_v13 = vcombine.low %v4099_v33, %v4099_v33  ;;  %v3457_v14 = vld [vmem:[%s3983_s12 + $0x470] ss:$8 sps:$4 sm:$0xff]   ;;  %v3486_v33 = vld [vmem:[%s3983_s12 + $0x534] ss:$8 sps:$4 sm:$0xff]  }
  0x80   : > { %2413 = vmatprep.subr.bf16.mxu1 %v3374_v15  ;;  %v3460_v15 = vld [vmem:[%s3983_s12 + $0x570] ss:$8 sps:$4 sm:$0xff]  }
  0x82   : > { %2373 = vmatpush1.bf16.msra.mxu0 %v3369_v16  ;;  %v3465_v16 = vld [vmem:[%s3983_s12 + $0x464] ss:$8 sps:$4 sm:$0xff]  }
  0x83   : > { %2414 = vmatpush1.bf16.msra.mxu1 %v3372_v17  ;;  %2374 = vmatprep.subr.bf16.mxu0 %v3377_v18  ;;  %v3468_v17 = vld [vmem:[%s3983_s12 + $0x564] ss:$8 sps:$4 sm:$0xff]  }
  0x84   : > { %2415 = vmatprep.subr.bf16.mxu1 %v3380_v19  ;;  %v4156_v18 = vld [vmem:[%s4422_s0 + $0x20] sm:$0xff]  ;;  %v4161_v19 = vld [vmem:[%s4422_s0 + $0x28] sm:$0xff] }
  0x86   : > { %2375 = vmatpush1.bf16.msra.mxu0 %v3375_v20  ;;  %v2857_v20 = vcombine.high %v4156_v18, %v4156_v18 }
  0x87   : > { %2416 = vmatpush1.bf16.msra.mxu1 %v3378_v21  ;;  %2376 = vmatprep.subr.bf16.mxu0 %v3383_v22  ;;  %v2859_v21 = vcombine.high %v4161_v19, %v4161_v19  ;;  %v3463_v22 = vld [vmem:[%s3983_s12 + $0x460] ss:$8 sps:$4 sm:$0xff]  }
  0x88   : > { %2417 = vmatprep.subr.bf16.mxu1 %v3386_v23  ;;  %v3466_v23 = vld [vmem:[%s3983_s12 + $0x560] ss:$8 sps:$4 sm:$0xff]  }
  0x8a   : > { %2377 = vmatpush1.bf16.msra.mxu0 %v3381_v24  ;;  %v3471_v24 = vld [vmem:[%s3983_s12 + $0x454] ss:$8 sps:$4 sm:$0xff]  }
  0x8b   : > { %2418 = vmatpush1.bf16.msra.mxu1 %v3384_v25  ;;  %2378 = vmatprep.subr.bf16.mxu0 %v3389_v26  ;;  %v3474_v25 = vld [vmem:[%s3983_s12 + $0x554] ss:$8 sps:$4 sm:$0xff]   ;;  %v3469_v26 = vld [vmem:[%s3983_s12 + $0x450] ss:$8 sps:$4 sm:$0xff]  }
  0x8c   : > { %2419 = vmatprep.subr.bf16.mxu1 %v3392_v27  ;;  %v3472_v27 = vld [vmem:[%s3983_s12 + $0x550] ss:$8 sps:$4 sm:$0xff]  }
  0x8e   : > { %2379 = vmatpush1.bf16.msra.mxu0 %v3387_v28  ;;  %v3477_v28 = vld [vmem:[%s3983_s12 + $0x444] ss:$8 sps:$4 sm:$0xff]  }
  0x8f   : > { %2420 = vmatpush1.bf16.msra.mxu1 %v3390_v29  ;;  %2380 = vmatprep.subr.bf16.mxu0 %v3395_v30  ;;  %v3480_v29 = vld [vmem:[%s3983_s12 + $0x544] ss:$8 sps:$4 sm:$0xff]   ;;  %v3475_v30 = vld [vmem:[%s3983_s12 + $0x440] ss:$8 sps:$4 sm:$0xff]  }
  0x90   : > { %2421 = vmatprep.subr.bf16.mxu1 %v3398_v31  ;;  %v3478_v31 = vld [vmem:[%s3983_s12 + $0x540] ss:$8 sps:$4 sm:$0xff]  }
  0x92   : > { %2381 = vmatpush1.bf16.msra.mxu0 %v3393_v34  ;;  %v3481_v34 = vld [vmem:[%s3983_s12 + $0x430] ss:$8 sps:$4 sm:$0xff]  }
  0x93   : > { %2422 = vmatpush1.bf16.msra.mxu1 %v3396_v35  ;;  %2382 = vmatprep.subr.bf16.mxu0 %v3401_v38  ;;  %v3484_v35 = vld [vmem:[%s3983_s12 + $0x530] ss:$8 sps:$4 sm:$0xff]   ;;  %v3487_v38 = vld [vmem:[%s3983_s12 + $0x420] ss:$8 sps:$4 sm:$0xff]  }
  0x94   : > { %2423 = vmatprep.subr.bf16.mxu1 %v3404_v39  ;;  %v3490_v39 = vld [vmem:[%s3983_s12 + $0x520] ss:$8 sps:$4 sm:$0xff]  }
  0x96   : > { %2383 = vmatpush1.bf16.msra.mxu0 %v3399_v40  ;;  %v3495_v40 = vld [vmem:[%s3983_s12 + $0x414] ss:$8 sps:$4 sm:$0xff]  }
  0x97   : > { %2424 = vmatpush1.bf16.msra.mxu1 %v3402_v41  ;;  %2384 = vmatprep.subr.bf16.mxu0 %v3407_v42  ;;  %v3498_v41 = vld [vmem:[%s3983_s12 + $0x514] ss:$8 sps:$4 sm:$0xff]   ;;  %v3493_v42 = vld [vmem:[%s3983_s12 + $0x410] ss:$8 sps:$4 sm:$0xff]  }
  0x98   : > { %2425 = vmatprep.subr.bf16.mxu1 %v3410_v43  ;;  %v3496_v43 = vld [vmem:[%s3983_s12 + $0x510] ss:$8 sps:$4 sm:$0xff]  }
  0x9a   : > { %2385 = vmatpush2.bf16.msra.mxu0 %v3405_v44  ;;  %v3501_v44 = vld [vmem:[%s3983_s12 + $0x404] ss:$8 sps:$4 sm:$0xff]  }
  0x9b   : > { %2426 = vmatpush2.bf16.msra.mxu1 %v3408_v45  ;;  %2386 = vmatprep.subr.bf16.mxu0 %v3413_v46  ;;  %v3504_v45 = vld [vmem:[%s3983_s12 + $0x504] ss:$8 sps:$4 sm:$0xff]   ;;  %v3499_v46 = vld [vmem:[%s3983_s12 + $0x400] ss:$8 sps:$4 sm:$0xff]  }
  0x9c   : > { %2427 = vmatprep.subr.bf16.mxu1 %v3416_v47  ;;  %v3502_v47 = vld [vmem:[%s3983_s12 + $0x500] ss:$8 sps:$4 sm:$0xff]  }
  0x9e   : > { %2387 = vmatpush2.bf16.msra.mxu0 %v3411_v48  ;;  %v3507_v48 = vld [vmem:[%s3983_s12 + $0x4f4] ss:$8 sps:$4 sm:$0xff]  }
  0x9f   : > { %2428 = vmatpush2.bf16.msra.mxu1 %v3414_v49  ;;  %2388 = vmatprep.subr.bf16.mxu0 %v3419_v50  ;;  %v3510_v49 = vld [vmem:[%s3983_s12 + $0x5f4] ss:$8 sps:$4 sm:$0xff]   ;;  %v3505_v50 = vld [vmem:[%s3983_s12 + $0x4f0] ss:$8 sps:$4 sm:$0xff]  }
  0xa0   : > { %2429 = vmatprep.subr.bf16.mxu1 %v3422_v51  ;;  %v3508_v51 = vld [vmem:[%s3983_s12 + $0x5f0] ss:$8 sps:$4 sm:$0xff]  }
  0xa2   : > { %2389 = vmatpush2.bf16.msra.mxu0 %v3417_v52  ;;  %v3513_v52 = vld [vmem:[%s3983_s12 + $0x4e4] ss:$8 sps:$4 sm:$0xff]  }
  0xa3   : > { %2430 = vmatpush2.bf16.msra.mxu1 %v3420_v53  ;;  %2390 = vmatprep.subr.bf16.mxu0 %v3425_v54  ;;  %v3516_v53 = vld [vmem:[%s3983_s12 + $0x5e4] ss:$8 sps:$4 sm:$0xff]   ;;  %v3511_v54 = vld [vmem:[%s3983_s12 + $0x4e0] ss:$8 sps:$4 sm:$0xff]  }
  0xa4   : > { %2431 = vmatprep.subr.bf16.mxu1 %v3428_v55  ;;  %v3514_v55 = vld [vmem:[%s3983_s12 + $0x5e0] ss:$8 sps:$4 sm:$0xff]  }
  0xa6   : > { %2391 = vmatpush2.bf16.msra.mxu0 %v3423_v56  ;;  %v3519_v56 = vld [vmem:[%s3983_s12 + $0x4d4] ss:$8 sps:$4 sm:$0xff]  }
  0xa7   : > { %2432 = vmatpush2.bf16.msra.mxu1 %v3426_v57  ;;  %2392 = vmatprep.subr.bf16.mxu0 %v3431_v58  ;;  %v3522_v57 = vld [vmem:[%s3983_s12 + $0x5d4] ss:$8 sps:$4 sm:$0xff]   ;;  %v3517_v58 = vld [vmem:[%s3983_s12 + $0x4d0] ss:$8 sps:$4 sm:$0xff]  }
  0xa8   : > { %2433 = vmatprep.subr.bf16.mxu1 %v3434_v59  ;;  %v3520_v59 = vld [vmem:[%s3983_s12 + $0x5d0] ss:$8 sps:$4 sm:$0xff]  }
  0xaa   : > { %2393 = vmatpush2.bf16.msra.mxu0 %v3429_v60  ;;  %v3525_v60 = vld [vmem:[%s3983_s12 + $0x4c4] ss:$8 sps:$4 sm:$0xff]  }
  0xab   : > { %2434 = vmatpush2.bf16.msra.mxu1 %v3432_v61  ;;  %2394 = vmatprep.subr.bf16.mxu0 %v3437_v62  ;;  %v3528_v61 = vld [vmem:[%s3983_s12 + $0x5c4] ss:$8 sps:$4 sm:$0xff]   ;;  %v3523_v62 = vld [vmem:[%s3983_s12 + $0x4c0] ss:$8 sps:$4 sm:$0xff]  }
  0xac   : > { %2435 = vmatprep.subr.bf16.mxu1 %v3440_v63  ;;  %v3526_v63 = vld [vmem:[%s3983_s12 + $0x5c0] ss:$8 sps:$4 sm:$0xff]  }
  0xae   : > { %2395 = vmatpush2.bf16.msra.mxu0 %v3435_v0  ;;  %v3531_v0 = vld [vmem:[%s3983_s12 + $0x4b4] ss:$8 sps:$4 sm:$0xff]  }
  0xaf   : > { %2436 = vmatpush2.bf16.msra.mxu1 %v3438_v1  ;;  %2396 = vmatprep.subr.bf16.mxu0 %v3443_v2  ;;  %v3534_v1 = vld [vmem:[%s3983_s12 + $0x5b4] ss:$8 sps:$4 sm:$0xff]   ;;  %v3529_v2 = vld [vmem:[%s3983_s12 + $0x4b0] ss:$8 sps:$4 sm:$0xff]  }
  0xb0   : > { %2437 = vmatprep.subr.bf16.mxu1 %v3446_v3  ;;  %v3532_v3 = vld [vmem:[%s3983_s12 + $0x5b0] ss:$8 sps:$4 sm:$0xff]  }
  0xb2   : > { %2397 = vmatpush2.bf16.msra.mxu0 %v3441_v4  ;;  %v3537_v4 = vld [vmem:[%s3983_s12 + $0x4a4] ss:$8 sps:$4 sm:$0xff]  }
  0xb3   : > { %2438 = vmatpush2.bf16.msra.mxu1 %v3444_v5  ;;  %2398 = vmatprep.subr.bf16.mxu0 %v3449_v6  ;;  %v3540_v5 = vld [vmem:[%s3983_s12 + $0x5a4] ss:$8 sps:$4 sm:$0xff]   ;;  %v3535_v6 = vld [vmem:[%s3983_s12 + $0x4a0] ss:$8 sps:$4 sm:$0xff]  }
  0xb4   : > { %2439 = vmatprep.subr.bf16.mxu1 %v3452_v7  ;;  %v3538_v7 = vld [vmem:[%s3983_s12 + $0x5a0] ss:$8 sps:$4 sm:$0xff]  }
  0xb6   : > { %2399 = vmatpush2.bf16.msra.mxu0 %v3447_v8  ;;  %v3543_v8 = vld [vmem:[%s3983_s12 + $0x494] ss:$8 sps:$4 sm:$0xff]  }
  0xb7   : > { %2440 = vmatpush2.bf16.msra.mxu1 %v3450_v9  ;;  %2450 = vmatprep.subr.bf16.mxu0 %v3459_v10  ;;  %v3546_v9 = vld [vmem:[%s3983_s12 + $0x594] ss:$8 sps:$4 sm:$0xff]   ;;  %v3541_v10 = vld [vmem:[%s3983_s12 + $0x490] ss:$8 sps:$4 sm:$0xff]  }
  0xb8   : > { %2491 = vmatprep.subr.bf16.mxu1 %v3462_v11  ;;  %v3544_v11 = vld [vmem:[%s3983_s12 + $0x590] ss:$8 sps:$4 sm:$0xff]  }
  0xb9   : > { %2401 = vmatmul.mubr.bf16.vlgmr.msra.gmra.mxu0 %v2852_v12  ;;  %v3549_v12 = vld [vmem:[%s3983_s12 + $0x484] ss:$8 sps:$4 sm:$0xff]  }
  0xba   : > { %2442 = vmatmul.mubr.bf16.vlgmr.msra.gmra.mxu1 %v2854_v13  ;;  %2451 = vmatpush1.bf16.msra.mxu0 %v3457_v14  ;;  %v3552_v13 = vld [vmem:[%s3983_s12 + $0x584] ss:$8 sps:$4 sm:$0xff]   ;;  %v3547_v14 = vld [vmem:[%s3983_s12 + $0x480] ss:$8 sps:$4 sm:$0xff]  }
  0xbb   : > { %2492 = vmatpush1.bf16.msra.mxu1 %v3460_v15  ;;  %2452 = vmatprep.subr.bf16.mxu0 %v3465_v16  ;;  %v3550_v15 = vld [vmem:[%s3983_s12 + $0x580] ss:$8 sps:$4 sm:$0xff]   ;;  %v3559_v16 = vld [vmem:[%s3983_s12 + $0x674] ss:$8 sps:$4 sm:$0xff]  }
  0xbc   : > { %2493 = vmatprep.subr.bf16.mxu1 %v3468_v17  ;;  %2482 = vmatprep.mubr.bf16.mxu0 %v2857_v20  ;;  %v3562_v17 = vld [vmem:[%s3983_s12 + $0x774] ss:$8 sps:$4 sm:$0xff]   ;;  %v3557_v20 = vld [vmem:[%s3983_s12 + $0x670] ss:$8 sps:$4 sm:$0xff]  }
  0xbd   : > { %2523 = vmatprep.mubr.bf16.mxu1 %v2859_v21  ;;  %v4231_v21 = vld [vmem:[%s4422_s0 + $0x30] sm:$0xff] }
  0xbe   : > { %2453 = vmatpush1.bf16.msra.mxu0 %v3463_v22  ;;  %v2856_v22 = vcombine.low %v4156_v18, %v4156_v18  ;;  %v2861_v18 = vcombine.high %v4231_v21, %v4231_v21 }
  0xbf   : > { %2494 = vmatpush1.bf16.msra.mxu1 %v3466_v23  ;;  %2454 = vmatprep.subr.bf16.mxu0 %v3471_v24  ;;  %v2858_v23 = vcombine.low %v4161_v19, %v4161_v19  ;;  %v4240_v24 = vld [vmem:[%s4422_s0 + $0x38] sm:$0xff] }
  0xc0   : > { %2495 = vmatprep.subr.bf16.mxu1 %v3474_v25  ;;  %v3560_v25 = vld [vmem:[%s3983_s12 + $0x770] ss:$8 sps:$4 sm:$0xff]   ;;  %v2863_v19 = vcombine.high %v4240_v24, %v4240_v24 }
  0xc2   : > { %2455 = vmatpush1.bf16.msra.mxu0 %v3469_v26  ;;  %v3565_v26 = vld [vmem:[%s3983_s12 + $0x664] ss:$8 sps:$4 sm:$0xff]  }
  0xc3   : > { %2496 = vmatpush1.bf16.msra.mxu1 %v3472_v27  ;;  %2456 = vmatprep.subr.bf16.mxu0 %v3477_v28  ;;  %v3568_v27 = vld [vmem:[%s3983_s12 + $0x764] ss:$8 sps:$4 sm:$0xff]   ;;  %v3563_v28 = vld [vmem:[%s3983_s12 + $0x660] ss:$8 sps:$4 sm:$0xff]  }
  0xc4   : > { %2497 = vmatprep.subr.bf16.mxu1 %v3480_v29  ;;  %v3566_v29 = vld [vmem:[%s3983_s12 + $0x760] ss:$8 sps:$4 sm:$0xff]  }
  0xc6   : > { %2457 = vmatpush1.bf16.msra.mxu0 %v3475_v30  ;;  %v3571_v30 = vld [vmem:[%s3983_s12 + $0x654] ss:$8 sps:$4 sm:$0xff]  }
  0xc7   : > { %2498 = vmatpush1.bf16.msra.mxu1 %v3478_v31  ;;  %2458 = vmatprep.subr.bf16.mxu0 %v3483_v32  ;;  %v3574_v31 = vld [vmem:[%s3983_s12 + $0x754] ss:$8 sps:$4 sm:$0xff]   ;;  %v3569_v32 = vld [vmem:[%s3983_s12 + $0x650] ss:$8 sps:$4 sm:$0xff]  }
  0xc8   : > { %2499 = vmatprep.subr.bf16.mxu1 %v3486_v33  ;;  %v3572_v33 = vld [vmem:[%s3983_s12 + $0x750] ss:$8 sps:$4 sm:$0xff]  }
  0xca   : > { %2459 = vmatpush1.bf16.msra.mxu0 %v3481_v34  ;;  %v3577_v34 = vld [vmem:[%s3983_s12 + $0x644] ss:$8 sps:$4 sm:$0xff]  }
  0xcb   : > { %2500 = vmatpush1.bf16.msra.mxu1 %v3484_v35  ;;  %2460 = vmatprep.subr.bf16.mxu0 %v3489_v36  ;;  %v3580_v35 = vld [vmem:[%s3983_s12 + $0x744] ss:$8 sps:$4 sm:$0xff]   ;;  %v3575_v36 = vld [vmem:[%s3983_s12 + $0x640] ss:$8 sps:$4 sm:$0xff]  }
  0xcc   : > { %2501 = vmatprep.subr.bf16.mxu1 %v3492_v37  ;;  %v3578_v37 = vld [vmem:[%s3983_s12 + $0x740] ss:$8 sps:$4 sm:$0xff]  }
  0xce   : > { %2461 = vmatpush1.bf16.msra.mxu0 %v3487_v38  ;;  %v3583_v38 = vld [vmem:[%s3983_s12 + $0x634] ss:$8 sps:$4 sm:$0xff]  }
  0xcf   : > { %2502 = vmatpush1.bf16.msra.mxu1 %v3490_v39  ;;  %2462 = vmatprep.subr.bf16.mxu0 %v3495_v40  ;;  %v3586_v39 = vld [vmem:[%s3983_s12 + $0x734] ss:$8 sps:$4 sm:$0xff]   ;;  %v3581_v40 = vld [vmem:[%s3983_s12 + $0x630] ss:$8 sps:$4 sm:$0xff]  }
  0xd0   : > { %2503 = vmatprep.subr.bf16.mxu1 %v3498_v41  ;;  %v3584_v41 = vld [vmem:[%s3983_s12 + $0x730] ss:$8 sps:$4 sm:$0xff]  }
  0xd2   : > { %2463 = vmatpush1.bf16.msra.mxu0 %v3493_v42  ;;  %v3589_v42 = vld [vmem:[%s3983_s12 + $0x624] ss:$8 sps:$4 sm:$0xff]  }
  0xd3   : > { %2504 = vmatpush1.bf16.msra.mxu1 %v3496_v43  ;;  %2464 = vmatprep.subr.bf16.mxu0 %v3501_v44  ;;  %v3592_v43 = vld [vmem:[%s3983_s12 + $0x724] ss:$8 sps:$4 sm:$0xff]   ;;  %v3587_v44 = vld [vmem:[%s3983_s12 + $0x620] ss:$8 sps:$4 sm:$0xff]  }
  0xd4   : > { %2505 = vmatprep.subr.bf16.mxu1 %v3504_v45  ;;  %v3590_v45 = vld [vmem:[%s3983_s12 + $0x720] ss:$8 sps:$4 sm:$0xff]  }
  0xd6   : > { %2465 = vmatpush1.bf16.msra.mxu0 %v3499_v46  ;;  %v3595_v46 = vld [vmem:[%s3983_s12 + $0x614] ss:$8 sps:$4 sm:$0xff]  }
  0xd7   : > { %2506 = vmatpush1.bf16.msra.mxu1 %v3502_v47  ;;  %2466 = vmatprep.subr.bf16.mxu0 %v3507_v48  ;;  %v3598_v47 = vld [vmem:[%s3983_s12 + $0x714] ss:$8 sps:$4 sm:$0xff]   ;;  %v3593_v48 = vld [vmem:[%s3983_s12 + $0x610] ss:$8 sps:$4 sm:$0xff]  }
  0xd8   : > { %2507 = vmatprep.subr.bf16.mxu1 %v3510_v49  ;;  %v3596_v49 = vld [vmem:[%s3983_s12 + $0x710] ss:$8 sps:$4 sm:$0xff]  }
  0xda   : > { %2467 = vmatpush2.bf16.msra.mxu0 %v3505_v50  ;;  %v3601_v50 = vld [vmem:[%s3983_s12 + $0x604] ss:$8 sps:$4 sm:$0xff]  }
  0xdb   : > { %2508 = vmatpush2.bf16.msra.mxu1 %v3508_v51  ;;  %2468 = vmatprep.subr.bf16.mxu0 %v3513_v52  ;;  %v3604_v51 = vld [vmem:[%s3983_s12 + $0x704] ss:$8 sps:$4 sm:$0xff]   ;;  %v3599_v52 = vld [vmem:[%s3983_s12 + $0x600] ss:$8 sps:$4 sm:$0xff]  }
  0xdc   : > { %2509 = vmatprep.subr.bf16.mxu1 %v3516_v53  ;;  %v3602_v53 = vld [vmem:[%s3983_s12 + $0x700] ss:$8 sps:$4 sm:$0xff]  }
  0xde   : > { %2469 = vmatpush2.bf16.msra.mxu0 %v3511_v54  ;;  %v3607_v54 = vld [vmem:[%s3983_s12 + $0x6f4] ss:$8 sps:$4 sm:$0xff]  }
  0xdf   : > { %2510 = vmatpush2.bf16.msra.mxu1 %v3514_v55  ;;  %2470 = vmatprep.subr.bf16.mxu0 %v3519_v56  ;;  %v3610_v55 = vld [vmem:[%s3983_s12 + $0x7f4] ss:$8 sps:$4 sm:$0xff]   ;;  %v3605_v56 = vld [vmem:[%s3983_s12 + $0x6f0] ss:$8 sps:$4 sm:$0xff]  }
  0xe0   : > { %2511 = vmatprep.subr.bf16.mxu1 %v3522_v57  ;;  %v3608_v57 = vld [vmem:[%s3983_s12 + $0x7f0] ss:$8 sps:$4 sm:$0xff]  }
  0xe2   : > { %2471 = vmatpush2.bf16.msra.mxu0 %v3517_v58  ;;  %v3613_v58 = vld [vmem:[%s3983_s12 + $0x6e4] ss:$8 sps:$4 sm:$0xff]  }
  0xe3   : > { %2512 = vmatpush2.bf16.msra.mxu1 %v3520_v59  ;;  %2472 = vmatprep.subr.bf16.mxu0 %v3525_v60  ;;  %v3616_v59 = vld [vmem:[%s3983_s12 + $0x7e4] ss:$8 sps:$4 sm:$0xff]   ;;  %v3611_v60 = vld [vmem:[%s3983_s12 + $0x6e0] ss:$8 sps:$4 sm:$0xff]  }
  0xe4   : > { %2513 = vmatprep.subr.bf16.mxu1 %v3528_v61  ;;  %v3614_v61 = vld [vmem:[%s3983_s12 + $0x7e0] ss:$8 sps:$4 sm:$0xff]  }
  0xe6   : > { %2473 = vmatpush2.bf16.msra.mxu0 %v3523_v62  ;;  %v3619_v62 = vld [vmem:[%s3983_s12 + $0x6d4] ss:$8 sps:$4 sm:$0xff]  }
  0xe7   : > { %2514 = vmatpush2.bf16.msra.mxu1 %v3526_v63  ;;  %2474 = vmatprep.subr.bf16.mxu0 %v3531_v0  ;;  %v3622_v63 = vld [vmem:[%s3983_s12 + $0x7d4] ss:$8 sps:$4 sm:$0xff]   ;;  %v3617_v0 = vld [vmem:[%s3983_s12 + $0x6d0] ss:$8 sps:$4 sm:$0xff]  }
  0xe8   : > { %2515 = vmatprep.subr.bf16.mxu1 %v3534_v1  ;;  %v3620_v1 = vld [vmem:[%s3983_s12 + $0x7d0] ss:$8 sps:$4 sm:$0xff]  }
  0xea   : > { %2475 = vmatpush2.bf16.msra.mxu0 %v3529_v2  ;;  %v3625_v2 = vld [vmem:[%s3983_s12 + $0x6c4] ss:$8 sps:$4 sm:$0xff]  }
  0xeb   : > { %2516 = vmatpush2.bf16.msra.mxu1 %v3532_v3  ;;  %2476 = vmatprep.subr.bf16.mxu0 %v3537_v4  ;;  %v3628_v3 = vld [vmem:[%s3983_s12 + $0x7c4] ss:$8 sps:$4 sm:$0xff]   ;;  %v3623_v4 = vld [vmem:[%s3983_s12 + $0x6c0] ss:$8 sps:$4 sm:$0xff]  }
  0xec   : > { %2517 = vmatprep.subr.bf16.mxu1 %v3540_v5  ;;  %v3626_v5 = vld [vmem:[%s3983_s12 + $0x7c0] ss:$8 sps:$4 sm:$0xff]  }
  0xee   : > { %2477 = vmatpush2.bf16.msra.mxu0 %v3535_v6  ;;  %v3631_v6 = vld [vmem:[%s3983_s12 + $0x6b4] ss:$8 sps:$4 sm:$0xff]  }
  0xef   : > { %2518 = vmatpush2.bf16.msra.mxu1 %v3538_v7  ;;  %2478 = vmatprep.subr.bf16.mxu0 %v3543_v8  ;;  %v3634_v7 = vld [vmem:[%s3983_s12 + $0x7b4] ss:$8 sps:$4 sm:$0xff]   ;;  %v3629_v8 = vld [vmem:[%s3983_s12 + $0x6b0] ss:$8 sps:$4 sm:$0xff]  }
  0xf0   : > { %2519 = vmatprep.subr.bf16.mxu1 %v3546_v9  ;;  %v3632_v9 = vld [vmem:[%s3983_s12 + $0x7b0] ss:$8 sps:$4 sm:$0xff]  }
  0xf2   : > { %2479 = vmatpush2.bf16.msra.mxu0 %v3541_v10  ;;  %v3637_v10 = vld [vmem:[%s3983_s12 + $0x6a4] ss:$8 sps:$4 sm:$0xff]  }
  0xf3   : > { %2520 = vmatpush2.bf16.msra.mxu1 %v3544_v11  ;;  %2480 = vmatprep.subr.bf16.mxu0 %v3549_v12  ;;  %v3640_v11 = vld [vmem:[%s3983_s12 + $0x7a4] ss:$8 sps:$4 sm:$0xff]   ;;  %v3635_v12 = vld [vmem:[%s3983_s12 + $0x6a0] ss:$8 sps:$4 sm:$0xff]  }
  0xf4   : > { %2521 = vmatprep.subr.bf16.mxu1 %v3552_v13  ;;  %v3638_v13 = vld [vmem:[%s3983_s12 + $0x7a0] ss:$8 sps:$4 sm:$0xff]  }
  0xf6   : > { %2481 = vmatpush2.bf16.msra.mxu0 %v3547_v14  ;;  %v606_v14 = vlaneseq }
  0xf7   : > { %2522 = vmatpush2.bf16.msra.mxu1 %v3550_v15  ;;  %2532 = vmatprep.subr.bf16.mxu0 %v3559_v16  ;;  %v3643_v15 = vld [vmem:[%s3983_s12 + $0x694] ss:$8 sps:$4 sm:$0xff]  }
  0xf8   : > { %2573 = vmatprep.subr.bf16.mxu1 %v3562_v17  ;;  %v3646_v16 = vld [vmem:[%s3983_s12 + $0x794] ss:$8 sps:$4 sm:$0xff]   ;;  %v3641_v17 = vld [vmem:[%s3983_s12 + $0x690] ss:$8 sps:$4 sm:$0xff]  }
  0xf9   : > { %2483 = vmatmul.mubr.bf16.vlgmr.msra.gmra.mxu0 %v2856_v22  ;;  %v607_v22 = vshrl.u32 %v606_v14, 7  ;;  %v3702_v14 = vld [vmem:[%s3983_s12 + $0x900] ss:$8 sps:$4 sm:$0xff]  }
  0xfa   : > { %2524 = vmatmul.mubr.bf16.vlgmr.msra.gmra.mxu1 %v2858_v23  ;;  %2533 = vmatpush1.bf16.msra.mxu0 %v3557_v20  ;;  %v3644_v20 = vld [vmem:[%s3983_s12 + $0x790] ss:$8 sps:$4 sm:$0xff]   ;;  %v3649_v23 = vld [vmem:[%s3983_s12 + $0x684] ss:$8 sps:$4 sm:$0xff]  }
  0xfb   : > { %2574 = vmatpush1.bf16.msra.mxu1 %v3560_v25  ;;  %2534 = vmatprep.subr.bf16.mxu0 %v3565_v26  ;;  %v3652_v25 = vld [vmem:[%s3983_s12 + $0x784] ss:$8 sps:$4 sm:$0xff]   ;;  %v3647_v26 = vld [vmem:[%s3983_s12 + $0x680] ss:$8 sps:$4 sm:$0xff]  }
  0xfc   : > { %2575 = vmatprep.subr.bf16.mxu1 %v3568_v27  ;;  %2564 = vmatprep.mubr.bf16.mxu0 %v2861_v18  ;;  %v3650_v27 = vld [vmem:[%s3983_s12 + $0x780] ss:$8 sps:$4 sm:$0xff]   ;;  %v608_v18 = vsub.s32 0, %v607_v22 }
  0xfd   : > { %2605 = vmatprep.mubr.bf16.mxu1 %v2863_v19  ;;  %v604_v19 = vld [vmem:[%s3989_s30] sm:$0x3] }
  0xfe   : > { %2535 = vmatpush1.bf16.msra.mxu0 %v3563_v28  ;;  %v3659_v28 = vld [vmem:[%s3983_s12 + $0x874] ss:$8 sps:$4 sm:$0xff]  }
  0xff   : > { %2576 = vmatpush1.bf16.msra.mxu1 %v3566_v29  ;;  %2536 = vmatprep.subr.bf16.mxu0 %v3571_v30  ;;  %v3662_v29 = vld [vmem:[%s3983_s12 + $0x974] ss:$8 sps:$4 sm:$0xff]   ;;  %v612_v30 = vsub.s32 1, %v607_v22  ;;  %v3713_v22 = vld [vmem:[%s3983_s12 + $0x8e4] ss:$8 sps:$4 sm:$0xff]  }
 0x100   : > { %2577 = vmatprep.subr.bf16.mxu1 %v3574_v31  ;;  %v2860_v31 = vcombine.low %v4231_v21, %v4231_v21  ;;  %v3665_v21 = vld [vmem:[%s3983_s12 + $0x864] ss:$8 sps:$4 sm:$0xff]  }
 0x102   : > { %2537 = vmatpush1.bf16.msra.mxu0 %v3569_v32  ;;  %v2862_v32 = vcombine.low %v4240_v24, %v4240_v24  ;;  %v3668_v24 = vld [vmem:[%s3983_s12 + $0x964] ss:$8 sps:$4 sm:$0xff]  }
 0x103   : > { %2578 = vmatpush1.bf16.msra.mxu1 %v3572_v33  ;;  %2538 = vmatprep.subr.bf16.mxu0 %v3577_v34  ;;  %v4317_v33 = vld [vmem:[%s4422_s0 + $0x40] sm:$0xff]  ;;  %v4322_v34 = vld [vmem:[%s4422_s0 + $0x48] sm:$0xff] }
 0x104   : > { %2579 = vmatprep.subr.bf16.mxu1 %v3580_v35  ;;  %v609_v35 = vrot.slane %v604_v19, %v608_v18  ;;  %v3722_v18 = vld [vmem:[%s3983_s12 + $0x9d4] ss:$8 sps:$4 sm:$0xff]  }
 0x106   : > { %2539 = vmatpush1.bf16.msra.mxu0 %v3575_v36  ;;  %v3657_v36 = vld [vmem:[%s3983_s12 + $0x870] ss:$8 sps:$4 sm:$0xff]  }
 0x107   : > { %2580 = vmatpush1.bf16.msra.mxu1 %v3578_v37  ;;  %2540 = vmatprep.subr.bf16.mxu0 %v3583_v38  ;;  %v3660_v37 = vld [vmem:[%s3983_s12 + $0x970] ss:$8 sps:$4 sm:$0xff]   ;;  %v613_v38 = vrot.slane %v604_v19, %v612_v30  ;;  %v3728_v30 = vld [vmem:[%s3983_s12 + $0x9c4] ss:$8 sps:$4 sm:$0xff]  }
 0x108   : > { %2581 = vmatprep.subr.bf16.mxu1 %v3586_v39  ;;  %v2865_v39 = vcombine.high %v4317_v33, %v4317_v33  ;;  %v3717_v19 = vld [vmem:[%s3983_s12 + $0x8d0] ss:$8 sps:$4 sm:$0xff]  }
 0x10a   : > { %2541 = vmatpush1.bf16.msra.mxu0 %v3581_v40  ;;  %v2867_v40 = vcombine.high %v4322_v34, %v4322_v34 }
 0x10b   : > { %2582 = vmatpush1.bf16.msra.mxu1 %v3584_v41  ;;  %2542 = vmatprep.subr.bf16.mxu0 %v3589_v42 }
 0x10c   : > { %2583 = vmatprep.subr.bf16.mxu1 %v3592_v43 }
 0x10e   : > { %2543 = vmatpush1.bf16.msra.mxu0 %v3587_v44  ;;  %v3663_v44 = vld [vmem:[%s3983_s12 + $0x860] ss:$8 sps:$4 sm:$0xff]  }
 0x10f   : > { %2584 = vmatpush1.bf16.msra.mxu1 %v3590_v45  ;;  %2544 = vmatprep.subr.bf16.mxu0 %v3595_v46  ;;  %v3666_v45 = vld [vmem:[%s3983_s12 + $0x960] ss:$8 sps:$4 sm:$0xff]  }
 0x110   : > { %2585 = vmatprep.subr.bf16.mxu1 %v3598_v47 }
 0x112   : > { %2545 = vmatpush1.bf16.msra.mxu0 %v3593_v48  ;;  %v3671_v48 = vld [vmem:[%s3983_s12 + $0x854] ss:$8 sps:$4 sm:$0xff]  }
 0x113   : > { %2586 = vmatpush1.bf16.msra.mxu1 %v3596_v49  ;;  %2546 = vmatprep.subr.bf16.mxu0 %v3601_v50  ;;  %v3674_v49 = vld [vmem:[%s3983_s12 + $0x954] ss:$8 sps:$4 sm:$0xff]  }
 0x114   : > { %2587 = vmatprep.subr.bf16.mxu1 %v3604_v51 }
 0x116   : > { %2547 = vmatpush1.bf16.msra.mxu0 %v3599_v52 }
 0x117   : > { %2588 = vmatpush1.bf16.msra.mxu1 %v3602_v53  ;;  %2548 = vmatprep.subr.bf16.mxu0 %v3607_v54 }
 0x118   : > { %2589 = vmatprep.subr.bf16.mxu1 %v3610_v55  ;;  %v3669_v55 = vld [vmem:[%s3983_s12 + $0x850] ss:$8 sps:$4 sm:$0xff]  }
 0x11a   : > { %2549 = vmatpush2.bf16.msra.mxu0 %v3605_v56  ;;  %v3672_v56 = vld [vmem:[%s3983_s12 + $0x950] ss:$8 sps:$4 sm:$0xff]  }
 0x11b   : > { %2590 = vmatpush2.bf16.msra.mxu1 %v3608_v57  ;;  %2550 = vmatprep.subr.bf16.mxu0 %v3613_v58 }
 0x11c   : > { %2591 = vmatprep.subr.bf16.mxu1 %v3616_v59  ;;  %v3677_v59 = vld [vmem:[%s3983_s12 + $0x844] ss:$8 sps:$4 sm:$0xff]  }
 0x11e   : > { %2551 = vmatpush2.bf16.msra.mxu0 %v3611_v60  ;;  %v3680_v60 = vld [vmem:[%s3983_s12 + $0x944] ss:$8 sps:$4 sm:$0xff]  }
 0x11f   : > { %2592 = vmatpush2.bf16.msra.mxu1 %v3614_v61  ;;  %2552 = vmatprep.subr.bf16.mxu0 %v3619_v62  ;;  %v3675_v61 = vld [vmem:[%s3983_s12 + $0x840] ss:$8 sps:$4 sm:$0xff]  }
 0x120   : > { %2593 = vmatprep.subr.bf16.mxu1 %v3622_v63  ;;  %v3678_v62 = vld [vmem:[%s3983_s12 + $0x940] ss:$8 sps:$4 sm:$0xff]   ;;  %v3683_v63 = vld [vmem:[%s3983_s12 + $0x834] ss:$8 sps:$4 sm:$0xff]  }
 0x122   : > { %2553 = vmatpush2.bf16.msra.mxu0 %v3617_v0  ;;  %v3686_v0 = vld [vmem:[%s3983_s12 + $0x934] ss:$8 sps:$4 sm:$0xff]  }
 0x123   : > { %2594 = vmatpush2.bf16.msra.mxu1 %v3620_v1  ;;  %2554 = vmatprep.subr.bf16.mxu0 %v3625_v2  ;;  %v3681_v1 = vld [vmem:[%s3983_s12 + $0x830] ss:$8 sps:$4 sm:$0xff]  }
 0x124   : > { %2595 = vmatprep.subr.bf16.mxu1 %v3628_v3  ;;  %v3684_v2 = vld [vmem:[%s3983_s12 + $0x930] ss:$8 sps:$4 sm:$0xff]   ;;  %v3689_v3 = vld [vmem:[%s3983_s12 + $0x824] ss:$8 sps:$4 sm:$0xff]  }
 0x126   : > { %2555 = vmatpush2.bf16.msra.mxu0 %v3623_v4  ;;  %v3692_v4 = vld [vmem:[%s3983_s12 + $0x924] ss:$8 sps:$4 sm:$0xff]  }
 0x127   : > { %2596 = vmatpush2.bf16.msra.mxu1 %v3626_v5  ;;  %2556 = vmatprep.subr.bf16.mxu0 %v3631_v6  ;;  %v3687_v5 = vld [vmem:[%s3983_s12 + $0x820] ss:$8 sps:$4 sm:$0xff]  }
 0x128   : > { %2597 = vmatprep.subr.bf16.mxu1 %v3634_v7  ;;  %v3690_v6 = vld [vmem:[%s3983_s12 + $0x920] ss:$8 sps:$4 sm:$0xff]   ;;  %v3695_v7 = vld [vmem:[%s3983_s12 + $0x814] ss:$8 sps:$4 sm:$0xff]  }
 0x12a   : > { %2557 = vmatpush2.bf16.msra.mxu0 %v3629_v8  ;;  %v3698_v8 = vld [vmem:[%s3983_s12 + $0x914] ss:$8 sps:$4 sm:$0xff]  }
 0x12b   : > { %2598 = vmatpush2.bf16.msra.mxu1 %v3632_v9  ;;  %2558 = vmatprep.subr.bf16.mxu0 %v3637_v10  ;;  %v3693_v9 = vld [vmem:[%s3983_s12 + $0x810] ss:$8 sps:$4 sm:$0xff]  }
 0x12c   : > { %2599 = vmatprep.subr.bf16.mxu1 %v3640_v11  ;;  %v3696_v10 = vld [vmem:[%s3983_s12 + $0x910] ss:$8 sps:$4 sm:$0xff]   ;;  %v3701_v11 = vld [vmem:[%s3983_s12 + $0x804] ss:$8 sps:$4 sm:$0xff]  }
 0x12e   : > { %2559 = vmatpush2.bf16.msra.mxu0 %v3635_v12  ;;  %v3704_v12 = vld [vmem:[%s3983_s12 + $0x904] ss:$8 sps:$4 sm:$0xff]  }
 0x12f   : > { %2600 = vmatpush2.bf16.msra.mxu1 %v3638_v13  ;;  %2560 = vmatprep.subr.bf16.mxu0 %v3643_v15  ;;  %v3699_v13 = vld [vmem:[%s3983_s12 + $0x800] ss:$8 sps:$4 sm:$0xff]   ;;  %v3707_v15 = vld [vmem:[%s3983_s12 + $0x8f4] ss:$8 sps:$4 sm:$0xff]  }
 0x130   : > { %2601 = vmatprep.subr.bf16.mxu1 %v3646_v16  ;;  %v3710_v16 = vld [vmem:[%s3983_s12 + $0x9f4] ss:$8 sps:$4 sm:$0xff]  }
 0x132   : > { %2561 = vmatpush2.bf16.msra.mxu0 %v3641_v17  ;;  %v3705_v17 = vld [vmem:[%s3983_s12 + $0x8f0] ss:$8 sps:$4 sm:$0xff]  }
 0x133   : > { %2602 = vmatpush2.bf16.msra.mxu1 %v3644_v20  ;;  %2562 = vmatprep.subr.bf16.mxu0 %v3649_v23  ;;  %v3708_v20 = vld [vmem:[%s3983_s12 + $0x9f0] ss:$8 sps:$4 sm:$0xff]   ;;  %v3716_v23 = vld [vmem:[%s3983_s12 + $0x9e4] ss:$8 sps:$4 sm:$0xff]  }
 0x134   : > { %2603 = vmatprep.subr.bf16.mxu1 %v3652_v25  ;;  %v3711_v25 = vld [vmem:[%s3983_s12 + $0x8e0] ss:$8 sps:$4 sm:$0xff]  }
 0x136   : > { %2563 = vmatpush2.bf16.msra.mxu0 %v3647_v26  ;;  %v3714_v26 = vld [vmem:[%s3983_s12 + $0x9e0] ss:$8 sps:$4 sm:$0xff]  }
 0x137   : > { %2604 = vmatpush2.bf16.msra.mxu1 %v3650_v27  ;;  %2614 = vmatprep.subr.bf16.mxu0 %v3659_v28  ;;  %v3719_v27 = vld [vmem:[%s3983_s12 + $0x8d4] ss:$8 sps:$4 sm:$0xff]   ;;  %v3720_v28 = vld [vmem:[%s3983_s12 + $0x9d0] ss:$8 sps:$4 sm:$0xff]  }
 0x138   : > { %2655 = vmatprep.subr.bf16.mxu1 %v3662_v29  ;;  %v3725_v29 = vld [vmem:[%s3983_s12 + $0x8c4] ss:$8 sps:$4 sm:$0xff]  }
 0x139   : > { %v2320_v41 = vpop.f32.mrf.mxu0  ;;  %2565 = vmatmul.mubr.bf16.vlgmr.msra.gmra.mxu0 %v2860_v31  ;;  %v3723_v31 = vld [vmem:[%s3983_s12 + $0x8c0] ss:$8 sps:$4 sm:$0xff]  }
 0x13a   : > { %v2361_v42 = vpop.f32.mrf.mxu1  ;;  %2606 = vmatmul.mubr.bf16.vlgmr.msra.gmra.mxu1 %v2862_v32  ;;  %v2321_v43 = vadd.f32 %v2320_v41, %v609_v35  ;;  %2615 = vmatpush1.bf16.msra.mxu0 %v3657_v36  ;;  %v3726_v32 = vld [vmem:[%s3983_s12 + $0x9c0] ss:$8 sps:$4 sm:$0xff]   ;;  %v3731_v35 = vld [vmem:[%s3983_s12 + $0x8b4] ss:$8 sps:$4 sm:$0xff]  }
 0x13b   : > { %2656 = vmatpush1.bf16.msra.mxu1 %v3660_v37  ;;  %v2322_v46 = vpop.f32.mrf.mxu0  ;;  %2616 = vmatprep.subr.bf16.mxu0 %v3665_v21  ;;  %v3734_v36 = vld [vmem:[%s3983_s12 + $0x9b4] ss:$8 sps:$4 sm:$0xff]   ;;  %v3729_v37 = vld [vmem:[%s3983_s12 + $0x8b0] ss:$8 sps:$4 sm:$0xff]  }
 0x13c   : > { %v2363_v47 = vpop.f32.mrf.mxu1  ;;  %2657 = vmatprep.subr.bf16.mxu1 %v3668_v24  ;;  %v4336_v50 = vadd.f32 %v2361_v42, %v2321_v43  ;;  %v2323_v51 = vadd.f32 %v2322_v46, %v613_v38  ;;  %2646 = vmatprep.mubr.bf16.mxu0 %v2865_v39  ;;  %v3732_v21 = vld [vmem:[%s3983_s12 + $0x9b0] ss:$8 sps:$4 sm:$0xff]   ;;  %v3737_v24 = vld [vmem:[%s3983_s12 + $0x8a4] ss:$8 sps:$4 sm:$0xff]   ;;  %v3735_v39 = vld [vmem:[%s3983_s12 + $0x8a0] ss:$8 sps:$4 sm:$0xff]  }
 0x13d   : > { %2687 = vmatprep.mubr.bf16.mxu1 %v2867_v40  ;;  %v2324_v52 = vpop.f32.mrf.mxu0  ;;  %v3740_v38 = vld [vmem:[%s3983_s12 + $0x9a4] ss:$8 sps:$4 sm:$0xff]   ;;  %v3738_v40 = vld [vmem:[%s3983_s12 + $0x9a0] ss:$8 sps:$4 sm:$0xff]   ;;  %v3743_v41 = vld [vmem:[%s3983_s12 + $0x894] ss:$8 sps:$4 sm:$0xff]  }
 0x13e   : > { %v2365_v53 = vpop.f32.mrf.mxu1  ;;  %v4338_v54 = vadd.f32 %v2363_v47, %v2323_v51  ;;  %2617 = vmatpush1.bf16.msra.mxu0 %v3663_v44  ;;  %v3746_v42 = vld [vmem:[%s3983_s12 + $0x994] ss:$8 sps:$4 sm:$0xff]   ;;  %v3741_v43 = vld [vmem:[%s3983_s12 + $0x890] ss:$8 sps:$4 sm:$0xff]   ;;  %v3752_v46 = vld [vmem:[%s3983_s12 + $0x984] ss:$8 sps:$4 sm:$0xff]   ;;  %v2866_v51 = vcombine.low %v4322_v34, %v4322_v34 }
 0x13f   : > { %2658 = vmatpush1.bf16.msra.mxu1 %v3666_v45  ;;  %v2325_v57 = vpop.f32.mrf.mxu0  ;;  %2618 = vmatprep.subr.bf16.mxu0 %v3671_v48  ;;  %v3744_v44 = vld [vmem:[%s3983_s12 + $0x990] ss:$8 sps:$4 sm:$0xff]   ;;  %v3749_v45 = vld [vmem:[%s3983_s12 + $0x884] ss:$8 sps:$4 sm:$0xff]   ;;  %v3747_v47 = vld [vmem:[%s3983_s12 + $0x880] ss:$8 sps:$4 sm:$0xff]  }
 0x140   : > { %v2366_v58 = vpop.f32.mrf.mxu1  ;;  %2659 = vmatprep.subr.bf16.mxu1 %v3674_v49  ;;  %v3750_v48 = vld [vmem:[%s3983_s12 + $0x980] ss:$8 sps:$4 sm:$0xff]   ;;  %v2864_v49 = vcombine.low %v4317_v33, %v4317_v33  ;;  %s2846_s12 = sshll.u32 %s3859_s15, 1 }
 0x141   : > { %p267_p7 = scmp.lt.s32.totalorder %s2846_s12, 7 }
 0x142   : > { %2619 = vmatpush1.bf16.msra.mxu0 %v3669_v55 }
 0x143   : > { %2660 = vmatpush1.bf16.msra.mxu1 %v3672_v56  ;;  %2620 = vmatprep.subr.bf16.mxu0 %v3677_v59  ;;  %s4437_s12 = smov (!%p267_p7, %s2846_s12), 7 }
 0x144   : > { %2661 = vmatprep.subr.bf16.mxu1 %v3680_v60  ;;  %s2847_s30 = sshll.u32 %s4437_s12, 3 }
 0x145   : > { %s272_s15 = scalar_lea.vmem %s4425_s3, %s2847_s30 }
 0x146   : > { %2621 = vmatpush1.bf16.msra.mxu0 %v3675_v61 }
 0x147   : > { %2662 = vmatpush1.bf16.msra.mxu1 %v3678_v62  ;;  %2622 = vmatprep.subr.bf16.mxu0 %v3683_v63 }
 0x148   : > { %2663 = vmatprep.subr.bf16.mxu1 %v3686_v0 }
 0x14a   : > { %2623 = vmatpush1.bf16.msra.mxu0 %v3681_v1 }
 0x14b   : > { %2664 = vmatpush1.bf16.msra.mxu1 %v3684_v2  ;;  %2624 = vmatprep.subr.bf16.mxu0 %v3689_v3 }
 0x14c   : > { %2665 = vmatprep.subr.bf16.mxu1 %v3692_v4 }
 0x14e   : > { %2625 = vmatpush1.bf16.msra.mxu0 %v3687_v5 }
 0x14f   : > { %2666 = vmatpush1.bf16.msra.mxu1 %v3690_v6  ;;  %2626 = vmatprep.subr.bf16.mxu0 %v3695_v7 }
 0x150   : > { %2667 = vmatprep.subr.bf16.mxu1 %v3698_v8 }
 0x152   : > { %2627 = vmatpush1.bf16.msra.mxu0 %v3693_v9 }
 0x153   : > { %2668 = vmatpush1.bf16.msra.mxu1 %v3696_v10  ;;  %2628 = vmatprep.subr.bf16.mxu0 %v3701_v11 }
 0x154   : > { %2669 = vmatprep.subr.bf16.mxu1 %v3704_v12 }
 0x156   : > { %2629 = vmatpush1.bf16.msra.mxu0 %v3699_v13 }
 0x157   : > { %2670 = vmatpush1.bf16.msra.mxu1 %v3702_v14  ;;  %2630 = vmatprep.subr.bf16.mxu0 %v3707_v15 }
 0x158   : > { %2671 = vmatprep.subr.bf16.mxu1 %v3710_v16 }
 0x15a   : > { %2631 = vmatpush2.bf16.msra.mxu0 %v3705_v17 }
 0x15b   : > { %2672 = vmatpush2.bf16.msra.mxu1 %v3708_v20  ;;  %2632 = vmatprep.subr.bf16.mxu0 %v3713_v22 }
 0x15c   : > { %2673 = vmatprep.subr.bf16.mxu1 %v3716_v23 }
 0x15e   : > { %2633 = vmatpush2.bf16.msra.mxu0 %v3711_v25 }
 0x15f   : > { %2674 = vmatpush2.bf16.msra.mxu1 %v3714_v26  ;;  %2634 = vmatprep.subr.bf16.mxu0 %v3719_v27 }
 0x160   : > { %2675 = vmatprep.subr.bf16.mxu1 %v3722_v18 }
 0x162   : > { %2635 = vmatpush2.bf16.msra.mxu0 %v3717_v19 }
 0x163   : > { %2676 = vmatpush2.bf16.msra.mxu1 %v3720_v28  ;;  %2636 = vmatprep.subr.bf16.mxu0 %v3725_v29 }
 0x164   : > { %2677 = vmatprep.subr.bf16.mxu1 %v3728_v30 }
 0x166   : > { %2637 = vmatpush2.bf16.msra.mxu0 %v3723_v31 }
 0x167   : > { %2678 = vmatpush2.bf16.msra.mxu1 %v3726_v32  ;;  %2638 = vmatprep.subr.bf16.mxu0 %v3731_v35 }
 0x168   : > { %2679 = vmatprep.subr.bf16.mxu1 %v3734_v36 }
 0x16a   : > { %2639 = vmatpush2.bf16.msra.mxu0 %v3729_v37 }
 0x16b   : > { %2680 = vmatpush2.bf16.msra.mxu1 %v3732_v21  ;;  %2640 = vmatprep.subr.bf16.mxu0 %v3737_v24 }
 0x16c   : > { %2681 = vmatprep.subr.bf16.mxu1 %v3740_v38 }
 0x16e   : > { %2641 = vmatpush2.bf16.msra.mxu0 %v3735_v39 }
 0x16f   : > { %2682 = vmatpush2.bf16.msra.mxu1 %v3738_v40  ;;  %2642 = vmatprep.subr.bf16.mxu0 %v3743_v41 }
 0x170   : > { %2683 = vmatprep.subr.bf16.mxu1 %v3746_v42 }
 0x172   : > { %2643 = vmatpush2.bf16.msra.mxu0 %v3741_v43 }
 0x173   : > { %2684 = vmatpush2.bf16.msra.mxu1 %v3744_v44  ;;  %2644 = vmatprep.subr.bf16.mxu0 %v3749_v45 }
 0x174   : > { %2685 = vmatprep.subr.bf16.mxu1 %v3752_v46 }
 0x176   : > { %2645 = vmatpush2.bf16.msra.mxu0 %v3747_v47 }
 0x177   : > { %2686 = vmatpush2.bf16.msra.mxu1 %v3750_v48 }
 0x179   : > { %v2402_v52 = vpop.f32.mrf.mxu0  ;;  %2647 = vmatmul.mubr.bf16.vlgmr.msra.gmra.mxu0 %v2864_v49 }
 0x17a   : > { %v2443_v53 = vpop.f32.mrf.mxu1  ;;  %2688 = vmatmul.mubr.bf16.vlgmr.msra.gmra.mxu1 %v2866_v51  ;;  %v2403_v55 = vadd.f32 %v2402_v52, %v4336_v50 }
 0x17b   : > { %v2404_v56 = vpop.f32.mrf.mxu0 }
 0x17c   : > { %v2445_v57 = vpop.f32.mrf.mxu1  ;;  %v2444_v58 = vadd.f32 %v2443_v53, %v2403_v55  ;;  %v2405_v59 = vadd.f32 %v2404_v56, %v4338_v54 }
 0x17d   : > { %v2406_v60 = vpop.f32.mrf.mxu0 }
 0x17e   : > { %v2447_v61 = vpop.f32.mrf.mxu1  ;;  %v2446_v62 = vadd.f32 %v2445_v57, %v2405_v59 }
 0x17f   : > { %v2407_v33 = vpop.f32.mrf.mxu0 }
 0x180   : > { %v2448_v63 = vpop.f32.mrf.mxu1 }
 0x1b9   : > { %v2484_v0 = vpop.f32.mrf.mxu0 }
 0x1ba   : > { %v2525_v34 = vpop.f32.mrf.mxu1  ;;  %v2485_v1 = vadd.f32 %v2484_v0, %v2444_v58 }
 0x1bb   : > { %v2486_v2 = vpop.f32.mrf.mxu0 }
 0x1bc   : > { %v2527_v3 = vpop.f32.mrf.mxu1  ;;  %v2526_v4 = vadd.f32 %v2525_v34, %v2485_v1  ;;  %v2487_v5 = vadd.f32 %v2486_v2, %v2446_v62 }
 0x1bd   : > { %v2488_v6 = vpop.f32.mrf.mxu0 }
 0x1be   : > { %v2529_v50 = vpop.f32.mrf.mxu1  ;;  %v2528_v7 = vadd.f32 %v2527_v3, %v2487_v5 }
 0x1bf   : > { %v2489_v8 = vpop.f32.mrf.mxu0 }
 0x1c0   : > { %v2530_v9 = vpop.f32.mrf.mxu1 }
 0x1f9   : > { %v2566_v10 = vpop.f32.mrf.mxu0 }
 0x1fa   : > { %v2607_v54 = vpop.f32.mrf.mxu1  ;;  %v2567_v17 = vadd.f32 %v2566_v10, %v2526_v4 }
 0x1fb   : > { %v2568_v11 = vpop.f32.mrf.mxu0 }
 0x1fc   : > { %v2609_v12 = vpop.f32.mrf.mxu1  ;;  %v2569_v20 = vadd.f32 %v2568_v11, %v2528_v7  ;;  %v2608_v22 = vadd.f32 %v2607_v54, %v2567_v17 }
 0x1fd   : > { %v2570_v13 = vpop.f32.mrf.mxu0 }
 0x1fe   : > { %v2611_v14 = vpop.f32.mrf.mxu1  ;;  %v2610_v26 = vadd.f32 %v2609_v12, %v2569_v20 }
 0x1ff   : > { %v2571_v15 = vpop.f32.mrf.mxu0 }
 0x200   : > { %v2612_v16 = vpop.f32.mrf.mxu1 }
 0x239   : > { %v2648_v23 = vpop.f32.mrf.mxu0 }
 0x23a   : > { %v2689_v25 = vpop.f32.mrf.mxu1  ;;  %v2649_v27 = vadd.f32 %v2648_v23, %v2608_v22 }
 0x23b   : > { %v2650_v18 = vpop.f32.mrf.mxu0 }
 0x23c   : > { %v2691_v19 = vpop.f32.mrf.mxu1  ;;  %v2690_v28 = vadd.f32 %v2689_v25, %v2649_v27  ;;  %v2651_v29 = vadd.f32 %v2650_v18, %v2610_v26 }
 0x23d   : > { %v2652_v30 = vpop.f32.mrf.mxu0 }
 0x23e   : > { %v2693_v31 = vpop.f32.mrf.mxu1  ;;  %vm2696_vm0 = vcmp.ge.f32.partialorder %v2690_v28, 0.0  ;;  %v2698_v32 = vmul.f32 0.1, %v2690_v28  ;;  %v2692_v35 = vadd.f32 %v2691_v19, %v2651_v29 }
 0x23f   : > { %v2653_v36 = vpop.f32.mrf.mxu0 }
 0x240   : > { %v2694_v37 = vpop.f32.mrf.mxu1  ;;  %v2700_v21 = vsel %vm2696_vm0, %v2690_v28, %v2698_v32  ;;  %vm2697_vm1 = vcmp.ge.f32.partialorder %v2692_v35, 0.0  ;;  %v2699_v24 = vmul.f32 0.1, %v2692_v35 }
 0x241   : > { %2702 = vst [vmem:[%s272_s15] sm:$0xff] %v2700_v21 }
 0x242   : > { %v2701_v38 = vsel %vm2697_vm1, %v2692_v35, %v2699_v24 }
 0x243   : > { %2703 = vst [vmem:[%s272_s15 + $0x8] sm:$0xff] %v2701_v38 }
 0x244 PF: > { %s19_s17 = sadd.s32 1, %s3867_s17   ;;  %s4429_s12 = smov %s3851_s13 }
 0x245   : > { %p16_p9 = scmp.ge.s32.totalorder %s19_s17, 6   ;;  %s4430_s13 = smov %s3855_s14 }
 0x246   : > { %s4431_s14 = smov %s3939_s23  ;;  %s4432_s15 = smov %s3863_s16 }
 0x247   : > { %s4433_s16 = smov %s4435_s19  ;;  %18 = sbr.rel (!%p16_p9) target bundleno = 6 (0x6), region = 88 }
 0x24c   :  { %2734 = vsyncpa [#allocation3], 1 }
 0x24d   :  { %2736 = vsyncpa [#allocation3 + $0x1], 1 }
 0x24e   :  { %2737 = vsyncpa [#allocation5], 1 }
 0x24f   :  { %2739 = vsyncpa [#allocation5 + $0x1], 1 }

// kernel: one_period_discriminator_forward.7
= control target key start
LH: loop header
LB: loop body
LE: loop exit
PB: predicated region body
PF: predicated region fallthrough
CT: control target
= control target key end

     0   :  { %8 = vsyncpa [#allocation3], 0  ;;  %s8112_s0 = inlined_call_operand.vmem [shape: bf16[8,5120], index: 0, kind: input, shape index: {}]   ;;  %s8113_s1 = inlined_call_operand.hbm [shape: bf16[5120,1024], index: 1, kind: input, shape index: {}]   ;;  %s8114_s2 = inlined_call_operand.hbm [shape: f32[1,1024], index: 2, kind: input, shape index: {}]   ;;  %s8115_s3 = inlined_call_operand.vmem [shape: f32[8,1024], index: 3, kind: output, shape index: {}]  }
   0x1   :  { %10 = vsyncpa [#allocation3 + $0x1], 0 }
   0x2   :  { %11 = vsyncpa [#allocation5], 0 }
   0x3   :  { %13 = vsyncpa [#allocation5 + $0x1], 0  ;;  %s7144_s12 = smov 0   ;;  %s7146_s13 = smov 0  }
   0x4   :  { %s7148_s14 = smov 0   ;;  %s7150_s15 = smov 0  }
   0x5   :  { %s7152_s16 = smov 0   ;;  %s7154_s17 = smov 0  }
   0x6 LB: > { %s5244_s18 = sadd.s32 4294967295, %s7117_s17   ;;  %s28_s19 = sadd.s32 1, %s7113_s16  ;;  %s7117_s17 = sphi %s7154_s17, %s19_s17   ;;  %s7113_s16 = sphi %s7152_s16, %s8123_s16   ;;  %s7109_s15 = sphi %s7150_s15, %s8122_s15   ;;  %s7105_s14 = sphi %s7148_s14, %s8121_s14   ;;  %s7101_s13 = sphi %s7146_s13, %s8120_s13   ;;  %s7097_s12 = sphi %s7144_s12, %s8119_s12  }
   0x7   : > { %p29_p0 = scmp.ge.s32.totalorder %s28_s19, 4  ;;  %s64_s20 = sadd.s32 1, %s7105_s14 }
   0x8   : > { %p71_p1 = scmp.ne.s32.totalorder %s7105_s14, %s7101_s13  ;;  %p72_p2 = scmp.eq.s32.totalorder %s7117_s17, 0 }
   0x9   : > { %s8125_s19 = smov (%p29_p0, %s28_s19), 0  ;;  %p77_p4 = scmp.ne.s32.totalorder %s7101_s13, %s7097_s12 }
   0xa   : > { %p73_p3 = por %p72_p2, %p71_p1  ;;  %s61_s21 = ssub.s32 %s7113_s16, %s8125_s19 }
   0xb   : > { %p78_p5 = scmp.eq.s32.totalorder %s5244_s18, 0  ;;  %p62_p6 = scmp.eq.s32.totalorder %s61_s21, 0 }
   0xc   : > { %p5955_p8 = scmp.lt.s32.totalorder %s7117_s17, 4  ;;  %s7192_s24 = sand.u32 1, %s7105_s14  }
   0xd   : > { %p7183_p7 = por %p78_p5, %p77_p4  ;;  %s5940_s25 = sshll.u32 %s7113_s16, 7 }
   0xe   : > { %s7189_s23 = scalar_select %p62_p6, %s7105_s14, %s64_s20  }
   0xf   : > { %s5942_s26 = smul.u32 5120, %s7192_s24  ;;  %s173_s29 = scalar_lea.hbm %s8113_s1, %s5940_s25 }
  0x10   : > { %p7199_p9 = pnand %p5955_p8, %p73_p3  ;;  %p5254_p10 = scmp.ge.s32.totalorder %s7117_s17, 1 }
  0x11   : > { %s167_s4 = scalar_lea.vmem [#allocation2], %s5942_s26  ;;  %s164_s6 = scalar_lea.sflag [#allocation3], %s7192_s24 }
  0x12   : > { %s174_s5 = sshll.u32 %s167_s4, 4  ;;  %p7009_p11 = pneg %p7199_p9  ;;  %s175_s5 = int_to_ptr.vmem [resolvable:$true] %s174_s5 }
  0x13   : > { %s7020_s7 = scalar_lea.vmem %s175_s5, 81920  ;;  %s7119_s8 = smov [#allocation2]  }
  0x14   : > { %p7021_p12 = scmp.ne.s32.totalorder %s175_s5, %s7020_s7  ;;  %s7025_s9 = sshll.u32 %s7119_s8, 4  ;;  %s7026_s9 = int_to_ptr.vmem [resolvable:$false] %s7025_s9 }
  0x15   : > { %s7027_s10 = scalar_lea.vmem %s7026_s9, 163840  ;;  %p7028_p1 = scmp.lt.s32.totalorder %s175_s5, %s7026_s9 }
  0x16   : > { %p7023_p13 = pnand %p7021_p12, %p7009_p11  ;;  %p7029_p2 = scmp.lt.s32.totalorder %s7027_s10, %s7020_s7 }
  0x18   : > { %p7024_p0 = pneg %p7023_p13  ;;  %p7030_p3 = por %p7029_p2, %p7028_p1 }
  0x1a   : > { %p7031_p4 = pnand %p7030_p3, %p7024_p0 }
  0x1c   : > { %7034 = shalt.err (!%p7031_p4)
}
  0x1d   : > { %s7120_s11 = smov 512   ;;  %s7121_s12 = smov 128  }
  0x1e   : > { %s7122_s18 = smov 8   ;;  %p201_p5 = scmp.lt.s32.totalorder %s7117_s17, 5 }
  0x1f   : > { %5951 = dma.hbm_to_vmem [thread:$0]  (!%p7199_p9), %s173_s29, 81920, %s175_s5, %s164_s6, %s7120_s11, %s7121_s12, %s7122_s18  }
  0x20   : > { %s5251_s20 = sshll.u32 %s7192_s24, 1  ;;  %s5941_s21 = sshll.u32 %s7113_s16, 5 }
  0x21   : > { %p7217_p6 = pnand %p5254_p10, %p201_p5  ;;  %s194_s28 = scalar_lea.hbm %s8114_s2, %s5941_s21 }
  0x22   : > { %s188_s4 = scalar_lea.vmem [#allocation4], %s5251_s20  ;;  %s185_s8 = scalar_lea.sflag [#allocation5], %s7192_s24 }
  0x23   : > { %s196_s7 = sshll.u32 %s188_s4, 4  ;;  %s7123_s29 = smov [#allocation4]   ;;  %s197_s7 = int_to_ptr.vmem [resolvable:$true] %s196_s7 }
  0x24   : > { %s7048_s9 = scalar_lea.vmem %s197_s7, 32  ;;  %s7053_s5 = sshll.u32 %s7123_s29, 4  ;;  %s7054_s5 = int_to_ptr.vmem [resolvable:$false] %s7053_s5 }
  0x25   : > { %p7049_p8 = scmp.ne.s32.totalorder %s197_s7, %s7048_s9  ;;  %s7055_s6 = scalar_lea.vmem %s7054_s5, 64 }
  0x26   : > { %p7056_p10 = scmp.lt.s32.totalorder %s197_s7, %s7054_s5  ;;  %p7057_p0 = scmp.lt.s32.totalorder %s7055_s6, %s7048_s9 }
  0x27   : > { %p7051_p12 = pnand %p7049_p8, %p7009_p11 }
  0x28   : > { %p7058_p1 = por %p7057_p0, %p7056_p10 }
  0x29   : > { %p7052_p13 = pneg %p7051_p12 }
  0x2b   : > { %p7059_p2 = pnand %p7058_p1, %p7052_p13 }
  0x2d   : > { %7062 = shalt.err (!%p7059_p2)
}
  0x2e   : > { %5954 = dma.hbm_to_vmem [thread:$0]  (!%p7199_p9), %s194_s28, 32, %s197_s7, %s185_s8  }
  0x2f   : > { %205 = sbr.rel (%p7217_p6) target bundleno = 900 (0x384), region = 32  ;;  %s207_s24 = sand.u32 (!%p7217_p6), 1, %s7101_s13  }
  0x30   : > { %s5943_s10 = smul.u32 (!%p7217_p6), 5120, %s207_s24  ;;  %s208_s11 = scalar_lea.sflag (!%p7217_p6), [#allocation3], %s207_s24 }
  0x32   : > { %s7233_s12 = scalar_lea.vmem (!%p7217_p6), [#allocation2], %s5943_s10 }
  0x34   : > { %7088 = dma.done.wait (%p7183_p7), %s208_s11, 81920  }
  0x35   : > { %7090 = vsyncadd (%p7183_p7), %s208_s11, 4294885376  ;;  %s5255_s18 = sshll.u32 %s207_s24, 1  ;;  %s217_s20 = scalar_lea.sflag [#allocation5], %s207_s24 }
  0x36   : > { %s7239_s30 = scalar_lea.vmem [#allocation4], %s5255_s18 }
  0x37   : > { %7092 = dma.done.wait (%p7183_p7), %s217_s20, 32  }
  0x38   : > { %7094 = vsyncadd (%p7183_p7), %s217_s20, 4294967264  ;;  %v6007_v0 = vld [vmem:[%s7233_s12 + $0x74] ss:$8 sps:$4 sm:$0xff]   ;;  %v6011_v2 = vld [vmem:[%s7233_s12 + $0x70] ss:$8 sps:$4 sm:$0xff]  }
  0x39   : > { %v6009_v1 = vld [vmem:[%s7233_s12 + $0x174] ss:$8 sps:$4 sm:$0xff]   ;;  %4286 = vmatprep.subr.bf16.mxu0 %v6007_v0  ;;  %v6012_v3 = vld [vmem:[%s7233_s12 + $0x170] ss:$8 sps:$4 sm:$0xff]   ;;  %v6013_v4 = vld [vmem:[%s7233_s12 + $0x64] ss:$8 sps:$4 sm:$0xff]  }
  0x3a   : > { %4327 = vmatprep.subr.bf16.mxu1 %v6009_v1  ;;  %4287 = vmatpush1.bf16.msra.mxu0 %v6011_v2  ;;  %v6015_v5 = vld [vmem:[%s7233_s12 + $0x164] ss:$8 sps:$4 sm:$0xff]   ;;  %v6017_v6 = vld [vmem:[%s7233_s12 + $0x60] ss:$8 sps:$4 sm:$0xff]   ;;  %v6019_v8 = vld [vmem:[%s7233_s12 + $0x54] ss:$8 sps:$4 sm:$0xff]  }
  0x3b   : > { %4328 = vmatpush1.bf16.msra.mxu1 %v6012_v3  ;;  %4288 = vmatprep.subr.bf16.mxu0 %v6013_v4  ;;  %v6018_v7 = vld [vmem:[%s7233_s12 + $0x160] ss:$8 sps:$4 sm:$0xff]   ;;  %v6021_v9 = vld [vmem:[%s7233_s12 + $0x154] ss:$8 sps:$4 sm:$0xff]   ;;  %v6023_v10 = vld [vmem:[%s7233_s12 + $0x50] ss:$8 sps:$4 sm:$0xff]  }
  0x3c   : > { %4329 = vmatprep.subr.bf16.mxu1 %v6015_v5  ;;  %v6024_v11 = vld [vmem:[%s7233_s12 + $0x150] ss:$8 sps:$4 sm:$0xff]   ;;  %v6025_v12 = vld [vmem:[%s7233_s12 + $0x44] ss:$8 sps:$4 sm:$0xff]   ;;  %v6029_v14 = vld [vmem:[%s7233_s12 + $0x40] ss:$8 sps:$4 sm:$0xff]  }
  0x3d   : > { %v6027_v13 = vld [vmem:[%s7233_s12 + $0x144] ss:$8 sps:$4 sm:$0xff]   ;;  %v6030_v15 = vld [vmem:[%s7233_s12 + $0x140] ss:$8 sps:$4 sm:$0xff]   ;;  %v6031_v16 = vld [vmem:[%s7233_s12 + $0x34] ss:$8 sps:$4 sm:$0xff]  }
  0x3e   : > { %4289 = vmatpush1.bf16.msra.mxu0 %v6017_v6  ;;  %v6033_v17 = vld [vmem:[%s7233_s12 + $0x134] ss:$8 sps:$4 sm:$0xff]   ;;  %v6035_v18 = vld [vmem:[%s7233_s12 + $0x30] ss:$8 sps:$4 sm:$0xff]   ;;  %v6037_v20 = vld [vmem:[%s7233_s12 + $0x24] ss:$8 sps:$4 sm:$0xff]  }
  0x3f   : > { %4330 = vmatpush1.bf16.msra.mxu1 %v6018_v7  ;;  %4290 = vmatprep.subr.bf16.mxu0 %v6019_v8  ;;  %v6036_v19 = vld [vmem:[%s7233_s12 + $0x130] ss:$8 sps:$4 sm:$0xff]   ;;  %v6039_v21 = vld [vmem:[%s7233_s12 + $0x124] ss:$8 sps:$4 sm:$0xff]   ;;  %v6041_v22 = vld [vmem:[%s7233_s12 + $0x20] ss:$8 sps:$4 sm:$0xff]  }
  0x40   : > { %4331 = vmatprep.subr.bf16.mxu1 %v6021_v9  ;;  %v6042_v23 = vld [vmem:[%s7233_s12 + $0x120] ss:$8 sps:$4 sm:$0xff]   ;;  %v6043_v24 = vld [vmem:[%s7233_s12 + $0x14] ss:$8 sps:$4 sm:$0xff]   ;;  %v6047_v26 = vld [vmem:[%s7233_s12 + $0x10] ss:$8 sps:$4 sm:$0xff]  }
  0x41   : > { %v6045_v25 = vld [vmem:[%s7233_s12 + $0x114] ss:$8 sps:$4 sm:$0xff]   ;;  %v6048_v27 = vld [vmem:[%s7233_s12 + $0x110] ss:$8 sps:$4 sm:$0xff]   ;;  %v6049_v28 = vld [vmem:[%s7233_s12 + $0x4] ss:$8 sps:$4 sm:$0xff]  }
  0x42   : > { %4291 = vmatpush1.bf16.msra.mxu0 %v6023_v10  ;;  %v6051_v29 = vld [vmem:[%s7233_s12 + $0x104] ss:$8 sps:$4 sm:$0xff]   ;;  %v6053_v30 = vld [vmem:[%s7233_s12] ss:$8 sps:$4 sm:$0xff]   ;;  %v6055_v32 = vld [vmem:[%s7233_s12 + $0xf4] ss:$8 sps:$4 sm:$0xff]  }
  0x43   : > { %4332 = vmatpush1.bf16.msra.mxu1 %v6024_v11  ;;  %4292 = vmatprep.subr.bf16.mxu0 %v6025_v12  ;;  %v6054_v31 = vld [vmem:[%s7233_s12 + $0x100] ss:$8 sps:$4 sm:$0xff]   ;;  %v6057_v33 = vld [vmem:[%s7233_s12 + $0x1f4] ss:$8 sps:$4 sm:$0xff]   ;;  %v6059_v34 = vld [vmem:[%s7233_s12 + $0xf0] ss:$8 sps:$4 sm:$0xff]  }
  0x44   : > { %4333 = vmatprep.subr.bf16.mxu1 %v6027_v13  ;;  %v6060_v35 = vld [vmem:[%s7233_s12 + $0x1f0] ss:$8 sps:$4 sm:$0xff]   ;;  %v6061_v36 = vld [vmem:[%s7233_s12 + $0xe4] ss:$8 sps:$4 sm:$0xff]   ;;  %v6065_v38 = vld [vmem:[%s7233_s12 + $0xe0] ss:$8 sps:$4 sm:$0xff]  }
  0x45   : > { %v6063_v37 = vld [vmem:[%s7233_s12 + $0x1e4] ss:$8 sps:$4 sm:$0xff]   ;;  %v6066_v39 = vld [vmem:[%s7233_s12 + $0x1e0] ss:$8 sps:$4 sm:$0xff]   ;;  %v6067_v40 = vld [vmem:[%s7233_s12 + $0xd4] ss:$8 sps:$4 sm:$0xff]  }
  0x46   : > { %4293 = vmatpush1.bf16.msra.mxu0 %v6029_v14  ;;  %v6069_v41 = vld [vmem:[%s7233_s12 + $0x1d4] ss:$8 sps:$4 sm:$0xff]   ;;  %v6071_v42 = vld [vmem:[%s7233_s12 + $0xd0] ss:$8 sps:$4 sm:$0xff]   ;;  %v6073_v44 = vld [vmem:[%s7233_s12 + $0xc4] ss:$8 sps:$4 sm:$0xff]  }
  0x47   : > { %4334 = vmatpush1.bf16.msra.mxu1 %v6030_v15  ;;  %4294 = vmatprep.subr.bf16.mxu0 %v6031_v16  ;;  %v6072_v43 = vld [vmem:[%s7233_s12 + $0x1d0] ss:$8 sps:$4 sm:$0xff]   ;;  %v6075_v45 = vld [vmem:[%s7233_s12 + $0x1c4] ss:$8 sps:$4 sm:$0xff]   ;;  %v6077_v49 = vld [vmem:[%s7233_s12 + $0xc0] ss:$8 sps:$4 sm:$0xff]  }
  0x48   : > { %4335 = vmatprep.subr.bf16.mxu1 %v6033_v17  ;;  %v274_v46 = vld [vmem:[%s8112_s0] sm:$0xff]  ;;  %v275_v48 = vld [vmem:[%s8112_s0 + $0x8] sm:$0xff]  ;;  %v6079_v52 = vld [vmem:[%s7233_s12 + $0xb4] ss:$8 sps:$4 sm:$0xff]  }
  0x49   : > { %v5259_v47 = vcombine.high %v274_v46, %v274_v46  ;;  %v6078_v50 = vld [vmem:[%s7233_s12 + $0x1c0] ss:$8 sps:$4 sm:$0xff]   ;;  %v5261_v51 = vcombine.high %v275_v48, %v275_v48  ;;  %v6081_v53 = vld [vmem:[%s7233_s12 + $0x1b4] ss:$8 sps:$4 sm:$0xff]   ;;  %v6083_v54 = vld [vmem:[%s7233_s12 + $0xb0] ss:$8 sps:$4 sm:$0xff]   ;;  %v5258_v6 = vcombine.low %v274_v46, %v274_v46  ;;  %v5260_v7 = vcombine.low %v275_v48, %v275_v48 }
  0x4a   : > { %4295 = vmatpush1.bf16.msra.mxu0 %v6035_v18  ;;  %v6084_v55 = vld [vmem:[%s7233_s12 + $0x1b0] ss:$8 sps:$4 sm:$0xff]   ;;  %v6085_v56 = vld [vmem:[%s7233_s12 + $0xa4] ss:$8 sps:$4 sm:$0xff]   ;;  %v6089_v58 = vld [vmem:[%s7233_s12 + $0xa0] ss:$8 sps:$4 sm:$0xff]  }
  0x4b   : > { %4336 = vmatpush1.bf16.msra.mxu1 %v6036_v19  ;;  %4296 = vmatprep.subr.bf16.mxu0 %v6037_v20  ;;  %v6087_v57 = vld [vmem:[%s7233_s12 + $0x1a4] ss:$8 sps:$4 sm:$0xff]   ;;  %v6090_v59 = vld [vmem:[%s7233_s12 + $0x1a0] ss:$8 sps:$4 sm:$0xff]   ;;  %v6091_v60 = vld [vmem:[%s7233_s12 + $0x94] ss:$8 sps:$4 sm:$0xff]  }
  0x4c   : > { %4337 = vmatprep.subr.bf16.mxu1 %v6039_v21  ;;  %4318 = vmatprep.mubr.bf16.mxu0 %v5259_v47  ;;  %v6093_v61 = vld [vmem:[%s7233_s12 + $0x194] ss:$8 sps:$4 sm:$0xff]   ;;  %v6095_v62 = vld [vmem:[%s7233_s12 + $0x90] ss:$8 sps:$4 sm:$0xff]   ;;  %v6097_v0 = vld [vmem:[%s7233_s12 + $0x84] ss:$8 sps:$4 sm:$0xff]  }
  0x4d   : > { %4359 = vmatprep.mubr.bf16.mxu1 %v5261_v51  ;;  %v6096_v63 = vld [vmem:[%s7233_s12 + $0x190] ss:$8 sps:$4 sm:$0xff]   ;;  %v6099_v1 = vld [vmem:[%s7233_s12 + $0x184] ss:$8 sps:$4 sm:$0xff]   ;;  %v6101_v2 = vld [vmem:[%s7233_s12 + $0x80] ss:$8 sps:$4 sm:$0xff]  }
  0x4e   : > { %4297 = vmatpush1.bf16.msra.mxu0 %v6041_v22  ;;  %v6102_v3 = vld [vmem:[%s7233_s12 + $0x180] ss:$8 sps:$4 sm:$0xff]   ;;  %v6109_v4 = vld [vmem:[%s7233_s12 + $0x274] ss:$8 sps:$4 sm:$0xff]   ;;  %v6107_v8 = vld [vmem:[%s7233_s12 + $0x270] ss:$8 sps:$4 sm:$0xff]  }
  0x4f   : > { %4338 = vmatpush1.bf16.msra.mxu1 %v6042_v23  ;;  %4298 = vmatprep.subr.bf16.mxu0 %v6043_v24  ;;  %v6112_v5 = vld [vmem:[%s7233_s12 + $0x374] ss:$8 sps:$4 sm:$0xff]   ;;  %v6110_v9 = vld [vmem:[%s7233_s12 + $0x370] ss:$8 sps:$4 sm:$0xff]   ;;  %v6115_v10 = vld [vmem:[%s7233_s12 + $0x264] ss:$8 sps:$4 sm:$0xff]  }
  0x50   : > { %4339 = vmatprep.subr.bf16.mxu1 %v6045_v25  ;;  %v6118_v11 = vld [vmem:[%s7233_s12 + $0x364] ss:$8 sps:$4 sm:$0xff]   ;;  %v6113_v12 = vld [vmem:[%s7233_s12 + $0x260] ss:$8 sps:$4 sm:$0xff]   ;;  %v6121_v14 = vld [vmem:[%s7233_s12 + $0x254] ss:$8 sps:$4 sm:$0xff]  }
  0x51   : > { %v6116_v13 = vld [vmem:[%s7233_s12 + $0x360] ss:$8 sps:$4 sm:$0xff]   ;;  %v6124_v15 = vld [vmem:[%s7233_s12 + $0x354] ss:$8 sps:$4 sm:$0xff]   ;;  %v6119_v16 = vld [vmem:[%s7233_s12 + $0x250] ss:$8 sps:$4 sm:$0xff]  }
  0x52   : > { %4299 = vmatpush1.bf16.msra.mxu0 %v6047_v26  ;;  %v6122_v17 = vld [vmem:[%s7233_s12 + $0x350] ss:$8 sps:$4 sm:$0xff]   ;;  %v6127_v18 = vld [vmem:[%s7233_s12 + $0x244] ss:$8 sps:$4 sm:$0xff]   ;;  %v6125_v20 = vld [vmem:[%s7233_s12 + $0x240] ss:$8 sps:$4 sm:$0xff]  }
  0x53   : > { %4340 = vmatpush1.bf16.msra.mxu1 %v6048_v27  ;;  %4300 = vmatprep.subr.bf16.mxu0 %v6049_v28  ;;  %v6130_v19 = vld [vmem:[%s7233_s12 + $0x344] ss:$8 sps:$4 sm:$0xff]   ;;  %v6128_v21 = vld [vmem:[%s7233_s12 + $0x340] ss:$8 sps:$4 sm:$0xff]   ;;  %v6133_v22 = vld [vmem:[%s7233_s12 + $0x234] ss:$8 sps:$4 sm:$0xff]  }
  0x54   : > { %4341 = vmatprep.subr.bf16.mxu1 %v6051_v29  ;;  %v6136_v23 = vld [vmem:[%s7233_s12 + $0x334] ss:$8 sps:$4 sm:$0xff]   ;;  %v6131_v24 = vld [vmem:[%s7233_s12 + $0x230] ss:$8 sps:$4 sm:$0xff]   ;;  %v6139_v26 = vld [vmem:[%s7233_s12 + $0x224] ss:$8 sps:$4 sm:$0xff]  }
  0x55   : > { %v6134_v25 = vld [vmem:[%s7233_s12 + $0x330] ss:$8 sps:$4 sm:$0xff]   ;;  %v6142_v27 = vld [vmem:[%s7233_s12 + $0x324] ss:$8 sps:$4 sm:$0xff]   ;;  %v6137_v28 = vld [vmem:[%s7233_s12 + $0x220] ss:$8 sps:$4 sm:$0xff]  }
  0x56   : > { %4301 = vmatpush1.bf16.msra.mxu0 %v6053_v30  ;;  %v6140_v29 = vld [vmem:[%s7233_s12 + $0x320] ss:$8 sps:$4 sm:$0xff]   ;;  %v6145_v30 = vld [vmem:[%s7233_s12 + $0x214] ss:$8 sps:$4 sm:$0xff]   ;;  %v6163_v46 = vld [vmem:[%s7233_s12 + $0x2e4] ss:$8 sps:$4 sm:$0xff]  }
  0x57   : > { %4342 = vmatpush1.bf16.msra.mxu1 %v6054_v31  ;;  %4302 = vmatprep.subr.bf16.mxu0 %v6055_v32  ;;  %v6148_v31 = vld [vmem:[%s7233_s12 + $0x314] ss:$8 sps:$4 sm:$0xff]   ;;  %v6166_v47 = vld [vmem:[%s7233_s12 + $0x3e4] ss:$8 sps:$4 sm:$0xff]   ;;  %v6161_v48 = vld [vmem:[%s7233_s12 + $0x2e0] ss:$8 sps:$4 sm:$0xff]  }
  0x58   : > { %4343 = vmatprep.subr.bf16.mxu1 %v6057_v33  ;;  %v7344_v32 = vld [vmem:[%s8112_s0 + $0x10] sm:$0xff]  ;;  %v7349_v33 = vld [vmem:[%s8112_s0 + $0x18] sm:$0xff] }
  0x59   : > { %v6172_v51 = vld [vmem:[%s7233_s12 + $0x3d4] ss:$8 sps:$4 sm:$0xff]  }
  0x5a   : > { %4303 = vmatpush2.bf16.msra.mxu0 %v6059_v34  ;;  %v6143_v34 = vld [vmem:[%s7233_s12 + $0x210] ss:$8 sps:$4 sm:$0xff]  }
  0x5b   : > { %4344 = vmatpush2.bf16.msra.mxu1 %v6060_v35  ;;  %4304 = vmatprep.subr.bf16.mxu0 %v6061_v36  ;;  %v6146_v35 = vld [vmem:[%s7233_s12 + $0x310] ss:$8 sps:$4 sm:$0xff]   ;;  %v5263_v36 = vcombine.high %v7344_v32, %v7344_v32 }
  0x5c   : > { %4345 = vmatprep.subr.bf16.mxu1 %v6063_v37  ;;  %v5265_v37 = vcombine.high %v7349_v33, %v7349_v33 }
  0x5e   : > { %4305 = vmatpush2.bf16.msra.mxu0 %v6065_v38  ;;  %v6151_v38 = vld [vmem:[%s7233_s12 + $0x204] ss:$8 sps:$4 sm:$0xff]  }
  0x5f   : > { %4346 = vmatpush2.bf16.msra.mxu1 %v6066_v39  ;;  %4306 = vmatprep.subr.bf16.mxu0 %v6067_v40  ;;  %v6154_v39 = vld [vmem:[%s7233_s12 + $0x304] ss:$8 sps:$4 sm:$0xff]   ;;  %v6149_v40 = vld [vmem:[%s7233_s12 + $0x200] ss:$8 sps:$4 sm:$0xff]  }
  0x60   : > { %4347 = vmatprep.subr.bf16.mxu1 %v6069_v41  ;;  %v6152_v41 = vld [vmem:[%s7233_s12 + $0x300] ss:$8 sps:$4 sm:$0xff]  }
  0x62   : > { %4307 = vmatpush2.bf16.msra.mxu0 %v6071_v42  ;;  %v6157_v42 = vld [vmem:[%s7233_s12 + $0x2f4] ss:$8 sps:$4 sm:$0xff]  }
  0x63   : > { %4348 = vmatpush2.bf16.msra.mxu1 %v6072_v43  ;;  %4308 = vmatprep.subr.bf16.mxu0 %v6073_v44  ;;  %v6160_v43 = vld [vmem:[%s7233_s12 + $0x3f4] ss:$8 sps:$4 sm:$0xff]   ;;  %v6155_v44 = vld [vmem:[%s7233_s12 + $0x2f0] ss:$8 sps:$4 sm:$0xff]  }
  0x64   : > { %4349 = vmatprep.subr.bf16.mxu1 %v6075_v45  ;;  %v6158_v45 = vld [vmem:[%s7233_s12 + $0x3f0] ss:$8 sps:$4 sm:$0xff]  }
  0x66   : > { %4309 = vmatpush2.bf16.msra.mxu0 %v6077_v49  ;;  %v6164_v49 = vld [vmem:[%s7233_s12 + $0x3e0] ss:$8 sps:$4 sm:$0xff]  }
  0x67   : > { %4350 = vmatpush2.bf16.msra.mxu1 %v6078_v50  ;;  %4310 = vmatprep.subr.bf16.mxu0 %v6079_v52  ;;  %v6169_v50 = vld [vmem:[%s7233_s12 + $0x2d4] ss:$8 sps:$4 sm:$0xff]   ;;  %v6167_v52 = vld [vmem:[%s7233_s12 + $0x2d0] ss:$8 sps:$4 sm:$0xff]  }
  0x68   : > { %4351 = vmatprep.subr.bf16.mxu1 %v6081_v53  ;;  %v6170_v53 = vld [vmem:[%s7233_s12 + $0x3d0] ss:$8 sps:$4 sm:$0xff]  }
  0x6a   : > { %4311 = vmatpush2.bf16.msra.mxu0 %v6083_v54  ;;  %v6175_v54 = vld [vmem:[%s7233_s12 + $0x2c4] ss:$8 sps:$4 sm:$0xff]  }
  0x6b   : > { %4352 = vmatpush2.bf16.msra.mxu1 %v6084_v55  ;;  %4312 = vmatprep.subr.bf16.mxu0 %v6085_v56  ;;  %v6178_v55 = vld [vmem:[%s7233_s12 + $0x3c4] ss:$8 sps:$4 sm:$0xff]   ;;  %v6173_v56 = vld [vmem:[%s7233_s12 + $0x2c0] ss:$8 sps:$4 sm:$0xff]  }
  0x6c   : > { %4353 = vmatprep.subr.bf16.mxu1 %v6087_v57  ;;  %v6176_v57 = vld [vmem:[%s7233_s12 + $0x3c0] ss:$8 sps:$4 sm:$0xff]  }
  0x6e   : > { %4313 = vmatpush2.bf16.msra.mxu0 %v6089_v58  ;;  %v6181_v58 = vld [vmem:[%s7233_s12 + $0x2b4] ss:$8 sps:$4 sm:$0xff]  }
  0x6f   : > { %4354 = vmatpush2.bf16.msra.mxu1 %v6090_v59  ;;  %4314 = vmatprep.subr.bf16.mxu0 %v6091_v60  ;;  %v6184_v59 = vld [vmem:[%s7233_s12 + $0x3b4] ss:$8 sps:$4 sm:$0xff]   ;;  %v6179_v60 = vld [vmem:[%s7233_s12 + $0x2b0] ss:$8 sps:$4 sm:$0xff]  }
  0x70   : > { %4355 = vmatprep.subr.bf16.mxu1 %v6093_v61  ;;  %v6182_v61 = vld [vmem:[%s7233_s12 + $0x3b0] ss:$8 sps:$4 sm:$0xff]  }
  0x72   : > { %4315 = vmatpush2.bf16.msra.mxu0 %v6095_v62  ;;  %v6187_v62 = vld [vmem:[%s7233_s12 + $0x2a4] ss:$8 sps:$4 sm:$0xff]  }
  0x73   : > { %4356 = vmatpush2.bf16.msra.mxu1 %v6096_v63  ;;  %4316 = vmatprep.subr.bf16.mxu0 %v6097_v0  ;;  %v6190_v63 = vld [vmem:[%s7233_s12 + $0x3a4] ss:$8 sps:$4 sm:$0xff]   ;;  %v6185_v0 = vld [vmem:[%s7233_s12 + $0x2a0] ss:$8 sps:$4 sm:$0xff]  }
  0x74   : > { %4357 = vmatprep.subr.bf16.mxu1 %v6099_v1  ;;  %v6188_v1 = vld [vmem:[%s7233_s12 + $0x3a0] ss:$8 sps:$4 sm:$0xff]  }
  0x76   : > { %4317 = vmatpush2.bf16.msra.mxu0 %v6101_v2  ;;  %v6193_v2 = vld [vmem:[%s7233_s12 + $0x294] ss:$8 sps:$4 sm:$0xff]  }
  0x77   : > { %4358 = vmatpush2.bf16.msra.mxu1 %v6102_v3  ;;  %4368 = vmatprep.subr.bf16.mxu0 %v6109_v4  ;;  %v6196_v3 = vld [vmem:[%s7233_s12 + $0x394] ss:$8 sps:$4 sm:$0xff]   ;;  %v6191_v4 = vld [vmem:[%s7233_s12 + $0x290] ss:$8 sps:$4 sm:$0xff]  }
  0x78   : > { %4409 = vmatprep.subr.bf16.mxu1 %v6112_v5  ;;  %v6194_v5 = vld [vmem:[%s7233_s12 + $0x390] ss:$8 sps:$4 sm:$0xff]  }
  0x79   : > { %4319 = vmatmul.mubr.bf16.vlgmr.msra.gmra.mxu0 %v5258_v6  ;;  %v6199_v6 = vld [vmem:[%s7233_s12 + $0x284] ss:$8 sps:$4 sm:$0xff]  }
  0x7a   : > { %4360 = vmatmul.mubr.bf16.vlgmr.msra.gmra.mxu1 %v5260_v7  ;;  %4369 = vmatpush1.bf16.msra.mxu0 %v6107_v8  ;;  %v6202_v7 = vld [vmem:[%s7233_s12 + $0x384] ss:$8 sps:$4 sm:$0xff]   ;;  %v6197_v8 = vld [vmem:[%s7233_s12 + $0x280] ss:$8 sps:$4 sm:$0xff]  }
  0x7b   : > { %4410 = vmatpush1.bf16.msra.mxu1 %v6110_v9  ;;  %4370 = vmatprep.subr.bf16.mxu0 %v6115_v10  ;;  %v6200_v9 = vld [vmem:[%s7233_s12 + $0x380] ss:$8 sps:$4 sm:$0xff]   ;;  %v6209_v10 = vld [vmem:[%s7233_s12 + $0x474] ss:$8 sps:$4 sm:$0xff]  }
  0x7c   : > { %4411 = vmatprep.subr.bf16.mxu1 %v6118_v11  ;;  %4400 = vmatprep.mubr.bf16.mxu0 %v5263_v36  ;;  %v6212_v11 = vld [vmem:[%s7233_s12 + $0x574] ss:$8 sps:$4 sm:$0xff]   ;;  %v6239_v36 = vld [vmem:[%s7233_s12 + $0x424] ss:$8 sps:$4 sm:$0xff]  }
  0x7d   : > { %4441 = vmatprep.mubr.bf16.mxu1 %v5265_v37  ;;  %v6242_v37 = vld [vmem:[%s7233_s12 + $0x524] ss:$8 sps:$4 sm:$0xff]  }
  0x7e   : > { %4371 = vmatpush1.bf16.msra.mxu0 %v6113_v12  ;;  %v5262_v12 = vcombine.low %v7344_v32, %v7344_v32  ;;  %v6233_v32 = vld [vmem:[%s7233_s12 + $0x434] ss:$8 sps:$4 sm:$0xff]  }
  0x7f   : > { %4412 = vmatpush1.bf16.msra.mxu1 %v6116_v13  ;;  %4372 = vmatprep.subr.bf16.mxu0 %v6121_v14  ;;  %v5264_v13 = vcombine.low %v7349_v33, %v7349_v33  ;;  %v6207_v14 = vld [vmem:[%s7233_s12 + $0x470] ss:$8 sps:$4 sm:$0xff]   ;;  %v6236_v33 = vld [vmem:[%s7233_s12 + $0x534] ss:$8 sps:$4 sm:$0xff]  }
  0x80   : > { %4413 = vmatprep.subr.bf16.mxu1 %v6124_v15  ;;  %v6210_v15 = vld [vmem:[%s7233_s12 + $0x570] ss:$8 sps:$4 sm:$0xff]  }
  0x82   : > { %4373 = vmatpush1.bf16.msra.mxu0 %v6119_v16  ;;  %v6215_v16 = vld [vmem:[%s7233_s12 + $0x464] ss:$8 sps:$4 sm:$0xff]  }
  0x83   : > { %4414 = vmatpush1.bf16.msra.mxu1 %v6122_v17  ;;  %4374 = vmatprep.subr.bf16.mxu0 %v6127_v18  ;;  %v6218_v17 = vld [vmem:[%s7233_s12 + $0x564] ss:$8 sps:$4 sm:$0xff]  }
  0x84   : > { %4415 = vmatprep.subr.bf16.mxu1 %v6130_v19  ;;  %v7406_v18 = vld [vmem:[%s8112_s0 + $0x20] sm:$0xff]  ;;  %v7411_v19 = vld [vmem:[%s8112_s0 + $0x28] sm:$0xff] }
  0x86   : > { %4375 = vmatpush1.bf16.msra.mxu0 %v6125_v20  ;;  %v5267_v20 = vcombine.high %v7406_v18, %v7406_v18 }
  0x87   : > { %4416 = vmatpush1.bf16.msra.mxu1 %v6128_v21  ;;  %4376 = vmatprep.subr.bf16.mxu0 %v6133_v22  ;;  %v5269_v21 = vcombine.high %v7411_v19, %v7411_v19  ;;  %v6213_v22 = vld [vmem:[%s7233_s12 + $0x460] ss:$8 sps:$4 sm:$0xff]  }
  0x88   : > { %4417 = vmatprep.subr.bf16.mxu1 %v6136_v23  ;;  %v6216_v23 = vld [vmem:[%s7233_s12 + $0x560] ss:$8 sps:$4 sm:$0xff]  }
  0x8a   : > { %4377 = vmatpush1.bf16.msra.mxu0 %v6131_v24  ;;  %v6221_v24 = vld [vmem:[%s7233_s12 + $0x454] ss:$8 sps:$4 sm:$0xff]  }
  0x8b   : > { %4418 = vmatpush1.bf16.msra.mxu1 %v6134_v25  ;;  %4378 = vmatprep.subr.bf16.mxu0 %v6139_v26  ;;  %v6224_v25 = vld [vmem:[%s7233_s12 + $0x554] ss:$8 sps:$4 sm:$0xff]   ;;  %v6219_v26 = vld [vmem:[%s7233_s12 + $0x450] ss:$8 sps:$4 sm:$0xff]  }
  0x8c   : > { %4419 = vmatprep.subr.bf16.mxu1 %v6142_v27  ;;  %v6222_v27 = vld [vmem:[%s7233_s12 + $0x550] ss:$8 sps:$4 sm:$0xff]  }
  0x8e   : > { %4379 = vmatpush1.bf16.msra.mxu0 %v6137_v28  ;;  %v6227_v28 = vld [vmem:[%s7233_s12 + $0x444] ss:$8 sps:$4 sm:$0xff]  }
  0x8f   : > { %4420 = vmatpush1.bf16.msra.mxu1 %v6140_v29  ;;  %4380 = vmatprep.subr.bf16.mxu0 %v6145_v30  ;;  %v6230_v29 = vld [vmem:[%s7233_s12 + $0x544] ss:$8 sps:$4 sm:$0xff]   ;;  %v6225_v30 = vld [vmem:[%s7233_s12 + $0x440] ss:$8 sps:$4 sm:$0xff]  }
  0x90   : > { %4421 = vmatprep.subr.bf16.mxu1 %v6148_v31  ;;  %v6228_v31 = vld [vmem:[%s7233_s12 + $0x540] ss:$8 sps:$4 sm:$0xff]  }
  0x92   : > { %4381 = vmatpush1.bf16.msra.mxu0 %v6143_v34  ;;  %v6231_v34 = vld [vmem:[%s7233_s12 + $0x430] ss:$8 sps:$4 sm:$0xff]  }
  0x93   : > { %4422 = vmatpush1.bf16.msra.mxu1 %v6146_v35  ;;  %4382 = vmatprep.subr.bf16.mxu0 %v6151_v38  ;;  %v6234_v35 = vld [vmem:[%s7233_s12 + $0x530] ss:$8 sps:$4 sm:$0xff]   ;;  %v6237_v38 = vld [vmem:[%s7233_s12 + $0x420] ss:$8 sps:$4 sm:$0xff]  }
  0x94   : > { %4423 = vmatprep.subr.bf16.mxu1 %v6154_v39  ;;  %v6240_v39 = vld [vmem:[%s7233_s12 + $0x520] ss:$8 sps:$4 sm:$0xff]  }
  0x96   : > { %4383 = vmatpush1.bf16.msra.mxu0 %v6149_v40  ;;  %v6245_v40 = vld [vmem:[%s7233_s12 + $0x414] ss:$8 sps:$4 sm:$0xff]  }
  0x97   : > { %4424 = vmatpush1.bf16.msra.mxu1 %v6152_v41  ;;  %4384 = vmatprep.subr.bf16.mxu0 %v6157_v42  ;;  %v6248_v41 = vld [vmem:[%s7233_s12 + $0x514] ss:$8 sps:$4 sm:$0xff]   ;;  %v6243_v42 = vld [vmem:[%s7233_s12 + $0x410] ss:$8 sps:$4 sm:$0xff]  }
  0x98   : > { %4425 = vmatprep.subr.bf16.mxu1 %v6160_v43  ;;  %v6246_v43 = vld [vmem:[%s7233_s12 + $0x510] ss:$8 sps:$4 sm:$0xff]  }
  0x9a   : > { %4385 = vmatpush2.bf16.msra.mxu0 %v6155_v44  ;;  %v6251_v44 = vld [vmem:[%s7233_s12 + $0x404] ss:$8 sps:$4 sm:$0xff]  }
  0x9b   : > { %4426 = vmatpush2.bf16.msra.mxu1 %v6158_v45  ;;  %4386 = vmatprep.subr.bf16.mxu0 %v6163_v46  ;;  %v6254_v45 = vld [vmem:[%s7233_s12 + $0x504] ss:$8 sps:$4 sm:$0xff]   ;;  %v6249_v46 = vld [vmem:[%s7233_s12 + $0x400] ss:$8 sps:$4 sm:$0xff]  }
  0x9c   : > { %4427 = vmatprep.subr.bf16.mxu1 %v6166_v47  ;;  %v6252_v47 = vld [vmem:[%s7233_s12 + $0x500] ss:$8 sps:$4 sm:$0xff]  }
  0x9e   : > { %4387 = vmatpush2.bf16.msra.mxu0 %v6161_v48  ;;  %v6257_v48 = vld [vmem:[%s7233_s12 + $0x4f4] ss:$8 sps:$4 sm:$0xff]  }
  0x9f   : > { %4428 = vmatpush2.bf16.msra.mxu1 %v6164_v49  ;;  %4388 = vmatprep.subr.bf16.mxu0 %v6169_v50  ;;  %v6260_v49 = vld [vmem:[%s7233_s12 + $0x5f4] ss:$8 sps:$4 sm:$0xff]   ;;  %v6255_v50 = vld [vmem:[%s7233_s12 + $0x4f0] ss:$8 sps:$4 sm:$0xff]  }
  0xa0   : > { %4429 = vmatprep.subr.bf16.mxu1 %v6172_v51  ;;  %v6258_v51 = vld [vmem:[%s7233_s12 + $0x5f0] ss:$8 sps:$4 sm:$0xff]  }
  0xa2   : > { %4389 = vmatpush2.bf16.msra.mxu0 %v6167_v52  ;;  %v6263_v52 = vld [vmem:[%s7233_s12 + $0x4e4] ss:$8 sps:$4 sm:$0xff]  }
  0xa3   : > { %4430 = vmatpush2.bf16.msra.mxu1 %v6170_v53  ;;  %4390 = vmatprep.subr.bf16.mxu0 %v6175_v54  ;;  %v6266_v53 = vld [vmem:[%s7233_s12 + $0x5e4] ss:$8 sps:$4 sm:$0xff]   ;;  %v6261_v54 = vld [vmem:[%s7233_s12 + $0x4e0] ss:$8 sps:$4 sm:$0xff]  }
  0xa4   : > { %4431 = vmatprep.subr.bf16.mxu1 %v6178_v55  ;;  %v6264_v55 = vld [vmem:[%s7233_s12 + $0x5e0] ss:$8 sps:$4 sm:$0xff]  }
  0xa6   : > { %4391 = vmatpush2.bf16.msra.mxu0 %v6173_v56  ;;  %v6269_v56 = vld [vmem:[%s7233_s12 + $0x4d4] ss:$8 sps:$4 sm:$0xff]  }
  0xa7   : > { %4432 = vmatpush2.bf16.msra.mxu1 %v6176_v57  ;;  %4392 = vmatprep.subr.bf16.mxu0 %v6181_v58  ;;  %v6272_v57 = vld [vmem:[%s7233_s12 + $0x5d4] ss:$8 sps:$4 sm:$0xff]   ;;  %v6267_v58 = vld [vmem:[%s7233_s12 + $0x4d0] ss:$8 sps:$4 sm:$0xff]  }
  0xa8   : > { %4433 = vmatprep.subr.bf16.mxu1 %v6184_v59  ;;  %v6270_v59 = vld [vmem:[%s7233_s12 + $0x5d0] ss:$8 sps:$4 sm:$0xff]  }
  0xaa   : > { %4393 = vmatpush2.bf16.msra.mxu0 %v6179_v60  ;;  %v6275_v60 = vld [vmem:[%s7233_s12 + $0x4c4] ss:$8 sps:$4 sm:$0xff]  }
  0xab   : > { %4434 = vmatpush2.bf16.msra.mxu1 %v6182_v61  ;;  %4394 = vmatprep.subr.bf16.mxu0 %v6187_v62  ;;  %v6278_v61 = vld [vmem:[%s7233_s12 + $0x5c4] ss:$8 sps:$4 sm:$0xff]   ;;  %v6273_v62 = vld [vmem:[%s7233_s12 + $0x4c0] ss:$8 sps:$4 sm:$0xff]  }
  0xac   : > { %4435 = vmatprep.subr.bf16.mxu1 %v6190_v63  ;;  %v6276_v63 = vld [vmem:[%s7233_s12 + $0x5c0] ss:$8 sps:$4 sm:$0xff]  }
  0xae   : > { %4395 = vmatpush2.bf16.msra.mxu0 %v6185_v0  ;;  %v6281_v0 = vld [vmem:[%s7233_s12 + $0x4b4] ss:$8 sps:$4 sm:$0xff]  }
  0xaf   : > { %4436 = vmatpush2.bf16.msra.mxu1 %v6188_v1  ;;  %4396 = vmatprep.subr.bf16.mxu0 %v6193_v2  ;;  %v6284_v1 = vld [vmem:[%s7233_s12 + $0x5b4] ss:$8 sps:$4 sm:$0xff]   ;;  %v6279_v2 = vld [vmem:[%s7233_s12 + $0x4b0] ss:$8 sps:$4 sm:$0xff]  }
  0xb0   : > { %4437 = vmatprep.subr.bf16.mxu1 %v6196_v3  ;;  %v6282_v3 = vld [vmem:[%s7233_s12 + $0x5b0] ss:$8 sps:$4 sm:$0xff]  }
  0xb2   : > { %4397 = vmatpush2.bf16.msra.mxu0 %v6191_v4  ;;  %v6287_v4 = vld [vmem:[%s7233_s12 + $0x4a4] ss:$8 sps:$4 sm:$0xff]  }
  0xb3   : > { %4438 = vmatpush2.bf16.msra.mxu1 %v6194_v5  ;;  %4398 = vmatprep.subr.bf16.mxu0 %v6199_v6  ;;  %v6290_v5 = vld [vmem:[%s7233_s12 + $0x5a4] ss:$8 sps:$4 sm:$0xff]   ;;  %v6285_v6 = vld [vmem:[%s7233_s12 + $0x4a0] ss:$8 sps:$4 sm:$0xff]  }
  0xb4   : > { %4439 = vmatprep.subr.bf16.mxu1 %v6202_v7  ;;  %v6288_v7 = vld [vmem:[%s7233_s12 + $0x5a0] ss:$8 sps:$4 sm:$0xff]  }
  0xb6   : > { %4399 = vmatpush2.bf16.msra.mxu0 %v6197_v8  ;;  %v6293_v8 = vld [vmem:[%s7233_s12 + $0x494] ss:$8 sps:$4 sm:$0xff]  }
  0xb7   : > { %4440 = vmatpush2.bf16.msra.mxu1 %v6200_v9  ;;  %4450 = vmatprep.subr.bf16.mxu0 %v6209_v10  ;;  %v6296_v9 = vld [vmem:[%s7233_s12 + $0x594] ss:$8 sps:$4 sm:$0xff]   ;;  %v6291_v10 = vld [vmem:[%s7233_s12 + $0x490] ss:$8 sps:$4 sm:$0xff]  }
  0xb8   : > { %4491 = vmatprep.subr.bf16.mxu1 %v6212_v11  ;;  %v6294_v11 = vld [vmem:[%s7233_s12 + $0x590] ss:$8 sps:$4 sm:$0xff]  }
  0xb9   : > { %4401 = vmatmul.mubr.bf16.vlgmr.msra.gmra.mxu0 %v5262_v12  ;;  %v6299_v12 = vld [vmem:[%s7233_s12 + $0x484] ss:$8 sps:$4 sm:$0xff]  }
  0xba   : > { %4442 = vmatmul.mubr.bf16.vlgmr.msra.gmra.mxu1 %v5264_v13  ;;  %4451 = vmatpush1.bf16.msra.mxu0 %v6207_v14  ;;  %v6302_v13 = vld [vmem:[%s7233_s12 + $0x584] ss:$8 sps:$4 sm:$0xff]   ;;  %v6297_v14 = vld [vmem:[%s7233_s12 + $0x480] ss:$8 sps:$4 sm:$0xff]  }
  0xbb   : > { %4492 = vmatpush1.bf16.msra.mxu1 %v6210_v15  ;;  %4452 = vmatprep.subr.bf16.mxu0 %v6215_v16  ;;  %v6300_v15 = vld [vmem:[%s7233_s12 + $0x580] ss:$8 sps:$4 sm:$0xff]   ;;  %v6309_v16 = vld [vmem:[%s7233_s12 + $0x674] ss:$8 sps:$4 sm:$0xff]  }
  0xbc   : > { %4493 = vmatprep.subr.bf16.mxu1 %v6218_v17  ;;  %4482 = vmatprep.mubr.bf16.mxu0 %v5267_v20  ;;  %v6312_v17 = vld [vmem:[%s7233_s12 + $0x774] ss:$8 sps:$4 sm:$0xff]   ;;  %v6307_v20 = vld [vmem:[%s7233_s12 + $0x670] ss:$8 sps:$4 sm:$0xff]  }
  0xbd   : > { %4523 = vmatprep.mubr.bf16.mxu1 %v5269_v21  ;;  %v7481_v21 = vld [vmem:[%s8112_s0 + $0x30] sm:$0xff] }
  0xbe   : > { %4453 = vmatpush1.bf16.msra.mxu0 %v6213_v22  ;;  %v5266_v22 = vcombine.low %v7406_v18, %v7406_v18  ;;  %v5271_v18 = vcombine.high %v7481_v21, %v7481_v21 }
  0xbf   : > { %4494 = vmatpush1.bf16.msra.mxu1 %v6216_v23  ;;  %4454 = vmatprep.subr.bf16.mxu0 %v6221_v24  ;;  %v5268_v23 = vcombine.low %v7411_v19, %v7411_v19  ;;  %v7490_v24 = vld [vmem:[%s8112_s0 + $0x38] sm:$0xff] }
  0xc0   : > { %4495 = vmatprep.subr.bf16.mxu1 %v6224_v25  ;;  %v6310_v25 = vld [vmem:[%s7233_s12 + $0x770] ss:$8 sps:$4 sm:$0xff]   ;;  %v5273_v19 = vcombine.high %v7490_v24, %v7490_v24 }
  0xc2   : > { %4455 = vmatpush1.bf16.msra.mxu0 %v6219_v26  ;;  %v6315_v26 = vld [vmem:[%s7233_s12 + $0x664] ss:$8 sps:$4 sm:$0xff]  }
  0xc3   : > { %4496 = vmatpush1.bf16.msra.mxu1 %v6222_v27  ;;  %4456 = vmatprep.subr.bf16.mxu0 %v6227_v28  ;;  %v6318_v27 = vld [vmem:[%s7233_s12 + $0x764] ss:$8 sps:$4 sm:$0xff]   ;;  %v6313_v28 = vld [vmem:[%s7233_s12 + $0x660] ss:$8 sps:$4 sm:$0xff]  }
  0xc4   : > { %4497 = vmatprep.subr.bf16.mxu1 %v6230_v29  ;;  %v6316_v29 = vld [vmem:[%s7233_s12 + $0x760] ss:$8 sps:$4 sm:$0xff]  }
  0xc6   : > { %4457 = vmatpush1.bf16.msra.mxu0 %v6225_v30  ;;  %v6321_v30 = vld [vmem:[%s7233_s12 + $0x654] ss:$8 sps:$4 sm:$0xff]  }
  0xc7   : > { %4498 = vmatpush1.bf16.msra.mxu1 %v6228_v31  ;;  %4458 = vmatprep.subr.bf16.mxu0 %v6233_v32  ;;  %v6324_v31 = vld [vmem:[%s7233_s12 + $0x754] ss:$8 sps:$4 sm:$0xff]   ;;  %v6319_v32 = vld [vmem:[%s7233_s12 + $0x650] ss:$8 sps:$4 sm:$0xff]  }
  0xc8   : > { %4499 = vmatprep.subr.bf16.mxu1 %v6236_v33  ;;  %v6322_v33 = vld [vmem:[%s7233_s12 + $0x750] ss:$8 sps:$4 sm:$0xff]  }
  0xca   : > { %4459 = vmatpush1.bf16.msra.mxu0 %v6231_v34  ;;  %v6327_v34 = vld [vmem:[%s7233_s12 + $0x644] ss:$8 sps:$4 sm:$0xff]  }
  0xcb   : > { %4500 = vmatpush1.bf16.msra.mxu1 %v6234_v35  ;;  %4460 = vmatprep.subr.bf16.mxu0 %v6239_v36  ;;  %v6330_v35 = vld [vmem:[%s7233_s12 + $0x744] ss:$8 sps:$4 sm:$0xff]   ;;  %v6325_v36 = vld [vmem:[%s7233_s12 + $0x640] ss:$8 sps:$4 sm:$0xff]  }
  0xcc   : > { %4501 = vmatprep.subr.bf16.mxu1 %v6242_v37  ;;  %v6328_v37 = vld [vmem:[%s7233_s12 + $0x740] ss:$8 sps:$4 sm:$0xff]  }
  0xce   : > { %4461 = vmatpush1.bf16.msra.mxu0 %v6237_v38  ;;  %v6333_v38 = vld [vmem:[%s7233_s12 + $0x634] ss:$8 sps:$4 sm:$0xff]  }
  0xcf   : > { %4502 = vmatpush1.bf16.msra.mxu1 %v6240_v39  ;;  %4462 = vmatprep.subr.bf16.mxu0 %v6245_v40  ;;  %v6336_v39 = vld [vmem:[%s7233_s12 + $0x734] ss:$8 sps:$4 sm:$0xff]   ;;  %v6331_v40 = vld [vmem:[%s7233_s12 + $0x630] ss:$8 sps:$4 sm:$0xff]  }
  0xd0   : > { %4503 = vmatprep.subr.bf16.mxu1 %v6248_v41  ;;  %v6334_v41 = vld [vmem:[%s7233_s12 + $0x730] ss:$8 sps:$4 sm:$0xff]  }
  0xd2   : > { %4463 = vmatpush1.bf16.msra.mxu0 %v6243_v42  ;;  %v6339_v42 = vld [vmem:[%s7233_s12 + $0x624] ss:$8 sps:$4 sm:$0xff]  }
  0xd3   : > { %4504 = vmatpush1.bf16.msra.mxu1 %v6246_v43  ;;  %4464 = vmatprep.subr.bf16.mxu0 %v6251_v44  ;;  %v6342_v43 = vld [vmem:[%s7233_s12 + $0x724] ss:$8 sps:$4 sm:$0xff]   ;;  %v6337_v44 = vld [vmem:[%s7233_s12 + $0x620] ss:$8 sps:$4 sm:$0xff]  }
  0xd4   : > { %4505 = vmatprep.subr.bf16.mxu1 %v6254_v45  ;;  %v6340_v45 = vld [vmem:[%s7233_s12 + $0x720] ss:$8 sps:$4 sm:$0xff]  }
  0xd6   : > { %4465 = vmatpush1.bf16.msra.mxu0 %v6249_v46  ;;  %v6345_v46 = vld [vmem:[%s7233_s12 + $0x614] ss:$8 sps:$4 sm:$0xff]  }
  0xd7   : > { %4506 = vmatpush1.bf16.msra.mxu1 %v6252_v47  ;;  %4466 = vmatprep.subr.bf16.mxu0 %v6257_v48  ;;  %v6348_v47 = vld [vmem:[%s7233_s12 + $0x714] ss:$8 sps:$4 sm:$0xff]   ;;  %v6343_v48 = vld [vmem:[%s7233_s12 + $0x610] ss:$8 sps:$4 sm:$0xff]  }
  0xd8   : > { %4507 = vmatprep.subr.bf16.mxu1 %v6260_v49  ;;  %v6346_v49 = vld [vmem:[%s7233_s12 + $0x710] ss:$8 sps:$4 sm:$0xff]  }
  0xda   : > { %4467 = vmatpush2.bf16.msra.mxu0 %v6255_v50  ;;  %v6351_v50 = vld [vmem:[%s7233_s12 + $0x604] ss:$8 sps:$4 sm:$0xff]  }
  0xdb   : > { %4508 = vmatpush2.bf16.msra.mxu1 %v6258_v51  ;;  %4468 = vmatprep.subr.bf16.mxu0 %v6263_v52  ;;  %v6354_v51 = vld [vmem:[%s7233_s12 + $0x704] ss:$8 sps:$4 sm:$0xff]   ;;  %v6349_v52 = vld [vmem:[%s7233_s12 + $0x600] ss:$8 sps:$4 sm:$0xff]  }
  0xdc   : > { %4509 = vmatprep.subr.bf16.mxu1 %v6266_v53  ;;  %v6352_v53 = vld [vmem:[%s7233_s12 + $0x700] ss:$8 sps:$4 sm:$0xff]  }
  0xde   : > { %4469 = vmatpush2.bf16.msra.mxu0 %v6261_v54  ;;  %v6357_v54 = vld [vmem:[%s7233_s12 + $0x6f4] ss:$8 sps:$4 sm:$0xff]  }
  0xdf   : > { %4510 = vmatpush2.bf16.msra.mxu1 %v6264_v55  ;;  %4470 = vmatprep.subr.bf16.mxu0 %v6269_v56  ;;  %v6360_v55 = vld [vmem:[%s7233_s12 + $0x7f4] ss:$8 sps:$4 sm:$0xff]   ;;  %v6355_v56 = vld [vmem:[%s7233_s12 + $0x6f0] ss:$8 sps:$4 sm:$0xff]  }
  0xe0   : > { %4511 = vmatprep.subr.bf16.mxu1 %v6272_v57  ;;  %v6358_v57 = vld [vmem:[%s7233_s12 + $0x7f0] ss:$8 sps:$4 sm:$0xff]  }
  0xe2   : > { %4471 = vmatpush2.bf16.msra.mxu0 %v6267_v58  ;;  %v6363_v58 = vld [vmem:[%s7233_s12 + $0x6e4] ss:$8 sps:$4 sm:$0xff]  }
  0xe3   : > { %4512 = vmatpush2.bf16.msra.mxu1 %v6270_v59  ;;  %4472 = vmatprep.subr.bf16.mxu0 %v6275_v60  ;;  %v6366_v59 = vld [vmem:[%s7233_s12 + $0x7e4] ss:$8 sps:$4 sm:$0xff]   ;;  %v6361_v60 = vld [vmem:[%s7233_s12 + $0x6e0] ss:$8 sps:$4 sm:$0xff]  }
  0xe4   : > { %4513 = vmatprep.subr.bf16.mxu1 %v6278_v61  ;;  %v6364_v61 = vld [vmem:[%s7233_s12 + $0x7e0] ss:$8 sps:$4 sm:$0xff]  }
  0xe6   : > { %4473 = vmatpush2.bf16.msra.mxu0 %v6273_v62  ;;  %v6369_v62 = vld [vmem:[%s7233_s12 + $0x6d4] ss:$8 sps:$4 sm:$0xff]  }
  0xe7   : > { %4514 = vmatpush2.bf16.msra.mxu1 %v6276_v63  ;;  %4474 = vmatprep.subr.bf16.mxu0 %v6281_v0  ;;  %v6372_v63 = vld [vmem:[%s7233_s12 + $0x7d4] ss:$8 sps:$4 sm:$0xff]   ;;  %v6367_v0 = vld [vmem:[%s7233_s12 + $0x6d0] ss:$8 sps:$4 sm:$0xff]  }
  0xe8   : > { %4515 = vmatprep.subr.bf16.mxu1 %v6284_v1  ;;  %v6370_v1 = vld [vmem:[%s7233_s12 + $0x7d0] ss:$8 sps:$4 sm:$0xff]  }
  0xea   : > { %4475 = vmatpush2.bf16.msra.mxu0 %v6279_v2  ;;  %v6375_v2 = vld [vmem:[%s7233_s12 + $0x6c4] ss:$8 sps:$4 sm:$0xff]  }
  0xeb   : > { %4516 = vmatpush2.bf16.msra.mxu1 %v6282_v3  ;;  %4476 = vmatprep.subr.bf16.mxu0 %v6287_v4  ;;  %v6378_v3 = vld [vmem:[%s7233_s12 + $0x7c4] ss:$8 sps:$4 sm:$0xff]   ;;  %v6373_v4 = vld [vmem:[%s7233_s12 + $0x6c0] ss:$8 sps:$4 sm:$0xff]  }
  0xec   : > { %4517 = vmatprep.subr.bf16.mxu1 %v6290_v5  ;;  %v6376_v5 = vld [vmem:[%s7233_s12 + $0x7c0] ss:$8 sps:$4 sm:$0xff]  }
  0xee   : > { %4477 = vmatpush2.bf16.msra.mxu0 %v6285_v6  ;;  %v6381_v6 = vld [vmem:[%s7233_s12 + $0x6b4] ss:$8 sps:$4 sm:$0xff]  }
  0xef   : > { %4518 = vmatpush2.bf16.msra.mxu1 %v6288_v7  ;;  %4478 = vmatprep.subr.bf16.mxu0 %v6293_v8  ;;  %v6384_v7 = vld [vmem:[%s7233_s12 + $0x7b4] ss:$8 sps:$4 sm:$0xff]   ;;  %v6379_v8 = vld [vmem:[%s7233_s12 + $0x6b0] ss:$8 sps:$4 sm:$0xff]  }
  0xf0   : > { %4519 = vmatprep.subr.bf16.mxu1 %v6296_v9  ;;  %v6382_v9 = vld [vmem:[%s7233_s12 + $0x7b0] ss:$8 sps:$4 sm:$0xff]  }
  0xf2   : > { %4479 = vmatpush2.bf16.msra.mxu0 %v6291_v10  ;;  %v6387_v10 = vld [vmem:[%s7233_s12 + $0x6a4] ss:$8 sps:$4 sm:$0xff]  }
  0xf3   : > { %4520 = vmatpush2.bf16.msra.mxu1 %v6294_v11  ;;  %4480 = vmatprep.subr.bf16.mxu0 %v6299_v12  ;;  %v6390_v11 = vld [vmem:[%s7233_s12 + $0x7a4] ss:$8 sps:$4 sm:$0xff]   ;;  %v6385_v12 = vld [vmem:[%s7233_s12 + $0x6a0] ss:$8 sps:$4 sm:$0xff]  }
  0xf4   : > { %4521 = vmatprep.subr.bf16.mxu1 %v6302_v13  ;;  %v6388_v13 = vld [vmem:[%s7233_s12 + $0x7a0] ss:$8 sps:$4 sm:$0xff]  }
  0xf6   : > { %4481 = vmatpush2.bf16.msra.mxu0 %v6297_v14  ;;  %v6393_v14 = vld [vmem:[%s7233_s12 + $0x694] ss:$8 sps:$4 sm:$0xff]  }
  0xf7   : > { %4522 = vmatpush2.bf16.msra.mxu1 %v6300_v15  ;;  %4532 = vmatprep.subr.bf16.mxu0 %v6309_v16  ;;  %v936_v15 = vlaneseq  ;;  %v6396_v16 = vld [vmem:[%s7233_s12 + $0x794] ss:$8 sps:$4 sm:$0xff]  }
  0xf8   : > { %4573 = vmatprep.subr.bf16.mxu1 %v6312_v17  ;;  %v6391_v17 = vld [vmem:[%s7233_s12 + $0x690] ss:$8 sps:$4 sm:$0xff]  }
  0xf9   : > { %4483 = vmatmul.mubr.bf16.vlgmr.msra.gmra.mxu0 %v5266_v22  ;;  %v6399_v22 = vld [vmem:[%s7233_s12 + $0x684] ss:$8 sps:$4 sm:$0xff]  }
  0xfa   : > { %4524 = vmatmul.mubr.bf16.vlgmr.msra.gmra.mxu1 %v5268_v23  ;;  %4533 = vmatpush1.bf16.msra.mxu0 %v6307_v20  ;;  %v6394_v20 = vld [vmem:[%s7233_s12 + $0x790] ss:$8 sps:$4 sm:$0xff]   ;;  %v937_v23 = vshrl.u32 %v936_v15, 7  ;;  %v6457_v15 = vld [vmem:[%s7233_s12 + $0x8f4] ss:$8 sps:$4 sm:$0xff]  }
  0xfb   : > { %4574 = vmatpush1.bf16.msra.mxu1 %v6310_v25  ;;  %4534 = vmatprep.subr.bf16.mxu0 %v6315_v26  ;;  %v6402_v25 = vld [vmem:[%s7233_s12 + $0x784] ss:$8 sps:$4 sm:$0xff]   ;;  %v6397_v26 = vld [vmem:[%s7233_s12 + $0x680] ss:$8 sps:$4 sm:$0xff]  }
  0xfc   : > { %4575 = vmatprep.subr.bf16.mxu1 %v6318_v27  ;;  %4564 = vmatprep.mubr.bf16.mxu0 %v5271_v18  ;;  %v6400_v27 = vld [vmem:[%s7233_s12 + $0x780] ss:$8 sps:$4 sm:$0xff]  }
  0xfd   : > { %4605 = vmatprep.mubr.bf16.mxu1 %v5273_v19  ;;  %v934_v18 = vld [vmem:[%s7239_s30] sm:$0x3]  ;;  %v938_v19 = vsub.s32 0, %v937_v23 }
  0xfe   : > { %4535 = vmatpush1.bf16.msra.mxu0 %v6313_v28  ;;  %v6409_v28 = vld [vmem:[%s7233_s12 + $0x874] ss:$8 sps:$4 sm:$0xff]  }
  0xff   : > { %4576 = vmatpush1.bf16.msra.mxu1 %v6316_v29  ;;  %4536 = vmatprep.subr.bf16.mxu0 %v6321_v30  ;;  %v6412_v29 = vld [vmem:[%s7233_s12 + $0x974] ss:$8 sps:$4 sm:$0xff]   ;;  %v6407_v30 = vld [vmem:[%s7233_s12 + $0x870] ss:$8 sps:$4 sm:$0xff]  }
 0x100   : > { %4577 = vmatprep.subr.bf16.mxu1 %v6324_v31  ;;  %v942_v31 = vsub.s32 1, %v937_v23  ;;  %v6466_v23 = vld [vmem:[%s7233_s12 + $0x9e4] ss:$8 sps:$4 sm:$0xff]  }
 0x102   : > { %4537 = vmatpush1.bf16.msra.mxu0 %v6319_v32  ;;  %v5270_v32 = vcombine.low %v7481_v21, %v7481_v21  ;;  %v6415_v21 = vld [vmem:[%s7233_s12 + $0x864] ss:$8 sps:$4 sm:$0xff]  }
 0x103   : > { %4578 = vmatpush1.bf16.msra.mxu1 %v6322_v33  ;;  %4538 = vmatprep.subr.bf16.mxu0 %v6327_v34  ;;  %v5272_v33 = vcombine.low %v7490_v24, %v7490_v24  ;;  %v7568_v34 = vld [vmem:[%s8112_s0 + $0x40] sm:$0xff] }
 0x104   : > { %4579 = vmatprep.subr.bf16.mxu1 %v6330_v35  ;;  %v7573_v35 = vld [vmem:[%s8112_s0 + $0x48] sm:$0xff] }
 0x105   : > { %v6418_v24 = vld [vmem:[%s7233_s12 + $0x964] ss:$8 sps:$4 sm:$0xff]  }
 0x106   : > { %4539 = vmatpush1.bf16.msra.mxu0 %v6325_v36  ;;  %v939_v36 = vrot.slane %v934_v18, %v938_v19  ;;  %v6467_v19 = vld [vmem:[%s7233_s12 + $0x8d0] ss:$8 sps:$4 sm:$0xff]  }
 0x107   : > { %4580 = vmatpush1.bf16.msra.mxu1 %v6328_v37  ;;  %4540 = vmatprep.subr.bf16.mxu0 %v6333_v38  ;;  %v6410_v37 = vld [vmem:[%s7233_s12 + $0x970] ss:$8 sps:$4 sm:$0xff]   ;;  %v943_v38 = vrot.slane %v934_v18, %v942_v31  ;;  %v6472_v18 = vld [vmem:[%s7233_s12 + $0x9d4] ss:$8 sps:$4 sm:$0xff]   ;;  %v6473_v31 = vld [vmem:[%s7233_s12 + $0x8c0] ss:$8 sps:$4 sm:$0xff]  }
 0x108   : > { %4581 = vmatprep.subr.bf16.mxu1 %v6336_v39  ;;  %v5275_v39 = vcombine.high %v7568_v34, %v7568_v34 }
 0x10a   : > { %4541 = vmatpush1.bf16.msra.mxu0 %v6331_v40  ;;  %v5277_v40 = vcombine.high %v7573_v35, %v7573_v35 }
 0x10b   : > { %4582 = vmatpush1.bf16.msra.mxu1 %v6334_v41  ;;  %4542 = vmatprep.subr.bf16.mxu0 %v6339_v42 }
 0x10c   : > { %4583 = vmatprep.subr.bf16.mxu1 %v6342_v43  ;;  %v6413_v43 = vld [vmem:[%s7233_s12 + $0x860] ss:$8 sps:$4 sm:$0xff]  }
 0x10e   : > { %4543 = vmatpush1.bf16.msra.mxu0 %v6337_v44 }
 0x10f   : > { %4584 = vmatpush1.bf16.msra.mxu1 %v6340_v45  ;;  %4544 = vmatprep.subr.bf16.mxu0 %v6345_v46  ;;  %v6416_v45 = vld [vmem:[%s7233_s12 + $0x960] ss:$8 sps:$4 sm:$0xff]  }
 0x110   : > { %4585 = vmatprep.subr.bf16.mxu1 %v6348_v47 }
 0x112   : > { %4545 = vmatpush1.bf16.msra.mxu0 %v6343_v48  ;;  %v6421_v48 = vld [vmem:[%s7233_s12 + $0x854] ss:$8 sps:$4 sm:$0xff]  }
 0x113   : > { %4586 = vmatpush1.bf16.msra.mxu1 %v6346_v49  ;;  %4546 = vmatprep.subr.bf16.mxu0 %v6351_v50  ;;  %v6424_v49 = vld [vmem:[%s7233_s12 + $0x954] ss:$8 sps:$4 sm:$0xff]  }
 0x114   : > { %4587 = vmatprep.subr.bf16.mxu1 %v6354_v51 }
 0x116   : > { %4547 = vmatpush1.bf16.msra.mxu0 %v6349_v52 }
 0x117   : > { %4588 = vmatpush1.bf16.msra.mxu1 %v6352_v53  ;;  %4548 = vmatprep.subr.bf16.mxu0 %v6357_v54  ;;  %v6419_v54 = vld [vmem:[%s7233_s12 + $0x850] ss:$8 sps:$4 sm:$0xff]  }
 0x118   : > { %4589 = vmatprep.subr.bf16.mxu1 %v6360_v55 }
 0x11a   : > { %4549 = vmatpush2.bf16.msra.mxu0 %v6355_v56  ;;  %v6422_v56 = vld [vmem:[%s7233_s12 + $0x950] ss:$8 sps:$4 sm:$0xff]  }
 0x11b   : > { %4590 = vmatpush2.bf16.msra.mxu1 %v6358_v57  ;;  %4550 = vmatprep.subr.bf16.mxu0 %v6363_v58 }
 0x11c   : > { %4591 = vmatprep.subr.bf16.mxu1 %v6366_v59  ;;  %v6427_v59 = vld [vmem:[%s7233_s12 + $0x844] ss:$8 sps:$4 sm:$0xff]  }
 0x11e   : > { %4551 = vmatpush2.bf16.msra.mxu0 %v6361_v60  ;;  %v6430_v60 = vld [vmem:[%s7233_s12 + $0x944] ss:$8 sps:$4 sm:$0xff]  }
 0x11f   : > { %4592 = vmatpush2.bf16.msra.mxu1 %v6364_v61  ;;  %4552 = vmatprep.subr.bf16.mxu0 %v6369_v62  ;;  %v6425_v61 = vld [vmem:[%s7233_s12 + $0x840] ss:$8 sps:$4 sm:$0xff]  }
 0x120   : > { %4593 = vmatprep.subr.bf16.mxu1 %v6372_v63  ;;  %v6428_v62 = vld [vmem:[%s7233_s12 + $0x940] ss:$8 sps:$4 sm:$0xff]   ;;  %v6433_v63 = vld [vmem:[%s7233_s12 + $0x834] ss:$8 sps:$4 sm:$0xff]  }
 0x122   : > { %4553 = vmatpush2.bf16.msra.mxu0 %v6367_v0  ;;  %v6436_v0 = vld [vmem:[%s7233_s12 + $0x934] ss:$8 sps:$4 sm:$0xff]  }
 0x123   : > { %4594 = vmatpush2.bf16.msra.mxu1 %v6370_v1  ;;  %4554 = vmatprep.subr.bf16.mxu0 %v6375_v2  ;;  %v6431_v1 = vld [vmem:[%s7233_s12 + $0x830] ss:$8 sps:$4 sm:$0xff]  }
 0x124   : > { %4595 = vmatprep.subr.bf16.mxu1 %v6378_v3  ;;  %v6434_v2 = vld [vmem:[%s7233_s12 + $0x930] ss:$8 sps:$4 sm:$0xff]   ;;  %v6439_v3 = vld [vmem:[%s7233_s12 + $0x824] ss:$8 sps:$4 sm:$0xff]  }
 0x126   : > { %4555 = vmatpush2.bf16.msra.mxu0 %v6373_v4  ;;  %v6442_v4 = vld [vmem:[%s7233_s12 + $0x924] ss:$8 sps:$4 sm:$0xff]  }
 0x127   : > { %4596 = vmatpush2.bf16.msra.mxu1 %v6376_v5  ;;  %4556 = vmatprep.subr.bf16.mxu0 %v6381_v6  ;;  %v6437_v5 = vld [vmem:[%s7233_s12 + $0x820] ss:$8 sps:$4 sm:$0xff]  }
 0x128   : > { %4597 = vmatprep.subr.bf16.mxu1 %v6384_v7  ;;  %v6440_v6 = vld [vmem:[%s7233_s12 + $0x920] ss:$8 sps:$4 sm:$0xff]   ;;  %v6445_v7 = vld [vmem:[%s7233_s12 + $0x814] ss:$8 sps:$4 sm:$0xff]  }
 0x12a   : > { %4557 = vmatpush2.bf16.msra.mxu0 %v6379_v8  ;;  %v6448_v8 = vld [vmem:[%s7233_s12 + $0x914] ss:$8 sps:$4 sm:$0xff]  }
 0x12b   : > { %4598 = vmatpush2.bf16.msra.mxu1 %v6382_v9  ;;  %4558 = vmatprep.subr.bf16.mxu0 %v6387_v10  ;;  %v6443_v9 = vld [vmem:[%s7233_s12 + $0x810] ss:$8 sps:$4 sm:$0xff]  }
 0x12c   : > { %4599 = vmatprep.subr.bf16.mxu1 %v6390_v11  ;;  %v6446_v10 = vld [vmem:[%s7233_s12 + $0x910] ss:$8 sps:$4 sm:$0xff]   ;;  %v6451_v11 = vld [vmem:[%s7233_s12 + $0x804] ss:$8 sps:$4 sm:$0xff]  }
 0x12e   : > { %4559 = vmatpush2.bf16.msra.mxu0 %v6385_v12  ;;  %v6454_v12 = vld [vmem:[%s7233_s12 + $0x904] ss:$8 sps:$4 sm:$0xff]  }
 0x12f   : > { %4600 = vmatpush2.bf16.msra.mxu1 %v6388_v13  ;;  %4560 = vmatprep.subr.bf16.mxu0 %v6393_v14  ;;  %v6449_v13 = vld [vmem:[%s7233_s12 + $0x800] ss:$8 sps:$4 sm:$0xff]  }
 0x130   : > { %4601 = vmatprep.subr.bf16.mxu1 %v6396_v16  ;;  %v6452_v14 = vld [vmem:[%s7233_s12 + $0x900] ss:$8 sps:$4 sm:$0xff]   ;;  %v6460_v16 = vld [vmem:[%s7233_s12 + $0x9f4] ss:$8 sps:$4 sm:$0xff]  }
 0x132   : > { %4561 = vmatpush2.bf16.msra.mxu0 %v6391_v17  ;;  %v6455_v17 = vld [vmem:[%s7233_s12 + $0x8f0] ss:$8 sps:$4 sm:$0xff]  }
 0x133   : > { %4602 = vmatpush2.bf16.msra.mxu1 %v6394_v20  ;;  %4562 = vmatprep.subr.bf16.mxu0 %v6399_v22  ;;  %v6458_v20 = vld [vmem:[%s7233_s12 + $0x9f0] ss:$8 sps:$4 sm:$0xff]   ;;  %v6463_v22 = vld [vmem:[%s7233_s12 + $0x8e4] ss:$8 sps:$4 sm:$0xff]  }
 0x134   : > { %4603 = vmatprep.subr.bf16.mxu1 %v6402_v25  ;;  %v6461_v25 = vld [vmem:[%s7233_s12 + $0x8e0] ss:$8 sps:$4 sm:$0xff]  }
 0x136   : > { %4563 = vmatpush2.bf16.msra.mxu0 %v6397_v26  ;;  %v6464_v26 = vld [vmem:[%s7233_s12 + $0x9e0] ss:$8 sps:$4 sm:$0xff]  }
 0x137   : > { %4604 = vmatpush2.bf16.msra.mxu1 %v6400_v27  ;;  %4614 = vmatprep.subr.bf16.mxu0 %v6409_v28  ;;  %v6469_v27 = vld [vmem:[%s7233_s12 + $0x8d4] ss:$8 sps:$4 sm:$0xff]   ;;  %v6470_v28 = vld [vmem:[%s7233_s12 + $0x9d0] ss:$8 sps:$4 sm:$0xff]  }
 0x138   : > { %4655 = vmatprep.subr.bf16.mxu1 %v6412_v29  ;;  %v6475_v29 = vld [vmem:[%s7233_s12 + $0x8c4] ss:$8 sps:$4 sm:$0xff]  }
 0x139   : > { %v4320_v41 = vpop.f32.mrf.mxu0  ;;  %4565 = vmatmul.mubr.bf16.vlgmr.msra.gmra.mxu0 %v5270_v32  ;;  %v6476_v32 = vld [vmem:[%s7233_s12 + $0x9c0] ss:$8 sps:$4 sm:$0xff]  }
 0x13a   : > { %v4361_v42 = vpop.f32.mrf.mxu1  ;;  %4606 = vmatmul.mubr.bf16.vlgmr.msra.gmra.mxu1 %v5272_v33  ;;  %v4321_v44 = vadd.f32 %v4320_v41, %v939_v36  ;;  %4615 = vmatpush1.bf16.msra.mxu0 %v6407_v30  ;;  %v6478_v30 = vld [vmem:[%s7233_s12 + $0x9c4] ss:$8 sps:$4 sm:$0xff]   ;;  %v6481_v33 = vld [vmem:[%s7233_s12 + $0x8b4] ss:$8 sps:$4 sm:$0xff]  }
 0x13b   : > { %4656 = vmatpush1.bf16.msra.mxu1 %v6410_v37  ;;  %v4322_v46 = vpop.f32.mrf.mxu0  ;;  %4616 = vmatprep.subr.bf16.mxu0 %v6415_v21  ;;  %v6484_v36 = vld [vmem:[%s7233_s12 + $0x9b4] ss:$8 sps:$4 sm:$0xff]   ;;  %v6479_v37 = vld [vmem:[%s7233_s12 + $0x8b0] ss:$8 sps:$4 sm:$0xff]  }
 0x13c   : > { %v4363_v47 = vpop.f32.mrf.mxu1  ;;  %4657 = vmatprep.subr.bf16.mxu1 %v6418_v24  ;;  %v7586_v50 = vadd.f32 %v4361_v42, %v4321_v44  ;;  %v4323_v51 = vadd.f32 %v4322_v46, %v943_v38  ;;  %4646 = vmatprep.mubr.bf16.mxu0 %v5275_v39  ;;  %v6482_v21 = vld [vmem:[%s7233_s12 + $0x9b0] ss:$8 sps:$4 sm:$0xff]   ;;  %v6487_v24 = vld [vmem:[%s7233_s12 + $0x8a4] ss:$8 sps:$4 sm:$0xff]   ;;  %v6485_v39 = vld [vmem:[%s7233_s12 + $0x8a0] ss:$8 sps:$4 sm:$0xff]  }
 0x13d   : > { %4687 = vmatprep.mubr.bf16.mxu1 %v5277_v40  ;;  %v4324_v52 = vpop.f32.mrf.mxu0  ;;  %v6490_v38 = vld [vmem:[%s7233_s12 + $0x9a4] ss:$8 sps:$4 sm:$0xff]   ;;  %v6488_v40 = vld [vmem:[%s7233_s12 + $0x9a0] ss:$8 sps:$4 sm:$0xff]   ;;  %v6493_v41 = vld [vmem:[%s7233_s12 + $0x894] ss:$8 sps:$4 sm:$0xff]  }
 0x13e   : > { %v4365_v53 = vpop.f32.mrf.mxu1  ;;  %v7589_v55 = vadd.f32 %v4363_v47, %v4323_v51  ;;  %4617 = vmatpush1.bf16.msra.mxu0 %v6413_v43  ;;  %v6496_v42 = vld [vmem:[%s7233_s12 + $0x994] ss:$8 sps:$4 sm:$0xff]   ;;  %v6491_v43 = vld [vmem:[%s7233_s12 + $0x890] ss:$8 sps:$4 sm:$0xff]   ;;  %v6502_v46 = vld [vmem:[%s7233_s12 + $0x984] ss:$8 sps:$4 sm:$0xff]  }
 0x13f   : > { %4658 = vmatpush1.bf16.msra.mxu1 %v6416_v45  ;;  %v4325_v57 = vpop.f32.mrf.mxu0  ;;  %4618 = vmatprep.subr.bf16.mxu0 %v6421_v48  ;;  %v6494_v44 = vld [vmem:[%s7233_s12 + $0x990] ss:$8 sps:$4 sm:$0xff]   ;;  %v6499_v45 = vld [vmem:[%s7233_s12 + $0x884] ss:$8 sps:$4 sm:$0xff]   ;;  %v6497_v47 = vld [vmem:[%s7233_s12 + $0x880] ss:$8 sps:$4 sm:$0xff]  }
 0x140   : > { %v4366_v58 = vpop.f32.mrf.mxu1  ;;  %4659 = vmatprep.subr.bf16.mxu1 %v6424_v49  ;;  %v6500_v48 = vld [vmem:[%s7233_s12 + $0x980] ss:$8 sps:$4 sm:$0xff]   ;;  %v6509_v49 = vld [vmem:[%s7233_s12 + $0xa74] ss:$8 sps:$4 sm:$0xff]   ;;  %v6507_v52 = vld [vmem:[%s7233_s12 + $0xa70] ss:$8 sps:$4 sm:$0xff]  }
 0x141   : > { %v6512_v51 = vld [vmem:[%s7233_s12 + $0xb74] ss:$8 sps:$4 sm:$0xff]   ;;  %v6510_v53 = vld [vmem:[%s7233_s12 + $0xb70] ss:$8 sps:$4 sm:$0xff]  }
 0x142   : > { %4619 = vmatpush1.bf16.msra.mxu0 %v6419_v54  ;;  %v5274_v54 = vcombine.low %v7568_v34, %v7568_v34  ;;  %v7655_v57 = vld [vmem:[%s8112_s0 + $0x50] sm:$0xff]  ;;  %v7660_v58 = vld [vmem:[%s8112_s0 + $0x58] sm:$0xff]  ;;  %v6513_v34 = vld [vmem:[%s7233_s12 + $0xa60] ss:$8 sps:$4 sm:$0xff]  }
 0x143   : > { %4660 = vmatpush1.bf16.msra.mxu1 %v6422_v56  ;;  %4620 = vmatprep.subr.bf16.mxu0 %v6427_v59  ;;  %v5276_v56 = vcombine.low %v7573_v35, %v7573_v35  ;;  %v6515_v59 = vld [vmem:[%s7233_s12 + $0xa64] ss:$8 sps:$4 sm:$0xff]   ;;  %v6516_v35 = vld [vmem:[%s7233_s12 + $0xb60] ss:$8 sps:$4 sm:$0xff]  }
 0x144   : > { %4661 = vmatprep.subr.bf16.mxu1 %v6430_v60  ;;  %v6518_v60 = vld [vmem:[%s7233_s12 + $0xb64] ss:$8 sps:$4 sm:$0xff]  }
 0x146   : > { %4621 = vmatpush1.bf16.msra.mxu0 %v6425_v61  ;;  %v5279_v61 = vcombine.high %v7655_v57, %v7655_v57 }
 0x147   : > { %4662 = vmatpush1.bf16.msra.mxu1 %v6428_v62  ;;  %4622 = vmatprep.subr.bf16.mxu0 %v6433_v63  ;;  %v5281_v62 = vcombine.high %v7660_v58, %v7660_v58 }
 0x148   : > { %4663 = vmatprep.subr.bf16.mxu1 %v6436_v0 }
 0x14a   : > { %4623 = vmatpush1.bf16.msra.mxu0 %v6431_v1 }
 0x14b   : > { %4664 = vmatpush1.bf16.msra.mxu1 %v6434_v2  ;;  %4624 = vmatprep.subr.bf16.mxu0 %v6439_v3 }
 0x14c   : > { %4665 = vmatprep.subr.bf16.mxu1 %v6442_v4  ;;  %v6521_v4 = vld [vmem:[%s7233_s12 + $0xa54] ss:$8 sps:$4 sm:$0xff]  }
 0x14e   : > { %4625 = vmatpush1.bf16.msra.mxu0 %v6437_v5  ;;  %v6524_v5 = vld [vmem:[%s7233_s12 + $0xb54] ss:$8 sps:$4 sm:$0xff]  }
 0x14f   : > { %4666 = vmatpush1.bf16.msra.mxu1 %v6440_v6  ;;  %4626 = vmatprep.subr.bf16.mxu0 %v6445_v7 }
 0x150   : > { %4667 = vmatprep.subr.bf16.mxu1 %v6448_v8  ;;  %v6519_v8 = vld [vmem:[%s7233_s12 + $0xa50] ss:$8 sps:$4 sm:$0xff]  }
 0x152   : > { %4627 = vmatpush1.bf16.msra.mxu0 %v6443_v9  ;;  %v6522_v9 = vld [vmem:[%s7233_s12 + $0xb50] ss:$8 sps:$4 sm:$0xff]  }
 0x153   : > { %4668 = vmatpush1.bf16.msra.mxu1 %v6446_v10  ;;  %4628 = vmatprep.subr.bf16.mxu0 %v6451_v11 }
 0x154   : > { %4669 = vmatprep.subr.bf16.mxu1 %v6454_v12 }
 0x156   : > { %4629 = vmatpush1.bf16.msra.mxu0 %v6449_v13 }
 0x157   : > { %4670 = vmatpush1.bf16.msra.mxu1 %v6452_v14  ;;  %4630 = vmatprep.subr.bf16.mxu0 %v6457_v15  ;;  %v6530_v14 = vld [vmem:[%s7233_s12 + $0xb44] ss:$8 sps:$4 sm:$0xff]   ;;  %v6525_v15 = vld [vmem:[%s7233_s12 + $0xa40] ss:$8 sps:$4 sm:$0xff]  }
 0x158   : > { %4671 = vmatprep.subr.bf16.mxu1 %v6460_v16  ;;  %v6528_v16 = vld [vmem:[%s7233_s12 + $0xb40] ss:$8 sps:$4 sm:$0xff]  }
 0x15a   : > { %4631 = vmatpush2.bf16.msra.mxu0 %v6455_v17  ;;  %v6533_v17 = vld [vmem:[%s7233_s12 + $0xa34] ss:$8 sps:$4 sm:$0xff]  }
 0x15b   : > { %4672 = vmatpush2.bf16.msra.mxu1 %v6458_v20  ;;  %4632 = vmatprep.subr.bf16.mxu0 %v6463_v22  ;;  %v6536_v20 = vld [vmem:[%s7233_s12 + $0xb34] ss:$8 sps:$4 sm:$0xff]   ;;  %v6531_v22 = vld [vmem:[%s7233_s12 + $0xa30] ss:$8 sps:$4 sm:$0xff]  }
 0x15c   : > { %4673 = vmatprep.subr.bf16.mxu1 %v6466_v23  ;;  %v6534_v23 = vld [vmem:[%s7233_s12 + $0xb30] ss:$8 sps:$4 sm:$0xff]  }
 0x15e   : > { %4633 = vmatpush2.bf16.msra.mxu0 %v6461_v25  ;;  %v6539_v25 = vld [vmem:[%s7233_s12 + $0xa24] ss:$8 sps:$4 sm:$0xff]  }
 0x15f   : > { %4674 = vmatpush2.bf16.msra.mxu1 %v6464_v26  ;;  %4634 = vmatprep.subr.bf16.mxu0 %v6469_v27  ;;  %v6542_v26 = vld [vmem:[%s7233_s12 + $0xb24] ss:$8 sps:$4 sm:$0xff]   ;;  %v6537_v27 = vld [vmem:[%s7233_s12 + $0xa20] ss:$8 sps:$4 sm:$0xff]  }
 0x160   : > { %4675 = vmatprep.subr.bf16.mxu1 %v6472_v18  ;;  %v6540_v18 = vld [vmem:[%s7233_s12 + $0xb20] ss:$8 sps:$4 sm:$0xff]  }
 0x162   : > { %4635 = vmatpush2.bf16.msra.mxu0 %v6467_v19  ;;  %v6545_v19 = vld [vmem:[%s7233_s12 + $0xa14] ss:$8 sps:$4 sm:$0xff]  }
 0x163   : > { %4676 = vmatpush2.bf16.msra.mxu1 %v6470_v28  ;;  %4636 = vmatprep.subr.bf16.mxu0 %v6475_v29  ;;  %v6548_v28 = vld [vmem:[%s7233_s12 + $0xb14] ss:$8 sps:$4 sm:$0xff]   ;;  %v6543_v29 = vld [vmem:[%s7233_s12 + $0xa10] ss:$8 sps:$4 sm:$0xff]  }
 0x164   : > { %4677 = vmatprep.subr.bf16.mxu1 %v6478_v30  ;;  %v6546_v30 = vld [vmem:[%s7233_s12 + $0xb10] ss:$8 sps:$4 sm:$0xff]  }
 0x166   : > { %4637 = vmatpush2.bf16.msra.mxu0 %v6473_v31  ;;  %v6551_v31 = vld [vmem:[%s7233_s12 + $0xa04] ss:$8 sps:$4 sm:$0xff]  }
 0x167   : > { %4678 = vmatpush2.bf16.msra.mxu1 %v6476_v32  ;;  %4638 = vmatprep.subr.bf16.mxu0 %v6481_v33  ;;  %v6554_v32 = vld [vmem:[%s7233_s12 + $0xb04] ss:$8 sps:$4 sm:$0xff]   ;;  %v6549_v33 = vld [vmem:[%s7233_s12 + $0xa00] ss:$8 sps:$4 sm:$0xff]  }
 0x168   : > { %4679 = vmatprep.subr.bf16.mxu1 %v6484_v36  ;;  %v6552_v36 = vld [vmem:[%s7233_s12 + $0xb00] ss:$8 sps:$4 sm:$0xff]  }
 0x16a   : > { %4639 = vmatpush2.bf16.msra.mxu0 %v6479_v37  ;;  %v6557_v37 = vld [vmem:[%s7233_s12 + $0xaf4] ss:$8 sps:$4 sm:$0xff]  }
 0x16b   : > { %4680 = vmatpush2.bf16.msra.mxu1 %v6482_v21  ;;  %4640 = vmatprep.subr.bf16.mxu0 %v6487_v24  ;;  %v6560_v21 = vld [vmem:[%s7233_s12 + $0xbf4] ss:$8 sps:$4 sm:$0xff]   ;;  %v6555_v24 = vld [vmem:[%s7233_s12 + $0xaf0] ss:$8 sps:$4 sm:$0xff]  }
 0x16c   : > { %4681 = vmatprep.subr.bf16.mxu1 %v6490_v38  ;;  %v6558_v38 = vld [vmem:[%s7233_s12 + $0xbf0] ss:$8 sps:$4 sm:$0xff]  }
 0x16e   : > { %4641 = vmatpush2.bf16.msra.mxu0 %v6485_v39  ;;  %v6563_v39 = vld [vmem:[%s7233_s12 + $0xae4] ss:$8 sps:$4 sm:$0xff]  }
 0x16f   : > { %4682 = vmatpush2.bf16.msra.mxu1 %v6488_v40  ;;  %4642 = vmatprep.subr.bf16.mxu0 %v6493_v41  ;;  %v6566_v40 = vld [vmem:[%s7233_s12 + $0xbe4] ss:$8 sps:$4 sm:$0xff]   ;;  %v6561_v41 = vld [vmem:[%s7233_s12 + $0xae0] ss:$8 sps:$4 sm:$0xff]  }
 0x170   : > { %4683 = vmatprep.subr.bf16.mxu1 %v6496_v42  ;;  %v6564_v42 = vld [vmem:[%s7233_s12 + $0xbe0] ss:$8 sps:$4 sm:$0xff]  }
 0x172   : > { %4643 = vmatpush2.bf16.msra.mxu0 %v6491_v43  ;;  %v6569_v43 = vld [vmem:[%s7233_s12 + $0xad4] ss:$8 sps:$4 sm:$0xff]  }
 0x173   : > { %4684 = vmatpush2.bf16.msra.mxu1 %v6494_v44  ;;  %4644 = vmatprep.subr.bf16.mxu0 %v6499_v45  ;;  %v6572_v44 = vld [vmem:[%s7233_s12 + $0xbd4] ss:$8 sps:$4 sm:$0xff]   ;;  %v6567_v45 = vld [vmem:[%s7233_s12 + $0xad0] ss:$8 sps:$4 sm:$0xff]  }
 0x174   : > { %4685 = vmatprep.subr.bf16.mxu1 %v6502_v46  ;;  %v6570_v46 = vld [vmem:[%s7233_s12 + $0xbd0] ss:$8 sps:$4 sm:$0xff]  }
 0x176   : > { %4645 = vmatpush2.bf16.msra.mxu0 %v6497_v47  ;;  %v6575_v47 = vld [vmem:[%s7233_s12 + $0xac4] ss:$8 sps:$4 sm:$0xff]  }
 0x177   : > { %4686 = vmatpush2.bf16.msra.mxu1 %v6500_v48  ;;  %4696 = vmatprep.subr.bf16.mxu0 %v6509_v49  ;;  %v6578_v48 = vld [vmem:[%s7233_s12 + $0xbc4] ss:$8 sps:$4 sm:$0xff]   ;;  %v6573_v49 = vld [vmem:[%s7233_s12 + $0xac0] ss:$8 sps:$4 sm:$0xff]  }
 0x178   : > { %4737 = vmatprep.subr.bf16.mxu1 %v6512_v51  ;;  %v6576_v51 = vld [vmem:[%s7233_s12 + $0xbc0] ss:$8 sps:$4 sm:$0xff]  }
 0x179   : > { %v4402_v63 = vpop.f32.mrf.mxu0  ;;  %4647 = vmatmul.mubr.bf16.vlgmr.msra.gmra.mxu0 %v5274_v54  ;;  %v6579_v54 = vld [vmem:[%s7233_s12 + $0xab0] ss:$8 sps:$4 sm:$0xff]  }
 0x17a   : > { %v4443_v0 = vpop.f32.mrf.mxu1  ;;  %4688 = vmatmul.mubr.bf16.vlgmr.msra.gmra.mxu1 %v5276_v56  ;;  %v4403_v1 = vadd.f32 %v4402_v63, %v7586_v50  ;;  %4697 = vmatpush1.bf16.msra.mxu0 %v6507_v52  ;;  %v6581_v52 = vld [vmem:[%s7233_s12 + $0xab4] ss:$8 sps:$4 sm:$0xff]   ;;  %v6582_v56 = vld [vmem:[%s7233_s12 + $0xbb0] ss:$8 sps:$4 sm:$0xff]  }
 0x17b   : > { %4738 = vmatpush1.bf16.msra.mxu1 %v6510_v53  ;;  %v4404_v2 = vpop.f32.mrf.mxu0  ;;  %4698 = vmatprep.subr.bf16.mxu0 %v6515_v59  ;;  %v6584_v53 = vld [vmem:[%s7233_s12 + $0xbb4] ss:$8 sps:$4 sm:$0xff]   ;;  %v6587_v59 = vld [vmem:[%s7233_s12 + $0xaa4] ss:$8 sps:$4 sm:$0xff]   ;;  %v6591_v63 = vld [vmem:[%s7233_s12 + $0xa90] ss:$8 sps:$4 sm:$0xff]  }
 0x17c   : > { %v4445_v3 = vpop.f32.mrf.mxu1  ;;  %4739 = vmatprep.subr.bf16.mxu1 %v6518_v60  ;;  %v7673_v6 = vadd.f32 %v4443_v0, %v4403_v1  ;;  %v4405_v7 = vadd.f32 %v4404_v2, %v7589_v55  ;;  %4728 = vmatprep.mubr.bf16.mxu0 %v5279_v61  ;;  %v6527_v55 = vld [vmem:[%s7233_s12 + $0xa44] ss:$8 sps:$4 sm:$0xff]   ;;  %v6593_v61 = vld [vmem:[%s7233_s12 + $0xa94] ss:$8 sps:$4 sm:$0xff]   ;;  %v6594_v0 = vld [vmem:[%s7233_s12 + $0xb90] ss:$8 sps:$4 sm:$0xff]  }
 0x17d   : > { %4769 = vmatprep.mubr.bf16.mxu1 %v5281_v62  ;;  %v4406_v50 = vpop.f32.mrf.mxu0  ;;  %v6590_v60 = vld [vmem:[%s7233_s12 + $0xba4] ss:$8 sps:$4 sm:$0xff]   ;;  %v6596_v62 = vld [vmem:[%s7233_s12 + $0xb94] ss:$8 sps:$4 sm:$0xff]  }
 0x17e   : > { %v4447_v10 = vpop.f32.mrf.mxu1  ;;  %v7678_v11 = vadd.f32 %v4445_v3, %v4405_v7  ;;  %4699 = vmatpush1.bf16.msra.mxu0 %v6513_v34  ;;  %v6585_v34 = vld [vmem:[%s7233_s12 + $0xaa0] ss:$8 sps:$4 sm:$0xff]   ;;  %v6599_v1 = vld [vmem:[%s7233_s12 + $0xa84] ss:$8 sps:$4 sm:$0xff]   ;;  %v6612_v7 = vld [vmem:[%s7233_s12 + $0xd74] ss:$8 sps:$4 sm:$0xff]   ;;  %v5278_v50 = vcombine.low %v7655_v57, %v7655_v57 }
 0x17f   : > { %4740 = vmatpush1.bf16.msra.mxu1 %v6516_v35  ;;  %v4407_v12 = vpop.f32.mrf.mxu0  ;;  %4700 = vmatprep.subr.bf16.mxu0 %v6521_v4  ;;  %v6588_v35 = vld [vmem:[%s7233_s12 + $0xba0] ss:$8 sps:$4 sm:$0xff]   ;;  %v6602_v2 = vld [vmem:[%s7233_s12 + $0xb84] ss:$8 sps:$4 sm:$0xff]   ;;  %v5280_v10 = vcombine.low %v7660_v58, %v7660_v58 }
 0x180   : > { %v4448_v13 = vpop.f32.mrf.mxu1  ;;  %4741 = vmatprep.subr.bf16.mxu1 %v6524_v5  ;;  %v6597_v3 = vld [vmem:[%s7233_s12 + $0xa80] ss:$8 sps:$4 sm:$0xff]   ;;  %v6609_v5 = vld [vmem:[%s7233_s12 + $0xc74] ss:$8 sps:$4 sm:$0xff]  }
 0x181   : > { %v6600_v4 = vld [vmem:[%s7233_s12 + $0xb80] ss:$8 sps:$4 sm:$0xff]  }
 0x182   : > { %4701 = vmatpush1.bf16.msra.mxu0 %v6519_v8  ;;  %v6607_v8 = vld [vmem:[%s7233_s12 + $0xc70] ss:$8 sps:$4 sm:$0xff]   ;;  %v7743_v12 = vld [vmem:[%s8112_s0 + $0x60] sm:$0xff]  ;;  %v7748_v13 = vld [vmem:[%s8112_s0 + $0x68] sm:$0xff] }
 0x183   : > { %4742 = vmatpush1.bf16.msra.mxu1 %v6522_v9  ;;  %4702 = vmatprep.subr.bf16.mxu0 %v6527_v55  ;;  %v6610_v9 = vld [vmem:[%s7233_s12 + $0xd70] ss:$8 sps:$4 sm:$0xff]   ;;  %v6615_v55 = vld [vmem:[%s7233_s12 + $0xc64] ss:$8 sps:$4 sm:$0xff]   ;;  %v6613_v57 = vld [vmem:[%s7233_s12 + $0xc60] ss:$8 sps:$4 sm:$0xff]  }
 0x184   : > { %4743 = vmatprep.subr.bf16.mxu1 %v6530_v14  ;;  %v6618_v14 = vld [vmem:[%s7233_s12 + $0xd64] ss:$8 sps:$4 sm:$0xff]   ;;  %v6616_v58 = vld [vmem:[%s7233_s12 + $0xd60] ss:$8 sps:$4 sm:$0xff]  }
 0x186   : > { %4703 = vmatpush1.bf16.msra.mxu0 %v6525_v15  ;;  %v5283_v15 = vcombine.high %v7743_v12, %v7743_v12 }
 0x187   : > { %4744 = vmatpush1.bf16.msra.mxu1 %v6528_v16  ;;  %4704 = vmatprep.subr.bf16.mxu0 %v6533_v17  ;;  %v5285_v16 = vcombine.high %v7748_v13, %v7748_v13 }
 0x188   : > { %4745 = vmatprep.subr.bf16.mxu1 %v6536_v20 }
 0x18a   : > { %4705 = vmatpush1.bf16.msra.mxu0 %v6531_v22 }
 0x18b   : > { %4746 = vmatpush1.bf16.msra.mxu1 %v6534_v23  ;;  %4706 = vmatprep.subr.bf16.mxu0 %v6539_v25 }
 0x18c   : > { %4747 = vmatprep.subr.bf16.mxu1 %v6542_v26  ;;  %v6621_v26 = vld [vmem:[%s7233_s12 + $0xc54] ss:$8 sps:$4 sm:$0xff]  }
 0x18e   : > { %4707 = vmatpush1.bf16.msra.mxu0 %v6537_v27  ;;  %v6624_v27 = vld [vmem:[%s7233_s12 + $0xd54] ss:$8 sps:$4 sm:$0xff]  }
 0x18f   : > { %4748 = vmatpush1.bf16.msra.mxu1 %v6540_v18  ;;  %4708 = vmatprep.subr.bf16.mxu0 %v6545_v19 }
 0x190   : > { %4749 = vmatprep.subr.bf16.mxu1 %v6548_v28 }
 0x192   : > { %4709 = vmatpush1.bf16.msra.mxu0 %v6543_v29 }
 0x193   : > { %4750 = vmatpush1.bf16.msra.mxu1 %v6546_v30  ;;  %4710 = vmatprep.subr.bf16.mxu0 %v6551_v31  ;;  %v6619_v30 = vld [vmem:[%s7233_s12 + $0xc50] ss:$8 sps:$4 sm:$0xff]  }
 0x194   : > { %4751 = vmatprep.subr.bf16.mxu1 %v6554_v32  ;;  %v6622_v31 = vld [vmem:[%s7233_s12 + $0xd50] ss:$8 sps:$4 sm:$0xff]  }
 0x196   : > { %4711 = vmatpush1.bf16.msra.mxu0 %v6549_v33 }
 0x197   : > { %4752 = vmatpush1.bf16.msra.mxu1 %v6552_v36  ;;  %4712 = vmatprep.subr.bf16.mxu0 %v6557_v37  ;;  %v6630_v36 = vld [vmem:[%s7233_s12 + $0xd44] ss:$8 sps:$4 sm:$0xff]   ;;  %v6625_v37 = vld [vmem:[%s7233_s12 + $0xc40] ss:$8 sps:$4 sm:$0xff]  }
 0x198   : > { %4753 = vmatprep.subr.bf16.mxu1 %v6560_v21  ;;  %v6628_v21 = vld [vmem:[%s7233_s12 + $0xd40] ss:$8 sps:$4 sm:$0xff]  }
 0x19a   : > { %4713 = vmatpush2.bf16.msra.mxu0 %v6555_v24  ;;  %v6633_v24 = vld [vmem:[%s7233_s12 + $0xc34] ss:$8 sps:$4 sm:$0xff]  }
 0x19b   : > { %4754 = vmatpush2.bf16.msra.mxu1 %v6558_v38  ;;  %4714 = vmatprep.subr.bf16.mxu0 %v6563_v39  ;;  %v6636_v38 = vld [vmem:[%s7233_s12 + $0xd34] ss:$8 sps:$4 sm:$0xff]   ;;  %v6631_v39 = vld [vmem:[%s7233_s12 + $0xc30] ss:$8 sps:$4 sm:$0xff]  }
 0x19c   : > { %4755 = vmatprep.subr.bf16.mxu1 %v6566_v40  ;;  %v6634_v40 = vld [vmem:[%s7233_s12 + $0xd30] ss:$8 sps:$4 sm:$0xff]  }
 0x19e   : > { %4715 = vmatpush2.bf16.msra.mxu0 %v6561_v41  ;;  %v6639_v41 = vld [vmem:[%s7233_s12 + $0xc24] ss:$8 sps:$4 sm:$0xff]  }
 0x19f   : > { %4756 = vmatpush2.bf16.msra.mxu1 %v6564_v42  ;;  %4716 = vmatprep.subr.bf16.mxu0 %v6569_v43  ;;  %v6642_v42 = vld [vmem:[%s7233_s12 + $0xd24] ss:$8 sps:$4 sm:$0xff]   ;;  %v6637_v43 = vld [vmem:[%s7233_s12 + $0xc20] ss:$8 sps:$4 sm:$0xff]  }
 0x1a0   : > { %4757 = vmatprep.subr.bf16.mxu1 %v6572_v44  ;;  %v6640_v44 = vld [vmem:[%s7233_s12 + $0xd20] ss:$8 sps:$4 sm:$0xff]  }
 0x1a2   : > { %4717 = vmatpush2.bf16.msra.mxu0 %v6567_v45  ;;  %v6645_v45 = vld [vmem:[%s7233_s12 + $0xc14] ss:$8 sps:$4 sm:$0xff]  }
 0x1a3   : > { %4758 = vmatpush2.bf16.msra.mxu1 %v6570_v46  ;;  %4718 = vmatprep.subr.bf16.mxu0 %v6575_v47  ;;  %v6648_v46 = vld [vmem:[%s7233_s12 + $0xd14] ss:$8 sps:$4 sm:$0xff]   ;;  %v6643_v47 = vld [vmem:[%s7233_s12 + $0xc10] ss:$8 sps:$4 sm:$0xff]  }
 0x1a4   : > { %4759 = vmatprep.subr.bf16.mxu1 %v6578_v48  ;;  %v6646_v48 = vld [vmem:[%s7233_s12 + $0xd10] ss:$8 sps:$4 sm:$0xff]  }
 0x1a6   : > { %4719 = vmatpush2.bf16.msra.mxu0 %v6573_v49  ;;  %v6651_v49 = vld [vmem:[%s7233_s12 + $0xc04] ss:$8 sps:$4 sm:$0xff]  }
 0x1a7   : > { %4760 = vmatpush2.bf16.msra.mxu1 %v6576_v51  ;;  %4720 = vmatprep.subr.bf16.mxu0 %v6581_v52  ;;  %v6654_v51 = vld [vmem:[%s7233_s12 + $0xd04] ss:$8 sps:$4 sm:$0xff]   ;;  %v6649_v52 = vld [vmem:[%s7233_s12 + $0xc00] ss:$8 sps:$4 sm:$0xff]  }
 0x1a8   : > { %4761 = vmatprep.subr.bf16.mxu1 %v6584_v53  ;;  %v6652_v53 = vld [vmem:[%s7233_s12 + $0xd00] ss:$8 sps:$4 sm:$0xff]  }
 0x1aa   : > { %4721 = vmatpush2.bf16.msra.mxu0 %v6579_v54  ;;  %v6657_v54 = vld [vmem:[%s7233_s12 + $0xcf4] ss:$8 sps:$4 sm:$0xff]  }
 0x1ab   : > { %4762 = vmatpush2.bf16.msra.mxu1 %v6582_v56  ;;  %4722 = vmatprep.subr.bf16.mxu0 %v6587_v59  ;;  %v6660_v56 = vld [vmem:[%s7233_s12 + $0xdf4] ss:$8 sps:$4 sm:$0xff]   ;;  %v6655_v59 = vld [vmem:[%s7233_s12 + $0xcf0] ss:$8 sps:$4 sm:$0xff]  }
 0x1ac   : > { %4763 = vmatprep.subr.bf16.mxu1 %v6590_v60  ;;  %v6658_v60 = vld [vmem:[%s7233_s12 + $0xdf0] ss:$8 sps:$4 sm:$0xff]  }
 0x1ae   : > { %4723 = vmatpush2.bf16.msra.mxu0 %v6585_v34  ;;  %v6663_v34 = vld [vmem:[%s7233_s12 + $0xce4] ss:$8 sps:$4 sm:$0xff]  }
 0x1af   : > { %4764 = vmatpush2.bf16.msra.mxu1 %v6588_v35  ;;  %4724 = vmatprep.subr.bf16.mxu0 %v6593_v61  ;;  %v6666_v35 = vld [vmem:[%s7233_s12 + $0xde4] ss:$8 sps:$4 sm:$0xff]   ;;  %v6661_v61 = vld [vmem:[%s7233_s12 + $0xce0] ss:$8 sps:$4 sm:$0xff]  }
 0x1b0   : > { %4765 = vmatprep.subr.bf16.mxu1 %v6596_v62  ;;  %v6664_v62 = vld [vmem:[%s7233_s12 + $0xde0] ss:$8 sps:$4 sm:$0xff]  }
 0x1b2   : > { %4725 = vmatpush2.bf16.msra.mxu0 %v6591_v63  ;;  %v6669_v63 = vld [vmem:[%s7233_s12 + $0xcd4] ss:$8 sps:$4 sm:$0xff]  }
 0x1b3   : > { %4766 = vmatpush2.bf16.msra.mxu1 %v6594_v0  ;;  %4726 = vmatprep.subr.bf16.mxu0 %v6599_v1  ;;  %v6672_v0 = vld [vmem:[%s7233_s12 + $0xdd4] ss:$8 sps:$4 sm:$0xff]   ;;  %v6667_v1 = vld [vmem:[%s7233_s12 + $0xcd0] ss:$8 sps:$4 sm:$0xff]  }
 0x1b4   : > { %4767 = vmatprep.subr.bf16.mxu1 %v6602_v2  ;;  %v6670_v2 = vld [vmem:[%s7233_s12 + $0xdd0] ss:$8 sps:$4 sm:$0xff]  }
 0x1b6   : > { %4727 = vmatpush2.bf16.msra.mxu0 %v6597_v3  ;;  %v6675_v3 = vld [vmem:[%s7233_s12 + $0xcc4] ss:$8 sps:$4 sm:$0xff]  }
 0x1b7   : > { %4768 = vmatpush2.bf16.msra.mxu1 %v6600_v4  ;;  %4778 = vmatprep.subr.bf16.mxu0 %v6609_v5  ;;  %v6678_v4 = vld [vmem:[%s7233_s12 + $0xdc4] ss:$8 sps:$4 sm:$0xff]   ;;  %v6673_v5 = vld [vmem:[%s7233_s12 + $0xcc0] ss:$8 sps:$4 sm:$0xff]  }
 0x1b8   : > { %4819 = vmatprep.subr.bf16.mxu1 %v6612_v7  ;;  %v6676_v7 = vld [vmem:[%s7233_s12 + $0xdc0] ss:$8 sps:$4 sm:$0xff]  }
 0x1b9   : > { %v4484_v17 = vpop.f32.mrf.mxu0  ;;  %4729 = vmatmul.mubr.bf16.vlgmr.msra.gmra.mxu0 %v5278_v50  ;;  %v6679_v50 = vld [vmem:[%s7233_s12 + $0xcb0] ss:$8 sps:$4 sm:$0xff]  }
 0x1ba   : > { %v4525_v20 = vpop.f32.mrf.mxu1  ;;  %4770 = vmatmul.mubr.bf16.vlgmr.msra.gmra.mxu1 %v5280_v10  ;;  %v4485_v22 = vadd.f32 %v4484_v17, %v7673_v6  ;;  %4779 = vmatpush1.bf16.msra.mxu0 %v6607_v8  ;;  %v6681_v8 = vld [vmem:[%s7233_s12 + $0xcb4] ss:$8 sps:$4 sm:$0xff]   ;;  %v6682_v10 = vld [vmem:[%s7233_s12 + $0xdb0] ss:$8 sps:$4 sm:$0xff]  }
 0x1bb   : > { %4820 = vmatpush1.bf16.msra.mxu1 %v6610_v9  ;;  %v4486_v23 = vpop.f32.mrf.mxu0  ;;  %4780 = vmatprep.subr.bf16.mxu0 %v6615_v55  ;;  %v6684_v9 = vld [vmem:[%s7233_s12 + $0xdb4] ss:$8 sps:$4 sm:$0xff]   ;;  %v6687_v55 = vld [vmem:[%s7233_s12 + $0xca4] ss:$8 sps:$4 sm:$0xff]   ;;  %v6691_v17 = vld [vmem:[%s7233_s12 + $0xc90] ss:$8 sps:$4 sm:$0xff]  }
 0x1bc   : > { %v4527_v25 = vpop.f32.mrf.mxu1  ;;  %4821 = vmatprep.subr.bf16.mxu1 %v6618_v14  ;;  %v7761_v18 = vadd.f32 %v4525_v20, %v4485_v22  ;;  %v4487_v19 = vadd.f32 %v4486_v23, %v7678_v11  ;;  %4810 = vmatprep.mubr.bf16.mxu0 %v5283_v15  ;;  %v6627_v11 = vld [vmem:[%s7233_s12 + $0xc44] ss:$8 sps:$4 sm:$0xff]   ;;  %v6693_v15 = vld [vmem:[%s7233_s12 + $0xc94] ss:$8 sps:$4 sm:$0xff]   ;;  %v6694_v20 = vld [vmem:[%s7233_s12 + $0xd90] ss:$8 sps:$4 sm:$0xff]  }
 0x1bd   : > { %4851 = vmatprep.mubr.bf16.mxu1 %v5285_v16  ;;  %v4488_v6 = vpop.f32.mrf.mxu0  ;;  %v6690_v14 = vld [vmem:[%s7233_s12 + $0xda4] ss:$8 sps:$4 sm:$0xff]   ;;  %v6696_v16 = vld [vmem:[%s7233_s12 + $0xd94] ss:$8 sps:$4 sm:$0xff]  }
 0x1be   : > { %v4529_v28 = vpop.f32.mrf.mxu1  ;;  %v7764_v29 = vadd.f32 %v4527_v25, %v4487_v19  ;;  %4781 = vmatpush1.bf16.msra.mxu0 %v6613_v57  ;;  %v6685_v57 = vld [vmem:[%s7233_s12 + $0xca0] ss:$8 sps:$4 sm:$0xff]   ;;  %v6699_v22 = vld [vmem:[%s7233_s12 + $0xc84] ss:$8 sps:$4 sm:$0xff]   ;;  %v6712_v19 = vld [vmem:[%s7233_s12 + $0xf74] ss:$8 sps:$4 sm:$0xff]   ;;  %v5282_v6 = vcombine.low %v7743_v12, %v7743_v12 }
 0x1bf   : > { %4822 = vmatpush1.bf16.msra.mxu1 %v6616_v58  ;;  %v4489_v32 = vpop.f32.mrf.mxu0  ;;  %4782 = vmatprep.subr.bf16.mxu0 %v6621_v26  ;;  %v6688_v58 = vld [vmem:[%s7233_s12 + $0xda0] ss:$8 sps:$4 sm:$0xff]   ;;  %v6702_v23 = vld [vmem:[%s7233_s12 + $0xd84] ss:$8 sps:$4 sm:$0xff]   ;;  %v5284_v28 = vcombine.low %v7748_v13, %v7748_v13 }
 0x1c0   : > { %v4530_v33 = vpop.f32.mrf.mxu1  ;;  %4823 = vmatprep.subr.bf16.mxu1 %v6624_v27  ;;  %v6697_v25 = vld [vmem:[%s7233_s12 + $0xc80] ss:$8 sps:$4 sm:$0xff]   ;;  %v6709_v27 = vld [vmem:[%s7233_s12 + $0xe74] ss:$8 sps:$4 sm:$0xff]   ;;  %v6707_v32 = vld [vmem:[%s7233_s12 + $0xe70] ss:$8 sps:$4 sm:$0xff]  }
 0x1c1   : > { %v6700_v26 = vld [vmem:[%s7233_s12 + $0xd80] ss:$8 sps:$4 sm:$0xff]   ;;  %v6710_v33 = vld [vmem:[%s7233_s12 + $0xf70] ss:$8 sps:$4 sm:$0xff]   ;;  %v6715_v12 = vld [vmem:[%s7233_s12 + $0xe64] ss:$8 sps:$4 sm:$0xff]  }
 0x1c2   : > { %4783 = vmatpush1.bf16.msra.mxu0 %v6619_v30  ;;  %v7829_v30 = vld [vmem:[%s8112_s0 + $0x70] sm:$0xff]  ;;  %v6718_v13 = vld [vmem:[%s7233_s12 + $0xf64] ss:$8 sps:$4 sm:$0xff]  }
 0x1c3   : > { %4824 = vmatpush1.bf16.msra.mxu1 %v6622_v31  ;;  %4784 = vmatprep.subr.bf16.mxu0 %v6627_v11  ;;  %v7834_v31 = vld [vmem:[%s8112_s0 + $0x78] sm:$0xff]  ;;  %v5287_v11 = vcombine.high %v7829_v30, %v7829_v30 }
 0x1c4   : > { %4825 = vmatprep.subr.bf16.mxu1 %v6630_v36  ;;  %v5289_v36 = vcombine.high %v7834_v31, %v7834_v31 }
 0x1c6   : > { %4785 = vmatpush1.bf16.msra.mxu0 %v6625_v37 }
 0x1c7   : > { %4826 = vmatpush1.bf16.msra.mxu1 %v6628_v21  ;;  %4786 = vmatprep.subr.bf16.mxu0 %v6633_v24 }
 0x1c8   : > { %4827 = vmatprep.subr.bf16.mxu1 %v6636_v38  ;;  %v6713_v38 = vld [vmem:[%s7233_s12 + $0xe60] ss:$8 sps:$4 sm:$0xff]  }
 0x1ca   : > { %4787 = vmatpush1.bf16.msra.mxu0 %v6631_v39  ;;  %v6716_v39 = vld [vmem:[%s7233_s12 + $0xf60] ss:$8 sps:$4 sm:$0xff]  }
 0x1cb   : > { %4828 = vmatpush1.bf16.msra.mxu1 %v6634_v40  ;;  %4788 = vmatprep.subr.bf16.mxu0 %v6639_v41 }
 0x1cc   : > { %4829 = vmatprep.subr.bf16.mxu1 %v6642_v42  ;;  %v6721_v42 = vld [vmem:[%s7233_s12 + $0xe54] ss:$8 sps:$4 sm:$0xff]  }
 0x1ce   : > { %4789 = vmatpush1.bf16.msra.mxu0 %v6637_v43  ;;  %v6724_v43 = vld [vmem:[%s7233_s12 + $0xf54] ss:$8 sps:$4 sm:$0xff]  }
 0x1cf   : > { %4830 = vmatpush1.bf16.msra.mxu1 %v6640_v44  ;;  %4790 = vmatprep.subr.bf16.mxu0 %v6645_v45 }
 0x1d0   : > { %4831 = vmatprep.subr.bf16.mxu1 %v6648_v46 }
 0x1d2   : > { %4791 = vmatpush1.bf16.msra.mxu0 %v6643_v47 }
 0x1d3   : > { %4832 = vmatpush1.bf16.msra.mxu1 %v6646_v48  ;;  %4792 = vmatprep.subr.bf16.mxu0 %v6651_v49  ;;  %v6719_v48 = vld [vmem:[%s7233_s12 + $0xe50] ss:$8 sps:$4 sm:$0xff]  }
 0x1d4   : > { %4833 = vmatprep.subr.bf16.mxu1 %v6654_v51  ;;  %v6722_v49 = vld [vmem:[%s7233_s12 + $0xf50] ss:$8 sps:$4 sm:$0xff]  }
 0x1d6   : > { %4793 = vmatpush1.bf16.msra.mxu0 %v6649_v52 }
 0x1d7   : > { %4834 = vmatpush1.bf16.msra.mxu1 %v6652_v53  ;;  %4794 = vmatprep.subr.bf16.mxu0 %v6657_v54  ;;  %v6730_v53 = vld [vmem:[%s7233_s12 + $0xf44] ss:$8 sps:$4 sm:$0xff]   ;;  %v6725_v54 = vld [vmem:[%s7233_s12 + $0xe40] ss:$8 sps:$4 sm:$0xff]  }
 0x1d8   : > { %4835 = vmatprep.subr.bf16.mxu1 %v6660_v56  ;;  %v6728_v56 = vld [vmem:[%s7233_s12 + $0xf40] ss:$8 sps:$4 sm:$0xff]  }
 0x1da   : > { %4795 = vmatpush2.bf16.msra.mxu0 %v6655_v59  ;;  %v6733_v59 = vld [vmem:[%s7233_s12 + $0xe34] ss:$8 sps:$4 sm:$0xff]  }
 0x1db   : > { %4836 = vmatpush2.bf16.msra.mxu1 %v6658_v60  ;;  %4796 = vmatprep.subr.bf16.mxu0 %v6663_v34  ;;  %v6736_v60 = vld [vmem:[%s7233_s12 + $0xf34] ss:$8 sps:$4 sm:$0xff]   ;;  %v6731_v34 = vld [vmem:[%s7233_s12 + $0xe30] ss:$8 sps:$4 sm:$0xff]  }
 0x1dc   : > { %4837 = vmatprep.subr.bf16.mxu1 %v6666_v35  ;;  %v6734_v35 = vld [vmem:[%s7233_s12 + $0xf30] ss:$8 sps:$4 sm:$0xff]  }
 0x1de   : > { %4797 = vmatpush2.bf16.msra.mxu0 %v6661_v61  ;;  %v6739_v61 = vld [vmem:[%s7233_s12 + $0xe24] ss:$8 sps:$4 sm:$0xff]  }
 0x1df   : > { %4838 = vmatpush2.bf16.msra.mxu1 %v6664_v62  ;;  %4798 = vmatprep.subr.bf16.mxu0 %v6669_v63  ;;  %v6742_v62 = vld [vmem:[%s7233_s12 + $0xf24] ss:$8 sps:$4 sm:$0xff]   ;;  %v6737_v63 = vld [vmem:[%s7233_s12 + $0xe20] ss:$8 sps:$4 sm:$0xff]  }
 0x1e0   : > { %4839 = vmatprep.subr.bf16.mxu1 %v6672_v0  ;;  %v6740_v0 = vld [vmem:[%s7233_s12 + $0xf20] ss:$8 sps:$4 sm:$0xff]  }
 0x1e2   : > { %4799 = vmatpush2.bf16.msra.mxu0 %v6667_v1  ;;  %v6745_v1 = vld [vmem:[%s7233_s12 + $0xe14] ss:$8 sps:$4 sm:$0xff]  }
 0x1e3   : > { %4840 = vmatpush2.bf16.msra.mxu1 %v6670_v2  ;;  %4800 = vmatprep.subr.bf16.mxu0 %v6675_v3  ;;  %v6748_v2 = vld [vmem:[%s7233_s12 + $0xf14] ss:$8 sps:$4 sm:$0xff]   ;;  %v6743_v3 = vld [vmem:[%s7233_s12 + $0xe10] ss:$8 sps:$4 sm:$0xff]  }
 0x1e4   : > { %4841 = vmatprep.subr.bf16.mxu1 %v6678_v4  ;;  %v6746_v4 = vld [vmem:[%s7233_s12 + $0xf10] ss:$8 sps:$4 sm:$0xff]  }
 0x1e6   : > { %4801 = vmatpush2.bf16.msra.mxu0 %v6673_v5  ;;  %v6751_v5 = vld [vmem:[%s7233_s12 + $0xe04] ss:$8 sps:$4 sm:$0xff]  }
 0x1e7   : > { %4842 = vmatpush2.bf16.msra.mxu1 %v6676_v7  ;;  %4802 = vmatprep.subr.bf16.mxu0 %v6681_v8  ;;  %v6754_v7 = vld [vmem:[%s7233_s12 + $0xf04] ss:$8 sps:$4 sm:$0xff]   ;;  %v6749_v8 = vld [vmem:[%s7233_s12 + $0xe00] ss:$8 sps:$4 sm:$0xff]  }
 0x1e8   : > { %4843 = vmatprep.subr.bf16.mxu1 %v6684_v9  ;;  %v6752_v9 = vld [vmem:[%s7233_s12 + $0xf00] ss:$8 sps:$4 sm:$0xff]  }
 0x1ea   : > { %4803 = vmatpush2.bf16.msra.mxu0 %v6679_v50  ;;  %v6757_v50 = vld [vmem:[%s7233_s12 + $0xef4] ss:$8 sps:$4 sm:$0xff]  }
 0x1eb   : > { %4844 = vmatpush2.bf16.msra.mxu1 %v6682_v10  ;;  %4804 = vmatprep.subr.bf16.mxu0 %v6687_v55  ;;  %v6760_v10 = vld [vmem:[%s7233_s12 + $0xff4] ss:$8 sps:$4 sm:$0xff]   ;;  %v6755_v55 = vld [vmem:[%s7233_s12 + $0xef0] ss:$8 sps:$4 sm:$0xff]  }
 0x1ec   : > { %4845 = vmatprep.subr.bf16.mxu1 %v6690_v14  ;;  %v6758_v14 = vld [vmem:[%s7233_s12 + $0xff0] ss:$8 sps:$4 sm:$0xff]  }
 0x1ee   : > { %4805 = vmatpush2.bf16.msra.mxu0 %v6685_v57  ;;  %v6763_v57 = vld [vmem:[%s7233_s12 + $0xee4] ss:$8 sps:$4 sm:$0xff]  }
 0x1ef   : > { %4846 = vmatpush2.bf16.msra.mxu1 %v6688_v58  ;;  %4806 = vmatprep.subr.bf16.mxu0 %v6693_v15  ;;  %v6766_v58 = vld [vmem:[%s7233_s12 + $0xfe4] ss:$8 sps:$4 sm:$0xff]   ;;  %v6761_v15 = vld [vmem:[%s7233_s12 + $0xee0] ss:$8 sps:$4 sm:$0xff]  }
 0x1f0   : > { %4847 = vmatprep.subr.bf16.mxu1 %v6696_v16  ;;  %v6764_v16 = vld [vmem:[%s7233_s12 + $0xfe0] ss:$8 sps:$4 sm:$0xff]  }
 0x1f2   : > { %4807 = vmatpush2.bf16.msra.mxu0 %v6691_v17  ;;  %v6769_v17 = vld [vmem:[%s7233_s12 + $0xed4] ss:$8 sps:$4 sm:$0xff]  }
 0x1f3   : > { %4848 = vmatpush2.bf16.msra.mxu1 %v6694_v20  ;;  %4808 = vmatprep.subr.bf16.mxu0 %v6699_v22  ;;  %v6772_v20 = vld [vmem:[%s7233_s12 + $0xfd4] ss:$8 sps:$4 sm:$0xff]   ;;  %v6767_v22 = vld [vmem:[%s7233_s12 + $0xed0] ss:$8 sps:$4 sm:$0xff]  }
 0x1f4   : > { %4849 = vmatprep.subr.bf16.mxu1 %v6702_v23  ;;  %v6770_v23 = vld [vmem:[%s7233_s12 + $0xfd0] ss:$8 sps:$4 sm:$0xff]  }
 0x1f6   : > { %4809 = vmatpush2.bf16.msra.mxu0 %v6697_v25  ;;  %v6775_v25 = vld [vmem:[%s7233_s12 + $0xec4] ss:$8 sps:$4 sm:$0xff]  }
 0x1f7   : > { %4850 = vmatpush2.bf16.msra.mxu1 %v6700_v26  ;;  %4860 = vmatprep.subr.bf16.mxu0 %v6709_v27  ;;  %v6778_v26 = vld [vmem:[%s7233_s12 + $0xfc4] ss:$8 sps:$4 sm:$0xff]   ;;  %v6773_v27 = vld [vmem:[%s7233_s12 + $0xec0] ss:$8 sps:$4 sm:$0xff]  }
 0x1f8   : > { %4901 = vmatprep.subr.bf16.mxu1 %v6712_v19  ;;  %v6776_v19 = vld [vmem:[%s7233_s12 + $0xfc0] ss:$8 sps:$4 sm:$0xff]  }
 0x1f9   : > { %v4566_v37 = vpop.f32.mrf.mxu0  ;;  %4811 = vmatmul.mubr.bf16.vlgmr.msra.gmra.mxu0 %v5282_v6  ;;  %v6781_v6 = vld [vmem:[%s7233_s12 + $0xeb4] ss:$8 sps:$4 sm:$0xff]  }
 0x1fa   : > { %v4607_v21 = vpop.f32.mrf.mxu1  ;;  %4852 = vmatmul.mubr.bf16.vlgmr.msra.gmra.mxu1 %v5284_v28  ;;  %v4567_v24 = vadd.f32 %v4566_v37, %v7761_v18  ;;  %4861 = vmatpush1.bf16.msra.mxu0 %v6707_v32  ;;  %v6784_v28 = vld [vmem:[%s7233_s12 + $0xfb4] ss:$8 sps:$4 sm:$0xff]   ;;  %v6779_v32 = vld [vmem:[%s7233_s12 + $0xeb0] ss:$8 sps:$4 sm:$0xff]  }
 0x1fb   : > { %4902 = vmatpush1.bf16.msra.mxu1 %v6710_v33  ;;  %v4568_v40 = vpop.f32.mrf.mxu0  ;;  %4862 = vmatprep.subr.bf16.mxu0 %v6715_v12  ;;  %v6782_v33 = vld [vmem:[%s7233_s12 + $0xfb0] ss:$8 sps:$4 sm:$0xff]   ;;  %v6787_v12 = vld [vmem:[%s7233_s12 + $0xea4] ss:$8 sps:$4 sm:$0xff]   ;;  %v6793_v37 = vld [vmem:[%s7233_s12 + $0xe94] ss:$8 sps:$4 sm:$0xff]  }
 0x1fc   : > { %v4609_v41 = vpop.f32.mrf.mxu1  ;;  %4903 = vmatprep.subr.bf16.mxu1 %v6718_v13  ;;  %v7849_v44 = vadd.f32 %v4607_v21, %v4567_v24  ;;  %v4569_v45 = vadd.f32 %v4568_v40, %v7764_v29  ;;  %4892 = vmatprep.mubr.bf16.mxu0 %v5287_v11  ;;  %v6727_v29 = vld [vmem:[%s7233_s12 + $0xe44] ss:$8 sps:$4 sm:$0xff]   ;;  %v6785_v11 = vld [vmem:[%s7233_s12 + $0xea0] ss:$8 sps:$4 sm:$0xff]   ;;  %v6796_v21 = vld [vmem:[%s7233_s12 + $0xf94] ss:$8 sps:$4 sm:$0xff]  }
 0x1fd   : > { %4933 = vmatprep.mubr.bf16.mxu1 %v5289_v36  ;;  %v4570_v18 = vpop.f32.mrf.mxu0  ;;  %v6790_v13 = vld [vmem:[%s7233_s12 + $0xfa4] ss:$8 sps:$4 sm:$0xff]   ;;  %v6788_v36 = vld [vmem:[%s7233_s12 + $0xfa0] ss:$8 sps:$4 sm:$0xff]   ;;  %v6791_v24 = vld [vmem:[%s7233_s12 + $0xe90] ss:$8 sps:$4 sm:$0xff]  }
 0x1fe   : > { %v4611_v46 = vpop.f32.mrf.mxu1  ;;  %v7852_v47 = vadd.f32 %v4609_v41, %v4569_v45  ;;  %4863 = vmatpush1.bf16.msra.mxu0 %v6713_v38  ;;  %v6794_v38 = vld [vmem:[%s7233_s12 + $0xf90] ss:$8 sps:$4 sm:$0xff]   ;;  %v6802_v40 = vld [vmem:[%s7233_s12 + $0xf84] ss:$8 sps:$4 sm:$0xff]   ;;  %v6797_v41 = vld [vmem:[%s7233_s12 + $0xe80] ss:$8 sps:$4 sm:$0xff]   ;;  %v5286_v18 = vcombine.low %v7829_v30, %v7829_v30 }
 0x1ff   : > { %4904 = vmatpush1.bf16.msra.mxu1 %v6716_v39  ;;  %v4571_v51 = vpop.f32.mrf.mxu0  ;;  %4864 = vmatprep.subr.bf16.mxu0 %v6721_v42  ;;  %v6799_v39 = vld [vmem:[%s7233_s12 + $0xe84] ss:$8 sps:$4 sm:$0xff]   ;;  %v6800_v42 = vld [vmem:[%s7233_s12 + $0xf80] ss:$8 sps:$4 sm:$0xff]   ;;  %v6812_v45 = vld [vmem:[%s7233_s12 + $0x1174] ss:$8 sps:$4 sm:$0xff]   ;;  %v5288_v46 = vcombine.low %v7834_v31, %v7834_v31 }
 0x200   : > { %v4612_v52 = vpop.f32.mrf.mxu1  ;;  %4905 = vmatprep.subr.bf16.mxu1 %v6724_v43  ;;  %v6809_v43 = vld [vmem:[%s7233_s12 + $0x1074] ss:$8 sps:$4 sm:$0xff]   ;;  %v6807_v51 = vld [vmem:[%s7233_s12 + $0x1070] ss:$8 sps:$4 sm:$0xff]   ;;  %v6815_v30 = vld [vmem:[%s7233_s12 + $0x1064] ss:$8 sps:$4 sm:$0xff]  }
 0x201   : > { %v6810_v52 = vld [vmem:[%s7233_s12 + $0x1170] ss:$8 sps:$4 sm:$0xff]   ;;  %v6818_v31 = vld [vmem:[%s7233_s12 + $0x1164] ss:$8 sps:$4 sm:$0xff]  }
 0x202   : > { %4865 = vmatpush1.bf16.msra.mxu0 %v6719_v48  ;;  %v7917_v48 = vld [vmem:[%s8112_s0 + $0x80] sm:$0xff] }
 0x203   : > { %4906 = vmatpush1.bf16.msra.mxu1 %v6722_v49  ;;  %4866 = vmatprep.subr.bf16.mxu0 %v6727_v29  ;;  %v7922_v49 = vld [vmem:[%s8112_s0 + $0x88] sm:$0xff]  ;;  %v5291_v29 = vcombine.high %v7917_v48, %v7917_v48 }
 0x204   : > { %4907 = vmatprep.subr.bf16.mxu1 %v6730_v53  ;;  %v5293_v53 = vcombine.high %v7922_v49, %v7922_v49 }
 0x206   : > { %4867 = vmatpush1.bf16.msra.mxu0 %v6725_v54 }
 0x207   : > { %4908 = vmatpush1.bf16.msra.mxu1 %v6728_v56  ;;  %4868 = vmatprep.subr.bf16.mxu0 %v6733_v59 }
 0x208   : > { %4909 = vmatprep.subr.bf16.mxu1 %v6736_v60  ;;  %v6813_v60 = vld [vmem:[%s7233_s12 + $0x1060] ss:$8 sps:$4 sm:$0xff]  }
 0x20a   : > { %4869 = vmatpush1.bf16.msra.mxu0 %v6731_v34  ;;  %v6816_v34 = vld [vmem:[%s7233_s12 + $0x1160] ss:$8 sps:$4 sm:$0xff]  }
 0x20b   : > { %4910 = vmatpush1.bf16.msra.mxu1 %v6734_v35  ;;  %4870 = vmatprep.subr.bf16.mxu0 %v6739_v61 }
 0x20c   : > { %4911 = vmatprep.subr.bf16.mxu1 %v6742_v62  ;;  %v6821_v62 = vld [vmem:[%s7233_s12 + $0x1054] ss:$8 sps:$4 sm:$0xff]  }
 0x20e   : > { %4871 = vmatpush1.bf16.msra.mxu0 %v6737_v63  ;;  %v6824_v63 = vld [vmem:[%s7233_s12 + $0x1154] ss:$8 sps:$4 sm:$0xff]  }
 0x20f   : > { %4912 = vmatpush1.bf16.msra.mxu1 %v6740_v0  ;;  %4872 = vmatprep.subr.bf16.mxu0 %v6745_v1 }
 0x210   : > { %4913 = vmatprep.subr.bf16.mxu1 %v6748_v2 }
 0x212   : > { %4873 = vmatpush1.bf16.msra.mxu0 %v6743_v3 }
 0x213   : > { %4914 = vmatpush1.bf16.msra.mxu1 %v6746_v4  ;;  %4874 = vmatprep.subr.bf16.mxu0 %v6751_v5  ;;  %v6819_v4 = vld [vmem:[%s7233_s12 + $0x1050] ss:$8 sps:$4 sm:$0xff]  }
 0x214   : > { %4915 = vmatprep.subr.bf16.mxu1 %v6754_v7  ;;  %v6822_v5 = vld [vmem:[%s7233_s12 + $0x1150] ss:$8 sps:$4 sm:$0xff]  }
 0x216   : > { %4875 = vmatpush1.bf16.msra.mxu0 %v6749_v8 }
 0x217   : > { %4916 = vmatpush1.bf16.msra.mxu1 %v6752_v9  ;;  %4876 = vmatprep.subr.bf16.mxu0 %v6757_v50  ;;  %v6830_v9 = vld [vmem:[%s7233_s12 + $0x1144] ss:$8 sps:$4 sm:$0xff]   ;;  %v6825_v50 = vld [vmem:[%s7233_s12 + $0x1040] ss:$8 sps:$4 sm:$0xff]  }
 0x218   : > { %4917 = vmatprep.subr.bf16.mxu1 %v6760_v10  ;;  %v6828_v10 = vld [vmem:[%s7233_s12 + $0x1140] ss:$8 sps:$4 sm:$0xff]  }
 0x21a   : > { %4877 = vmatpush2.bf16.msra.mxu0 %v6755_v55  ;;  %v6833_v55 = vld [vmem:[%s7233_s12 + $0x1034] ss:$8 sps:$4 sm:$0xff]  }
 0x21b   : > { %4918 = vmatpush2.bf16.msra.mxu1 %v6758_v14  ;;  %4878 = vmatprep.subr.bf16.mxu0 %v6763_v57  ;;  %v6836_v14 = vld [vmem:[%s7233_s12 + $0x1134] ss:$8 sps:$4 sm:$0xff]   ;;  %v6831_v57 = vld [vmem:[%s7233_s12 + $0x1030] ss:$8 sps:$4 sm:$0xff]  }
 0x21c   : > { %4919 = vmatprep.subr.bf16.mxu1 %v6766_v58  ;;  %v6834_v58 = vld [vmem:[%s7233_s12 + $0x1130] ss:$8 sps:$4 sm:$0xff]  }
 0x21e   : > { %4879 = vmatpush2.bf16.msra.mxu0 %v6761_v15  ;;  %v6839_v15 = vld [vmem:[%s7233_s12 + $0x1024] ss:$8 sps:$4 sm:$0xff]  }
 0x21f   : > { %4920 = vmatpush2.bf16.msra.mxu1 %v6764_v16  ;;  %4880 = vmatprep.subr.bf16.mxu0 %v6769_v17  ;;  %v6842_v16 = vld [vmem:[%s7233_s12 + $0x1124] ss:$8 sps:$4 sm:$0xff]   ;;  %v6837_v17 = vld [vmem:[%s7233_s12 + $0x1020] ss:$8 sps:$4 sm:$0xff]  }
 0x220   : > { %4921 = vmatprep.subr.bf16.mxu1 %v6772_v20  ;;  %v6840_v20 = vld [vmem:[%s7233_s12 + $0x1120] ss:$8 sps:$4 sm:$0xff]  }
 0x222   : > { %4881 = vmatpush2.bf16.msra.mxu0 %v6767_v22  ;;  %v6845_v22 = vld [vmem:[%s7233_s12 + $0x1014] ss:$8 sps:$4 sm:$0xff]  }
 0x223   : > { %4922 = vmatpush2.bf16.msra.mxu1 %v6770_v23  ;;  %4882 = vmatprep.subr.bf16.mxu0 %v6775_v25  ;;  %v6848_v23 = vld [vmem:[%s7233_s12 + $0x1114] ss:$8 sps:$4 sm:$0xff]   ;;  %v6843_v25 = vld [vmem:[%s7233_s12 + $0x1010] ss:$8 sps:$4 sm:$0xff]  }
 0x224   : > { %4923 = vmatprep.subr.bf16.mxu1 %v6778_v26  ;;  %v6846_v26 = vld [vmem:[%s7233_s12 + $0x1110] ss:$8 sps:$4 sm:$0xff]  }
 0x226   : > { %4883 = vmatpush2.bf16.msra.mxu0 %v6773_v27  ;;  %v6851_v27 = vld [vmem:[%s7233_s12 + $0x1004] ss:$8 sps:$4 sm:$0xff]  }
 0x227   : > { %4924 = vmatpush2.bf16.msra.mxu1 %v6776_v19  ;;  %4884 = vmatprep.subr.bf16.mxu0 %v6781_v6  ;;  %v6854_v19 = vld [vmem:[%s7233_s12 + $0x1104] ss:$8 sps:$4 sm:$0xff]   ;;  %v6849_v6 = vld [vmem:[%s7233_s12 + $0x1000] ss:$8 sps:$4 sm:$0xff]  }
 0x228   : > { %4925 = vmatprep.subr.bf16.mxu1 %v6784_v28  ;;  %v6852_v28 = vld [vmem:[%s7233_s12 + $0x1100] ss:$8 sps:$4 sm:$0xff]  }
 0x22a   : > { %4885 = vmatpush2.bf16.msra.mxu0 %v6779_v32  ;;  %v6857_v32 = vld [vmem:[%s7233_s12 + $0x10f4] ss:$8 sps:$4 sm:$0xff]  }
 0x22b   : > { %4926 = vmatpush2.bf16.msra.mxu1 %v6782_v33  ;;  %4886 = vmatprep.subr.bf16.mxu0 %v6787_v12  ;;  %v6860_v33 = vld [vmem:[%s7233_s12 + $0x11f4] ss:$8 sps:$4 sm:$0xff]   ;;  %v6855_v12 = vld [vmem:[%s7233_s12 + $0x10f0] ss:$8 sps:$4 sm:$0xff]  }
 0x22c   : > { %4927 = vmatprep.subr.bf16.mxu1 %v6790_v13  ;;  %v6858_v13 = vld [vmem:[%s7233_s12 + $0x11f0] ss:$8 sps:$4 sm:$0xff]  }
 0x22e   : > { %4887 = vmatpush2.bf16.msra.mxu0 %v6785_v11  ;;  %v6863_v11 = vld [vmem:[%s7233_s12 + $0x10e4] ss:$8 sps:$4 sm:$0xff]  }
 0x22f   : > { %4928 = vmatpush2.bf16.msra.mxu1 %v6788_v36  ;;  %4888 = vmatprep.subr.bf16.mxu0 %v6793_v37  ;;  %v6866_v36 = vld [vmem:[%s7233_s12 + $0x11e4] ss:$8 sps:$4 sm:$0xff]   ;;  %v6861_v37 = vld [vmem:[%s7233_s12 + $0x10e0] ss:$8 sps:$4 sm:$0xff]  }
 0x230   : > { %4929 = vmatprep.subr.bf16.mxu1 %v6796_v21  ;;  %v6864_v21 = vld [vmem:[%s7233_s12 + $0x11e0] ss:$8 sps:$4 sm:$0xff]  }
 0x232   : > { %4889 = vmatpush2.bf16.msra.mxu0 %v6791_v24  ;;  %v6869_v24 = vld [vmem:[%s7233_s12 + $0x10d4] ss:$8 sps:$4 sm:$0xff]  }
 0x233   : > { %4930 = vmatpush2.bf16.msra.mxu1 %v6794_v38  ;;  %4890 = vmatprep.subr.bf16.mxu0 %v6799_v39  ;;  %v6872_v38 = vld [vmem:[%s7233_s12 + $0x11d4] ss:$8 sps:$4 sm:$0xff]   ;;  %v6867_v39 = vld [vmem:[%s7233_s12 + $0x10d0] ss:$8 sps:$4 sm:$0xff]  }
 0x234   : > { %4931 = vmatprep.subr.bf16.mxu1 %v6802_v40  ;;  %v6870_v40 = vld [vmem:[%s7233_s12 + $0x11d0] ss:$8 sps:$4 sm:$0xff]  }
 0x236   : > { %4891 = vmatpush2.bf16.msra.mxu0 %v6797_v41  ;;  %v6875_v41 = vld [vmem:[%s7233_s12 + $0x10c4] ss:$8 sps:$4 sm:$0xff]  }
 0x237   : > { %4932 = vmatpush2.bf16.msra.mxu1 %v6800_v42  ;;  %4942 = vmatprep.subr.bf16.mxu0 %v6809_v43  ;;  %v6878_v42 = vld [vmem:[%s7233_s12 + $0x11c4] ss:$8 sps:$4 sm:$0xff]   ;;  %v6873_v43 = vld [vmem:[%s7233_s12 + $0x10c0] ss:$8 sps:$4 sm:$0xff]  }
 0x238   : > { %4983 = vmatprep.subr.bf16.mxu1 %v6812_v45  ;;  %v6876_v45 = vld [vmem:[%s7233_s12 + $0x11c0] ss:$8 sps:$4 sm:$0xff]  }
 0x239   : > { %v4648_v54 = vpop.f32.mrf.mxu0  ;;  %4893 = vmatmul.mubr.bf16.vlgmr.msra.gmra.mxu0 %v5286_v18  ;;  %v6881_v18 = vld [vmem:[%s7233_s12 + $0x10b4] ss:$8 sps:$4 sm:$0xff]  }
 0x23a   : > { %v4689_v56 = vpop.f32.mrf.mxu1  ;;  %4934 = vmatmul.mubr.bf16.vlgmr.msra.gmra.mxu1 %v5288_v46  ;;  %v4649_v59 = vadd.f32 %v4648_v54, %v7849_v44  ;;  %4943 = vmatpush1.bf16.msra.mxu0 %v6807_v51  ;;  %v6884_v46 = vld [vmem:[%s7233_s12 + $0x11b4] ss:$8 sps:$4 sm:$0xff]   ;;  %v6879_v51 = vld [vmem:[%s7233_s12 + $0x10b0] ss:$8 sps:$4 sm:$0xff]  }
 0x23b   : > { %4984 = vmatpush1.bf16.msra.mxu1 %v6810_v52  ;;  %v4650_v35 = vpop.f32.mrf.mxu0  ;;  %4944 = vmatprep.subr.bf16.mxu0 %v6815_v30  ;;  %v6882_v52 = vld [vmem:[%s7233_s12 + $0x11b0] ss:$8 sps:$4 sm:$0xff]   ;;  %v6887_v30 = vld [vmem:[%s7233_s12 + $0x10a4] ss:$8 sps:$4 sm:$0xff]   ;;  %v6893_v54 = vld [vmem:[%s7233_s12 + $0x1094] ss:$8 sps:$4 sm:$0xff]  }
 0x23c   : > { %v4691_v61 = vpop.f32.mrf.mxu1  ;;  %4985 = vmatprep.subr.bf16.mxu1 %v6818_v31  ;;  %v7937_v0 = vadd.f32 %v4689_v56, %v4649_v59  ;;  %v4651_v1 = vadd.f32 %v4650_v35, %v7852_v47  ;;  %4974 = vmatprep.mubr.bf16.mxu0 %v5291_v29  ;;  %v6827_v47 = vld [vmem:[%s7233_s12 + $0x1044] ss:$8 sps:$4 sm:$0xff]   ;;  %v6885_v29 = vld [vmem:[%s7233_s12 + $0x10a0] ss:$8 sps:$4 sm:$0xff]   ;;  %v6896_v56 = vld [vmem:[%s7233_s12 + $0x1194] ss:$8 sps:$4 sm:$0xff]  }
 0x23d   : > { %5015 = vmatprep.mubr.bf16.mxu1 %v5293_v53  ;;  %v4652_v44 = vpop.f32.mrf.mxu0  ;;  %v6890_v31 = vld [vmem:[%s7233_s12 + $0x11a4] ss:$8 sps:$4 sm:$0xff]   ;;  %v6888_v53 = vld [vmem:[%s7233_s12 + $0x11a0] ss:$8 sps:$4 sm:$0xff]   ;;  %v6891_v59 = vld [vmem:[%s7233_s12 + $0x1090] ss:$8 sps:$4 sm:$0xff]  }
 0x23e   : > { %v4693_v2 = vpop.f32.mrf.mxu1  ;;  %v7940_v3 = vadd.f32 %v4691_v61, %v4651_v1  ;;  %4945 = vmatpush1.bf16.msra.mxu0 %v6813_v60  ;;  %v6894_v60 = vld [vmem:[%s7233_s12 + $0x1190] ss:$8 sps:$4 sm:$0xff]   ;;  %v6902_v35 = vld [vmem:[%s7233_s12 + $0x1184] ss:$8 sps:$4 sm:$0xff]   ;;  %v6897_v61 = vld [vmem:[%s7233_s12 + $0x1080] ss:$8 sps:$4 sm:$0xff]   ;;  %v5290_v44 = vcombine.low %v7917_v48, %v7917_v48 }
 0x23f   : > { %4986 = vmatpush1.bf16.msra.mxu1 %v6816_v34  ;;  %v4653_v7 = vpop.f32.mrf.mxu0  ;;  %4946 = vmatprep.subr.bf16.mxu0 %v6821_v62  ;;  %v6899_v34 = vld [vmem:[%s7233_s12 + $0x1084] ss:$8 sps:$4 sm:$0xff]   ;;  %v6900_v62 = vld [vmem:[%s7233_s12 + $0x1180] ss:$8 sps:$4 sm:$0xff]   ;;  %v6912_v1 = vld [vmem:[%s7233_s12 + $0x1374] ss:$8 sps:$4 sm:$0xff]   ;;  %v5292_v2 = vcombine.low %v7922_v49, %v7922_v49 }
 0x240   : > { %v4694_v8 = vpop.f32.mrf.mxu1  ;;  %4987 = vmatprep.subr.bf16.mxu1 %v6824_v63  ;;  %v6909_v63 = vld [vmem:[%s7233_s12 + $0x1274] ss:$8 sps:$4 sm:$0xff]   ;;  %v6907_v7 = vld [vmem:[%s7233_s12 + $0x1270] ss:$8 sps:$4 sm:$0xff]   ;;  %v6915_v48 = vld [vmem:[%s7233_s12 + $0x1264] ss:$8 sps:$4 sm:$0xff]  }
 0x241   : > { %v6910_v8 = vld [vmem:[%s7233_s12 + $0x1370] ss:$8 sps:$4 sm:$0xff]   ;;  %v6918_v49 = vld [vmem:[%s7233_s12 + $0x1364] ss:$8 sps:$4 sm:$0xff]  }
 0x242   : > { %4947 = vmatpush1.bf16.msra.mxu0 %v6819_v4  ;;  %v8005_v4 = vld [vmem:[%s8112_s0 + $0x90] sm:$0xff] }
 0x243   : > { %4988 = vmatpush1.bf16.msra.mxu1 %v6822_v5  ;;  %4948 = vmatprep.subr.bf16.mxu0 %v6827_v47  ;;  %v8010_v5 = vld [vmem:[%s8112_s0 + $0x98] sm:$0xff]  ;;  %v5295_v47 = vcombine.high %v8005_v4, %v8005_v4 }
 0x244   : > { %4989 = vmatprep.subr.bf16.mxu1 %v6830_v9  ;;  %v5297_v9 = vcombine.high %v8010_v5, %v8010_v5 }
 0x246   : > { %4949 = vmatpush1.bf16.msra.mxu0 %v6825_v50 }
 0x247   : > { %4990 = vmatpush1.bf16.msra.mxu1 %v6828_v10  ;;  %4950 = vmatprep.subr.bf16.mxu0 %v6833_v55 }
 0x248   : > { %4991 = vmatprep.subr.bf16.mxu1 %v6836_v14  ;;  %v6913_v14 = vld [vmem:[%s7233_s12 + $0x1260] ss:$8 sps:$4 sm:$0xff]  }
 0x24a   : > { %4951 = vmatpush1.bf16.msra.mxu0 %v6831_v57  ;;  %v6916_v57 = vld [vmem:[%s7233_s12 + $0x1360] ss:$8 sps:$4 sm:$0xff]  }
 0x24b   : > { %4992 = vmatpush1.bf16.msra.mxu1 %v6834_v58  ;;  %4952 = vmatprep.subr.bf16.mxu0 %v6839_v15 }
 0x24c   : > { %4993 = vmatprep.subr.bf16.mxu1 %v6842_v16  ;;  %v6921_v16 = vld [vmem:[%s7233_s12 + $0x1254] ss:$8 sps:$4 sm:$0xff]  }
 0x24e   : > { %4953 = vmatpush1.bf16.msra.mxu0 %v6837_v17  ;;  %v6924_v17 = vld [vmem:[%s7233_s12 + $0x1354] ss:$8 sps:$4 sm:$0xff]  }
 0x24f   : > { %4994 = vmatpush1.bf16.msra.mxu1 %v6840_v20  ;;  %4954 = vmatprep.subr.bf16.mxu0 %v6845_v22 }
 0x250   : > { %4995 = vmatprep.subr.bf16.mxu1 %v6848_v23 }
 0x252   : > { %4955 = vmatpush1.bf16.msra.mxu0 %v6843_v25 }
 0x253   : > { %4996 = vmatpush1.bf16.msra.mxu1 %v6846_v26  ;;  %4956 = vmatprep.subr.bf16.mxu0 %v6851_v27  ;;  %v6919_v26 = vld [vmem:[%s7233_s12 + $0x1250] ss:$8 sps:$4 sm:$0xff]  }
 0x254   : > { %4997 = vmatprep.subr.bf16.mxu1 %v6854_v19  ;;  %v6922_v27 = vld [vmem:[%s7233_s12 + $0x1350] ss:$8 sps:$4 sm:$0xff]  }
 0x256   : > { %4957 = vmatpush1.bf16.msra.mxu0 %v6849_v6 }
 0x257   : > { %4998 = vmatpush1.bf16.msra.mxu1 %v6852_v28  ;;  %4958 = vmatprep.subr.bf16.mxu0 %v6857_v32  ;;  %v6930_v28 = vld [vmem:[%s7233_s12 + $0x1344] ss:$8 sps:$4 sm:$0xff]   ;;  %v6925_v32 = vld [vmem:[%s7233_s12 + $0x1240] ss:$8 sps:$4 sm:$0xff]  }
 0x258   : > { %4999 = vmatprep.subr.bf16.mxu1 %v6860_v33  ;;  %v6928_v33 = vld [vmem:[%s7233_s12 + $0x1340] ss:$8 sps:$4 sm:$0xff]  }
 0x25a   : > { %4959 = vmatpush2.bf16.msra.mxu0 %v6855_v12  ;;  %v6933_v12 = vld [vmem:[%s7233_s12 + $0x1234] ss:$8 sps:$4 sm:$0xff]  }
 0x25b   : > { %5000 = vmatpush2.bf16.msra.mxu1 %v6858_v13  ;;  %4960 = vmatprep.subr.bf16.mxu0 %v6863_v11  ;;  %v6936_v13 = vld [vmem:[%s7233_s12 + $0x1334] ss:$8 sps:$4 sm:$0xff]   ;;  %v6931_v11 = vld [vmem:[%s7233_s12 + $0x1230] ss:$8 sps:$4 sm:$0xff]  }
 0x25c   : > { %5001 = vmatprep.subr.bf16.mxu1 %v6866_v36  ;;  %v6934_v36 = vld [vmem:[%s7233_s12 + $0x1330] ss:$8 sps:$4 sm:$0xff]  }
 0x25e   : > { %4961 = vmatpush2.bf16.msra.mxu0 %v6861_v37  ;;  %v6939_v37 = vld [vmem:[%s7233_s12 + $0x1224] ss:$8 sps:$4 sm:$0xff]  }
 0x25f   : > { %5002 = vmatpush2.bf16.msra.mxu1 %v6864_v21  ;;  %4962 = vmatprep.subr.bf16.mxu0 %v6869_v24  ;;  %v6942_v21 = vld [vmem:[%s7233_s12 + $0x1324] ss:$8 sps:$4 sm:$0xff]   ;;  %v6937_v24 = vld [vmem:[%s7233_s12 + $0x1220] ss:$8 sps:$4 sm:$0xff]  }
 0x260   : > { %5003 = vmatprep.subr.bf16.mxu1 %v6872_v38  ;;  %v6940_v38 = vld [vmem:[%s7233_s12 + $0x1320] ss:$8 sps:$4 sm:$0xff]  }
 0x262   : > { %4963 = vmatpush2.bf16.msra.mxu0 %v6867_v39  ;;  %v6945_v39 = vld [vmem:[%s7233_s12 + $0x1214] ss:$8 sps:$4 sm:$0xff]  }
 0x263   : > { %5004 = vmatpush2.bf16.msra.mxu1 %v6870_v40  ;;  %4964 = vmatprep.subr.bf16.mxu0 %v6875_v41  ;;  %v6948_v40 = vld [vmem:[%s7233_s12 + $0x1314] ss:$8 sps:$4 sm:$0xff]   ;;  %v6943_v41 = vld [vmem:[%s7233_s12 + $0x1210] ss:$8 sps:$4 sm:$0xff]  }
 0x264   : > { %5005 = vmatprep.subr.bf16.mxu1 %v6878_v42  ;;  %v6946_v42 = vld [vmem:[%s7233_s12 + $0x1310] ss:$8 sps:$4 sm:$0xff]  }
 0x266   : > { %4965 = vmatpush2.bf16.msra.mxu0 %v6873_v43  ;;  %v6951_v43 = vld [vmem:[%s7233_s12 + $0x1204] ss:$8 sps:$4 sm:$0xff]  }
 0x267   : > { %5006 = vmatpush2.bf16.msra.mxu1 %v6876_v45  ;;  %4966 = vmatprep.subr.bf16.mxu0 %v6881_v18  ;;  %v6954_v45 = vld [vmem:[%s7233_s12 + $0x1304] ss:$8 sps:$4 sm:$0xff]   ;;  %v6949_v18 = vld [vmem:[%s7233_s12 + $0x1200] ss:$8 sps:$4 sm:$0xff]  }
 0x268   : > { %5007 = vmatprep.subr.bf16.mxu1 %v6884_v46  ;;  %v6952_v46 = vld [vmem:[%s7233_s12 + $0x1300] ss:$8 sps:$4 sm:$0xff]  }
 0x26a   : > { %4967 = vmatpush2.bf16.msra.mxu0 %v6879_v51  ;;  %v6957_v51 = vld [vmem:[%s7233_s12 + $0x12f4] ss:$8 sps:$4 sm:$0xff]  }
 0x26b   : > { %5008 = vmatpush2.bf16.msra.mxu1 %v6882_v52  ;;  %4968 = vmatprep.subr.bf16.mxu0 %v6887_v30  ;;  %v6960_v52 = vld [vmem:[%s7233_s12 + $0x13f4] ss:$8 sps:$4 sm:$0xff]   ;;  %v6955_v30 = vld [vmem:[%s7233_s12 + $0x12f0] ss:$8 sps:$4 sm:$0xff]  }
 0x26c   : > { %5009 = vmatprep.subr.bf16.mxu1 %v6890_v31  ;;  %v6958_v31 = vld [vmem:[%s7233_s12 + $0x13f0] ss:$8 sps:$4 sm:$0xff]  }
 0x26e   : > { %4969 = vmatpush2.bf16.msra.mxu0 %v6885_v29  ;;  %v6963_v29 = vld [vmem:[%s7233_s12 + $0x12e4] ss:$8 sps:$4 sm:$0xff]  }
 0x26f   : > { %5010 = vmatpush2.bf16.msra.mxu1 %v6888_v53  ;;  %4970 = vmatprep.subr.bf16.mxu0 %v6893_v54  ;;  %v6966_v53 = vld [vmem:[%s7233_s12 + $0x13e4] ss:$8 sps:$4 sm:$0xff]   ;;  %v6961_v54 = vld [vmem:[%s7233_s12 + $0x12e0] ss:$8 sps:$4 sm:$0xff]  }
 0x270   : > { %5011 = vmatprep.subr.bf16.mxu1 %v6896_v56  ;;  %v6964_v56 = vld [vmem:[%s7233_s12 + $0x13e0] ss:$8 sps:$4 sm:$0xff]  }
 0x272   : > { %4971 = vmatpush2.bf16.msra.mxu0 %v6891_v59  ;;  %v6969_v59 = vld [vmem:[%s7233_s12 + $0x12d4] ss:$8 sps:$4 sm:$0xff]  }
 0x273   : > { %5012 = vmatpush2.bf16.msra.mxu1 %v6894_v60  ;;  %4972 = vmatprep.subr.bf16.mxu0 %v6899_v34  ;;  %v6972_v60 = vld [vmem:[%s7233_s12 + $0x13d4] ss:$8 sps:$4 sm:$0xff]   ;;  %v6967_v34 = vld [vmem:[%s7233_s12 + $0x12d0] ss:$8 sps:$4 sm:$0xff]  }
 0x274   : > { %5013 = vmatprep.subr.bf16.mxu1 %v6902_v35  ;;  %v6970_v35 = vld [vmem:[%s7233_s12 + $0x13d0] ss:$8 sps:$4 sm:$0xff]  }
 0x276   : > { %4973 = vmatpush2.bf16.msra.mxu0 %v6897_v61  ;;  %v6975_v61 = vld [vmem:[%s7233_s12 + $0x12c4] ss:$8 sps:$4 sm:$0xff]  }
 0x277   : > { %5014 = vmatpush2.bf16.msra.mxu1 %v6900_v62  ;;  %5024 = vmatprep.subr.bf16.mxu0 %v6909_v63  ;;  %v6978_v62 = vld [vmem:[%s7233_s12 + $0x13c4] ss:$8 sps:$4 sm:$0xff]   ;;  %v6973_v63 = vld [vmem:[%s7233_s12 + $0x12c0] ss:$8 sps:$4 sm:$0xff]  }
 0x278   : > { %5065 = vmatprep.subr.bf16.mxu1 %v6912_v1  ;;  %v6976_v1 = vld [vmem:[%s7233_s12 + $0x13c0] ss:$8 sps:$4 sm:$0xff]  }
 0x279   : > { %v4730_v50 = vpop.f32.mrf.mxu0  ;;  %4975 = vmatmul.mubr.bf16.vlgmr.msra.gmra.mxu0 %v5290_v44  ;;  %v6981_v44 = vld [vmem:[%s7233_s12 + $0x12b4] ss:$8 sps:$4 sm:$0xff]  }
 0x27a   : > { %v4771_v10 = vpop.f32.mrf.mxu1  ;;  %5016 = vmatmul.mubr.bf16.vlgmr.msra.gmra.mxu1 %v5292_v2  ;;  %v4731_v55 = vadd.f32 %v4730_v50, %v7937_v0  ;;  %5025 = vmatpush1.bf16.msra.mxu0 %v6907_v7  ;;  %v6984_v2 = vld [vmem:[%s7233_s12 + $0x13b4] ss:$8 sps:$4 sm:$0xff]   ;;  %v6979_v7 = vld [vmem:[%s7233_s12 + $0x12b0] ss:$8 sps:$4 sm:$0xff]  }
 0x27b   : > { %5066 = vmatpush1.bf16.msra.mxu1 %v6910_v8  ;;  %v4732_v58 = vpop.f32.mrf.mxu0  ;;  %5026 = vmatprep.subr.bf16.mxu0 %v6915_v48  ;;  %v6982_v8 = vld [vmem:[%s7233_s12 + $0x13b0] ss:$8 sps:$4 sm:$0xff]   ;;  %v6987_v48 = vld [vmem:[%s7233_s12 + $0x12a4] ss:$8 sps:$4 sm:$0xff]   ;;  %v6993_v50 = vld [vmem:[%s7233_s12 + $0x1294] ss:$8 sps:$4 sm:$0xff]  }
 0x27c   : > { %v4773_v15 = vpop.f32.mrf.mxu1  ;;  %5067 = vmatprep.subr.bf16.mxu1 %v6918_v49  ;;  %v8025_v20 = vadd.f32 %v4771_v10, %v4731_v55  ;;  %v4733_v22 = vadd.f32 %v4732_v58, %v7940_v3  ;;  %5056 = vmatprep.mubr.bf16.mxu0 %v5295_v47  ;;  %v6927_v3 = vld [vmem:[%s7233_s12 + $0x1244] ss:$8 sps:$4 sm:$0xff]   ;;  %v6985_v47 = vld [vmem:[%s7233_s12 + $0x12a0] ss:$8 sps:$4 sm:$0xff]   ;;  %v6996_v10 = vld [vmem:[%s7233_s12 + $0x1394] ss:$8 sps:$4 sm:$0xff]  }
 0x27d   : > { %5097 = vmatprep.mubr.bf16.mxu1 %v5297_v9  ;;  %v4734_v0 = vpop.f32.mrf.mxu0  ;;  %v6990_v49 = vld [vmem:[%s7233_s12 + $0x13a4] ss:$8 sps:$4 sm:$0xff]   ;;  %v6988_v9 = vld [vmem:[%s7233_s12 + $0x13a0] ss:$8 sps:$4 sm:$0xff]   ;;  %v6991_v55 = vld [vmem:[%s7233_s12 + $0x1290] ss:$8 sps:$4 sm:$0xff]  }
 0x27e   : > { %v4775_v23 = vpop.f32.mrf.mxu1  ;;  %v8028_v25 = vadd.f32 %v4773_v15, %v4733_v22  ;;  %5027 = vmatpush1.bf16.msra.mxu0 %v6913_v14  ;;  %v6994_v14 = vld [vmem:[%s7233_s12 + $0x1390] ss:$8 sps:$4 sm:$0xff]   ;;  %v7002_v58 = vld [vmem:[%s7233_s12 + $0x1384] ss:$8 sps:$4 sm:$0xff]   ;;  %v6997_v15 = vld [vmem:[%s7233_s12 + $0x1280] ss:$8 sps:$4 sm:$0xff]   ;;  %v5296_v22 = vcombine.low %v8010_v5, %v8010_v5 }
 0x27f   : > { %5068 = vmatpush1.bf16.msra.mxu1 %v6916_v57  ;;  %v4735_v19 = vpop.f32.mrf.mxu0  ;;  %5028 = vmatprep.subr.bf16.mxu0 %v6921_v16  ;;  %v6999_v57 = vld [vmem:[%s7233_s12 + $0x1284] ss:$8 sps:$4 sm:$0xff]   ;;  %v7000_v16 = vld [vmem:[%s7233_s12 + $0x1380] ss:$8 sps:$4 sm:$0xff]   ;;  %s5256_s12 = sshll.u32 %s7109_s15, 1 }
 0x280   : > { %v4776_v6 = vpop.f32.mrf.mxu1  ;;  %5069 = vmatprep.subr.bf16.mxu1 %v6924_v17  ;;  %v5294_v17 = vcombine.low %v8005_v4, %v8005_v4  ;;  %p267_p7 = scmp.lt.s32.totalorder %s5256_s12, 7 }
 0x282   : > { %5029 = vmatpush1.bf16.msra.mxu0 %v6919_v26  ;;  %s8127_s12 = smov (!%p267_p7, %s5256_s12), 7 }
 0x283   : > { %5070 = vmatpush1.bf16.msra.mxu1 %v6922_v27  ;;  %5030 = vmatprep.subr.bf16.mxu0 %v6927_v3  ;;  %s5257_s25 = sshll.u32 %s8127_s12, 3 }
 0x284   : > { %5071 = vmatprep.subr.bf16.mxu1 %v6930_v28  ;;  %s272_s15 = scalar_lea.vmem %s8115_s3, %s5257_s25 }
 0x286   : > { %5031 = vmatpush1.bf16.msra.mxu0 %v6925_v32 }
 0x287   : > { %5072 = vmatpush1.bf16.msra.mxu1 %v6928_v33  ;;  %5032 = vmatprep.subr.bf16.mxu0 %v6933_v12 }
 0x288   : > { %5073 = vmatprep.subr.bf16.mxu1 %v6936_v13 }
 0x28a   : > { %5033 = vmatpush1.bf16.msra.mxu0 %v6931_v11 }
 0x28b   : > { %5074 = vmatpush1.bf16.msra.mxu1 %v6934_v36  ;;  %5034 = vmatprep.subr.bf16.mxu0 %v6939_v37 }
 0x28c   : > { %5075 = vmatprep.subr.bf16.mxu1 %v6942_v21 }
 0x28e   : > { %5035 = vmatpush1.bf16.msra.mxu0 %v6937_v24 }
 0x28f   : > { %5076 = vmatpush1.bf16.msra.mxu1 %v6940_v38  ;;  %5036 = vmatprep.subr.bf16.mxu0 %v6945_v39 }
 0x290   : > { %5077 = vmatprep.subr.bf16.mxu1 %v6948_v40 }
 0x292   : > { %5037 = vmatpush1.bf16.msra.mxu0 %v6943_v41 }
 0x293   : > { %5078 = vmatpush1.bf16.msra.mxu1 %v6946_v42  ;;  %5038 = vmatprep.subr.bf16.mxu0 %v6951_v43 }
 0x294   : > { %5079 = vmatprep.subr.bf16.mxu1 %v6954_v45 }
 0x296   : > { %5039 = vmatpush1.bf16.msra.mxu0 %v6949_v18 }
 0x297   : > { %5080 = vmatpush1.bf16.msra.mxu1 %v6952_v46  ;;  %5040 = vmatprep.subr.bf16.mxu0 %v6957_v51 }
 0x298   : > { %5081 = vmatprep.subr.bf16.mxu1 %v6960_v52 }
 0x29a   : > { %5041 = vmatpush2.bf16.msra.mxu0 %v6955_v30 }
 0x29b   : > { %5082 = vmatpush2.bf16.msra.mxu1 %v6958_v31  ;;  %5042 = vmatprep.subr.bf16.mxu0 %v6963_v29 }
 0x29c   : > { %5083 = vmatprep.subr.bf16.mxu1 %v6966_v53 }
 0x29e   : > { %5043 = vmatpush2.bf16.msra.mxu0 %v6961_v54 }
 0x29f   : > { %5084 = vmatpush2.bf16.msra.mxu1 %v6964_v56  ;;  %5044 = vmatprep.subr.bf16.mxu0 %v6969_v59 }
 0x2a0   : > { %5085 = vmatprep.subr.bf16.mxu1 %v6972_v60 }
 0x2a2   : > { %5045 = vmatpush2.bf16.msra.mxu0 %v6967_v34 }
 0x2a3   : > { %5086 = vmatpush2.bf16.msra.mxu1 %v6970_v35  ;;  %5046 = vmatprep.subr.bf16.mxu0 %v6975_v61 }
 0x2a4   : > { %5087 = vmatprep.subr.bf16.mxu1 %v6978_v62 }
 0x2a6   : > { %5047 = vmatpush2.bf16.msra.mxu0 %v6973_v63 }
 0x2a7   : > { %5088 = vmatpush2.bf16.msra.mxu1 %v6976_v1  ;;  %5048 = vmatprep.subr.bf16.mxu0 %v6981_v44 }
 0x2a8   : > { %5089 = vmatprep.subr.bf16.mxu1 %v6984_v2 }
 0x2aa   : > { %5049 = vmatpush2.bf16.msra.mxu0 %v6979_v7 }
 0x2ab   : > { %5090 = vmatpush2.bf16.msra.mxu1 %v6982_v8  ;;  %5050 = vmatprep.subr.bf16.mxu0 %v6987_v48 }
 0x2ac   : > { %5091 = vmatprep.subr.bf16.mxu1 %v6990_v49 }
 0x2ae   : > { %5051 = vmatpush2.bf16.msra.mxu0 %v6985_v47 }
 0x2af   : > { %5092 = vmatpush2.bf16.msra.mxu1 %v6988_v9  ;;  %5052 = vmatprep.subr.bf16.mxu0 %v6993_v50 }
 0x2b0   : > { %5093 = vmatprep.subr.bf16.mxu1 %v6996_v10 }
 0x2b2   : > { %5053 = vmatpush2.bf16.msra.mxu0 %v6991_v55 }
 0x2b3   : > { %5094 = vmatpush2.bf16.msra.mxu1 %v6994_v14  ;;  %5054 = vmatprep.subr.bf16.mxu0 %v6999_v57 }
 0x2b4   : > { %5095 = vmatprep.subr.bf16.mxu1 %v7002_v58 }
 0x2b6   : > { %5055 = vmatpush2.bf16.msra.mxu0 %v6997_v15 }
 0x2b7   : > { %5096 = vmatpush2.bf16.msra.mxu1 %v7000_v16 }
 0x2b9   : > { %v4812_v0 = vpop.f32.mrf.mxu0  ;;  %5057 = vmatmul.mubr.bf16.vlgmr.msra.gmra.mxu0 %v5294_v17 }
 0x2ba   : > { %v4853_v23 = vpop.f32.mrf.mxu1  ;;  %5098 = vmatmul.mubr.bf16.vlgmr.msra.gmra.mxu1 %v5296_v22  ;;  %v4813_v26 = vadd.f32 %v4812_v0, %v8025_v20 }
 0x2bb   : > { %v4814_v27 = vpop.f32.mrf.mxu0 }
 0x2bc   : > { %v4855_v19 = vpop.f32.mrf.mxu1  ;;  %v4854_v6 = vadd.f32 %v4853_v23, %v4813_v26  ;;  %v4815_v3 = vadd.f32 %v4814_v27, %v8028_v25 }
 0x2bd   : > { %v4816_v28 = vpop.f32.mrf.mxu0 }
 0x2be   : > { %v4857_v32 = vpop.f32.mrf.mxu1  ;;  %v4856_v33 = vadd.f32 %v4855_v19, %v4815_v3 }
 0x2bf   : > { %v4817_v4 = vpop.f32.mrf.mxu0 }
 0x2c0   : > { %v4858_v12 = vpop.f32.mrf.mxu1 }
 0x2f9   : > { %v4894_v13 = vpop.f32.mrf.mxu0 }
 0x2fa   : > { %v4935_v5 = vpop.f32.mrf.mxu1  ;;  %v4895_v11 = vadd.f32 %v4894_v13, %v4854_v6 }
 0x2fb   : > { %v4896_v36 = vpop.f32.mrf.mxu0 }
 0x2fc   : > { %v4937_v37 = vpop.f32.mrf.mxu1  ;;  %v4936_v21 = vadd.f32 %v4935_v5, %v4895_v11  ;;  %v4897_v24 = vadd.f32 %v4896_v36, %v4856_v33 }
 0x2fd   : > { %v4898_v38 = vpop.f32.mrf.mxu0 }
 0x2fe   : > { %v4939_v20 = vpop.f32.mrf.mxu1  ;;  %v4938_v39 = vadd.f32 %v4937_v37, %v4897_v24 }
 0x2ff   : > { %v4899_v40 = vpop.f32.mrf.mxu0 }
 0x300   : > { %v4940_v41 = vpop.f32.mrf.mxu1 }
 0x339   : > { %v4976_v42 = vpop.f32.mrf.mxu0 }
 0x33a   : > { %v5017_v25 = vpop.f32.mrf.mxu1  ;;  %v4977_v30 = vadd.f32 %v4976_v42, %v4936_v21 }
 0x33b   : > { %v4978_v43 = vpop.f32.mrf.mxu0 }
 0x33c   : > { %v5019_v45 = vpop.f32.mrf.mxu1  ;;  %v4979_v31 = vadd.f32 %v4978_v43, %v4938_v39  ;;  %v5018_v29 = vadd.f32 %v5017_v25, %v4977_v30 }
 0x33d   : > { %v4980_v18 = vpop.f32.mrf.mxu0 }
 0x33e   : > { %v5021_v46 = vpop.f32.mrf.mxu1  ;;  %v5020_v56 = vadd.f32 %v5019_v45, %v4979_v31 }
 0x33f   : > { %v4981_v51 = vpop.f32.mrf.mxu0 }
 0x340   : > { %v5022_v52 = vpop.f32.mrf.mxu1 }
 0x379   : > { %v5058_v53 = vpop.f32.mrf.mxu0 }
 0x37a   : > { %v5099_v54 = vpop.f32.mrf.mxu1  ;;  %v5059_v59 = vadd.f32 %v5058_v53, %v5018_v29 }
 0x37b   : > { %v5060_v60 = vpop.f32.mrf.mxu0 }
 0x37c   : > { %v5101_v34 = vpop.f32.mrf.mxu1  ;;  %v5100_v35 = vadd.f32 %v5099_v54, %v5059_v59  ;;  %v5061_v61 = vadd.f32 %v5060_v60, %v5020_v56 }
 0x37d   : > { %v5062_v62 = vpop.f32.mrf.mxu0 }
 0x37e   : > { %v5103_v63 = vpop.f32.mrf.mxu1  ;;  %vm5106_vm0 = vcmp.ge.f32.partialorder %v5100_v35, 0.0  ;;  %v5108_v1 = vmul.f32 0.1, %v5100_v35  ;;  %v5102_v44 = vadd.f32 %v5101_v34, %v5061_v61 }
 0x37f   : > { %v5063_v2 = vpop.f32.mrf.mxu0 }
 0x380   : > { %v5104_v7 = vpop.f32.mrf.mxu1  ;;  %v5110_v8 = vsel %vm5106_vm0, %v5100_v35, %v5108_v1  ;;  %vm5107_vm1 = vcmp.ge.f32.partialorder %v5102_v44, 0.0  ;;  %v5109_v48 = vmul.f32 0.1, %v5102_v44 }
 0x381   : > { %5112 = vst [vmem:[%s272_s15] sm:$0xff] %v5110_v8 }
 0x382   : > { %v5111_v49 = vsel %vm5107_vm1, %v5102_v44, %v5109_v48 }
 0x383   : > { %5113 = vst [vmem:[%s272_s15 + $0x8] sm:$0xff] %v5111_v49 }
 0x384 PF: > { %s19_s17 = sadd.s32 1, %s7117_s17   ;;  %s8119_s12 = smov %s7101_s13 }
 0x385   : > { %p16_p9 = scmp.ge.s32.totalorder %s19_s17, 6   ;;  %s8120_s13 = smov %s7105_s14 }
 0x386   : > { %s8121_s14 = smov %s7189_s23  ;;  %s8122_s15 = smov %s7113_s16 }
 0x387   : > { %s8123_s16 = smov %s8125_s19  ;;  %18 = sbr.rel (!%p16_p9) target bundleno = 6 (0x6), region = 88 }
 0x38c   :  { %5144 = vsyncpa [#allocation3], 1 }
 0x38d   :  { %5146 = vsyncpa [#allocation3 + $0x1], 1 }
 0x38e   :  { %5147 = vsyncpa [#allocation5], 1 }
 0x38f   :  { %5149 = vsyncpa [#allocation5 + $0x1], 1 }

</bundles_post_ra>
